<compile_context>
chip_gen: v7x
topology: tpu7x:2x2x1
jax: 0.10.0
libtpu: 0.0.40
codegen_flags: <defaults>
</compile_context>

<pallas_src>
import functools

import jax
import jax.numpy as jnp
from jax import lax
from jax.experimental import pallas as pl
from jax.experimental.pallas import tpu as pltpu


_VMEM_LIMIT = 32 * 1024 * 1024  # explicit scoped-VMEM budget (safe on v5e/v6e/v7x)


# ----------------------------------------------------------------------------
# Pallas kernel 1: fused (tiled) matmul + bias + activation
#   grid = (M tiles, N tiles, K tiles); K is the reduction axis (innermost),
#   accumulated in an f32 VMEM scratch; bias + activation fused in the
#   k == last epilogue.  Operands are bf16 -> MXU, accumulate in f32.
# ----------------------------------------------------------------------------
def _stable_sigmoid(x):
    # exp() only of non-positive arguments (no inf intermediate); reciprocal
    # keeps the result strictly inside [0, 1].
    z = jnp.exp(-jnp.abs(x))
    pos = pl.reciprocal(1.0 + z)            # sigmoid(x) for x >= 0
    return jnp.where(x >= 0, pos, 1.0 - pos)


def _mm_act_kernel(x_ref, w_ref, b_ref, o_ref, acc_ref, *, activation):
    @pl.when(pl.program_id(2) == 0)
    def _():
        acc_ref[...] = jnp.zeros_like(acc_ref)

    acc_ref[...] += jnp.dot(x_ref[...], w_ref[...],
                            preferred_element_type=jnp.float32)

    @pl.when(pl.program_id(2) == pl.num_programs(2) - 1)
    def _():
        acc = acc_ref[...] + b_ref[...]          # (1, tn) broadcast over rows
        if activation == "leaky":
            acc = jnp.where(acc > 0, acc, 0.1 * acc)
        elif activation == "sigmoid":
            acc = _stable_sigmoid(acc)
        o_ref[...] = acc.astype(o_ref.dtype)


def _pick_tile(dim, candidates):
    """Largest candidate that divides dim, else the full dim (single block)."""
    for c in candidates:
        if dim % c == 0:
            return c
    return dim


def matmul_act(x, w, b, activation="none", out_dtype=jnp.bfloat16):
    """(M, K) @ (K, N) + b with fused activation.  bf16 operands, f32 acc."""
    M, K = x.shape
    _, N = w.shape
    # M: at these scales a single full block; otherwise 256-wide tiles with a
    # cdiv grid (Pallas masks out-of-bounds stores for the ragged last block).
    tm = M if M <= 512 else 256
    tn = _pick_tile(N, (512, 256, 128))
    tk = _pick_tile(K, (2048, 1024, 896, 768, 640, 512, 384, 256, 128))
    grid = (pl.cdiv(M, tm), N // tn, K // tk)

    return pl.pallas_call(
        functools.partial(_mm_act_kernel, activation=activation),
        out_shape=jax.ShapeDtypeStruct((M, N), out_dtype),
        grid_spec=pltpu.PrefetchScalarGridSpec(
            num_scalar_prefetch=0,
            grid=grid,
            in_specs=[
                pl.BlockSpec((tm, tk), lambda i, j, k: (i, k)),
                pl.BlockSpec((tk, tn), lambda i, j, k: (k, j)),
                pl.BlockSpec((1, tn), lambda i, j, k: (0, j)),
            ],
            out_specs=pl.BlockSpec((tm, tn), lambda i, j, k: (i, j)),
            scratch_shapes=[pltpu.VMEM((tm, tn), jnp.float32)],
        ),
        compiler_params=pltpu.CompilerParams(
            dimension_semantics=("parallel", "parallel", "arbitrary"),
            vmem_limit_bytes=_VMEM_LIMIT,
        ),
    )(x.astype(jnp.bfloat16), w, b.reshape(1, N))


# ----------------------------------------------------------------------------
# Pallas kernel 2: fused 3x3 'same' conv (stride 1) + folded-BN bias + leaky
#   grid = (batch,).  Reads the padded NHWC image directly (no im2col); the
#   9 taps are accumulated per output row as (Wo, C) @ (C, N) MXU matmuls.
#   Weights are stored as (9, C, N): one (C, N) matrix per tap.
# ----------------------------------------------------------------------------
def _conv3x3_leaky_kernel(x_ref, w_ref, b_ref, o_ref):
    _, Ho, Wo, N = o_ref.shape
    bias = b_ref[...]                                     # (1, N) f32

    def row_body(r, carry):
        acc = jnp.zeros((Wo, N), jnp.float32)
        for di in range(3):
            for dj in range(3):
                xs = x_ref[0, r + di, pl.ds(dj, Wo), :]   # (Wo, C) bf16
                acc += jnp.dot(xs, w_ref[di * 3 + dj],
                               preferred_element_type=jnp.float32)
        acc = acc + bias
        acc = jnp.where(acc > 0, acc, 0.1 * acc)          # LeakyReLU(0.1)
        o_ref[0, r] = acc.astype(o_ref.dtype)
        return carry

    lax.fori_loop(0, Ho, row_body, 0)


def conv3x3_same_leaky(x_nhwc, w9, b):
    """ConvBlock(3x3, stride 1, 'same'): conv + folded-BN bias + LeakyReLU."""
    B, H, W, C = x_nhwc.shape
    N = w9.shape[-1]
    xp = jnp.pad(x_nhwc, ((0, 0), (1, 1), (1, 1), (0, 0)))   # halo only (cheap)
    Hp, Wp = H + 2, W + 2
    # NOTE: the weight/bias blocks are grid-invariant; at real scale they could
    # additionally be single-buffered via pipeline_mode=pl.Buffered(1) to save
    # VMEM — unnecessary at these sizes.
    return pl.pallas_call(
        _conv3x3_leaky_kernel,
        out_shape=jax.ShapeDtypeStruct((B, H, W, N), jnp.bfloat16),
        grid_spec=pltpu.PrefetchScalarGridSpec(
            num_scalar_prefetch=0,
            grid=(B,),
            in_specs=[
                pl.BlockSpec((1, Hp, Wp, C), lambda bi: (bi, 0, 0, 0)),
                pl.BlockSpec((9, C, N), lambda bi: (0, 0, 0)),
                pl.BlockSpec((1, N), lambda bi: (0, 0)),
            ],
            out_specs=pl.BlockSpec((1, H, W, N), lambda bi: (bi, 0, 0, 0)),
        ),
        compiler_params=pltpu.CompilerParams(
            dimension_semantics=("parallel",),
            vmem_limit_bytes=_VMEM_LIMIT,
        ),
    )(xp, w9, b.reshape(1, N))


# ----------------------------------------------------------------------------
# Glue: patchify "im2col" for the backbone stub (stride == kernel, so every
# input element appears exactly once -> no traffic inflation; kept in bf16).
# ----------------------------------------------------------------------------
def patchify_im2col(x_nhwc, patch):
    B, H, W, C = x_nhwc.shape
    Ho, Wo = H // patch, W // patch
    x = x_nhwc.reshape(B, Ho, patch, Wo, patch, C)
    x = jnp.transpose(x, (0, 1, 3, 2, 4, 5))          # (B, Ho, Wo, p, p, C)
    return x.reshape(B * Ho * Wo, patch * patch * C), (B, Ho, Wo)


# ----------------------------------------------------------------------------
# Parameter init (deterministic, synthetic); bf16 weights, f32 biases.
# ----------------------------------------------------------------------------
def init_params(key, in_ch=3, feat_ch=128, patch=4, num_patches=7,
                num_bboxes=2, num_classes=20, hidden=256):
    outs = num_bboxes * 5 + num_classes               # 30
    S = num_patches
    keys = jax.random.split(key, 8)

    def dense(k, kin, kout, kout_pad=None):
        kp = kout if kout_pad is None else kout_pad
        scale = 1.0 / jnp.sqrt(jnp.float32(kin))
        w = scale * jax.random.normal(k, (kin, kout), jnp.float32)
        b = 0.01 * jax.random.normal(jax.random.fold_in(k, 1), (kout,), jnp.float32)
        if kp != kout:                                # lane-dense N padding
            w = jnp.pad(w, ((0, 0), (0, kp - kout)))
            b = jnp.pad(b, (0, kp - kout))
        return w.astype(jnp.bfloat16), b              # bias stays f32

    def conv_w(k):
        scale = 1.0 / jnp.sqrt(jnp.float32(9 * feat_ch))
        w = scale * jax.random.normal(k, (9, feat_ch, feat_ch), jnp.float32)
        b = 0.01 * jax.random.normal(jax.random.fold_in(k, 1), (feat_ch,), jnp.float32)
        return w.astype(jnp.bfloat16), b

    p = {}
    # backbone stub: patchify conv (patch x patch, stride patch), in_ch -> feat_ch
    p["bb"] = dense(keys[0], patch * patch * in_ch, feat_ch)
    # 4 head ConvBlocks, 3x3, feat_ch -> feat_ch; weights as (9, C, N) taps
    p["conv"] = [conv_w(keys[1 + i]) for i in range(4)]
    # connection Linear(feat_ch * S * S, hidden): rows laid out for the NHWC
    # flatten (a pretrained NCHW-ordered weight would be row-permuted once here).
    p["fc1"] = dense(keys[5], feat_ch * S * S, hidden)
    # prediction Linear(hidden, outs * S * S), N padded to a multiple of 128
    n_pred = outs * S * S                             # 1470
    n_pred_pad = ((n_pred + 127) // 128) * 128        # 1536 (lane-dense)
    p["fc2"] = dense(keys[6], hidden, n_pred, kout_pad=n_pred_pad)

    cfg = dict(patch=patch, num_patches=S, num_bboxes=num_bboxes,
               num_classes=num_classes, outs=outs)
    return p, cfg


# ----------------------------------------------------------------------------
# decode (plain JAX, standard YOLOv1 semantics, no NMS)
# ----------------------------------------------------------------------------
def decode_grid(x, num_bboxes, num_classes):
    """x: (S, S, B*5 + C) -> boxes (S*S*B, 4), labels (S*S*B,), scores (S*S*B,)."""
    S = x.shape[0]
    cls = x[..., num_bboxes * 5:]
    best_cls_p = jnp.max(cls, axis=-1)                   # (S, S)
    label = jnp.argmax(cls, axis=-1).astype(jnp.int32)   # (S, S)
    row = jnp.arange(S, dtype=jnp.float32).reshape(S, 1)
    col = jnp.arange(S, dtype=jnp.float32).reshape(1, S)
    boxes, labels, scores = [], [], []
    for b in range(num_bboxes):
        off = b * 5
        cx = (col + x[..., off + 0]) / S
        cy = (row + x[..., off + 1]) / S
        w = x[..., off + 2]
        h = x[..., off + 3]
        conf = x[..., off + 4]
        box = jnp.stack([cx - w / 2, cy - h / 2, cx + w / 2, cy + h / 2], -1)
        boxes.append(box.reshape(S * S, 4))
        labels.append(label.reshape(S * S))
        scores.append((conf * best_cls_p).reshape(S * S))
    return (jnp.concatenate(boxes, 0),
            jnp.concatenate(labels, 0),
            jnp.concatenate(scores, 0))


# ----------------------------------------------------------------------------
# Full forward (encode + decode)
# ----------------------------------------------------------------------------
def yolo_forward(params, cfg, x_nchw):
    S = cfg["num_patches"]
    outs = cfg["outs"]
    B = x_nchw.shape[0]

    # NCHW (PyTorch) -> NHWC, cast once to bf16 (halves activation HBM traffic)
    x = jnp.transpose(x_nchw, (0, 2, 3, 1)).astype(jnp.bfloat16)

    # backbone stub: patchify conv + leaky  -> (B, 2S, 2S, C)
    w, b = params["bb"]
    cols, (Bsz, Ho, Wo) = patchify_im2col(x, cfg["patch"])
    x = matmul_act(cols, w, b, activation="leaky").reshape(Bsz, Ho, Wo, -1)

    # head ConvBlocks (fused 3x3 taps in-kernel, no im2col materialization)
    w, b = params["conv"][0]
    x = conv3x3_same_leaky(x, w, b)                       # (B, 2S, 2S, C)
    w, b = params["conv"][1]
    # 3x3 / stride 2 / pad 1 == same-conv output sampled at even positions.
    x = conv3x3_same_leaky(x, w, b)[:, ::2, ::2, :]       # (B, S, S, C)
    # TODO(synk): at production channel counts fold the stride-2 subsample into
    # the kernel's tap slices instead of computing the full-resolution conv.
    w, b = params["conv"][2]
    x = conv3x3_same_leaky(x, w, b)
    w, b = params["conv"][3]
    x = conv3x3_same_leaky(x, w, b)

    # flatten directly in NHWC order (fc1 weight rows match this layout)
    x = x.reshape(B, -1)

    # connection Linear, prediction Linear + fused stable sigmoid
    w, b = params["fc1"]
    x = matmul_act(x, w, b, activation="none")
    w, b = params["fc2"]
    x = matmul_act(x, w, b, activation="sigmoid", out_dtype=jnp.float32)
    x = x[:, : outs * S * S]                  # drop lane-padding columns

    # Rearrange 'b (p1 p2 o) -> b p1 p2 o'
    x = x.reshape(B, S, S, outs)

    # decode (per-image, batched with vmap)
    boxes, labels, scores = jax.vmap(
        lambda g: decode_grid(g, cfg["num_bboxes"], cfg["num_classes"])
    )(x)
    return boxes, labels, scores


if __name__ == "__main__":
    key = jax.random.PRNGKey(0)
    pkey, xkey = jax.random.split(key)

    params, cfg = init_params(pkey)

    # small input: (batch=2, 3, 56, 56)  (scaled-down stand-in for 448x448)
    x = jax.random.normal(xkey, (2, 3, 56, 56), jnp.float32)

    fwd = jax.jit(functools.partial(yolo_forward, params, cfg))
    boxes, labels, scores = fwd(x)
    jax.block_until_ready((boxes, labels, scores))

    S, nb = cfg["num_patches"], cfg["num_bboxes"]
    assert boxes.shape == (2, S * S * nb, 4)
    assert labels.shape == (2, S * S * nb)
    assert scores.shape == (2, S * S * nb)
    assert bool(jnp.all(jnp.isfinite(boxes)))
    assert bool(jnp.all((scores >= 0) & (scores <= 1)))

    print("KERNEL_OK")
</pallas_src>

<mosaic_0001>
module attributes {stable_mosaic.version = 11 : i64} {
  func.func @_mm_act_kernel(%arg0: i32, %arg1: i32, %arg2: i32, %arg3: memref<392x48xbf16, #tpu.memory_space<vmem>>, %arg4: memref<48x128xbf16, #tpu.memory_space<vmem>>, %arg5: memref<1x128xf32, #tpu.memory_space<vmem>>, %arg6: memref<392x128xbf16, #tpu.memory_space<vmem>>, %arg7: memref<392x128xf32, #tpu.memory_space<vmem>>) attributes {dimension_semantics = [#tpu.dimension_semantics<parallel>, #tpu.dimension_semantics<parallel>, #tpu.dimension_semantics<arbitrary>], iteration_bounds = array<i64: 1, 1, 1>, scalar_prefetch = 0 : i64, scratch_operands = 1 : i64, tpu.core_type = #tpu.core_type<tc>, window_params = [{transform_indices = @transform_0, window_bounds = array<i64: 392, 48>}, {transform_indices = @transform_1, window_bounds = array<i64: 48, 128>}, {transform_indices = @transform_2, window_bounds = array<i64: 1, 128>}, {transform_indices = @transform_3, window_bounds = array<i64: 392, 128>}]} {
    %c0_i32 = arith.constant 0 : i32
    %0 = arith.cmpi eq, %arg2, %c0_i32 : i32
    %1 = arith.extui %0 : i1 to i32
    %c0_i32_0 = arith.constant 0 : i32
    %2 = arith.cmpi ne, %1, %c0_i32_0 : i32
    scf.if %2 {
      %cst_10 = arith.constant 0.000000e+00 : f32
      %12 = vector.broadcast %cst_10 : f32 to vector<392x128xf32>
      %c0_11 = arith.constant 0 : index
      %c0_12 = arith.constant 0 : index
      %13 = vector.load %arg7[%c0_11, %c0_12] : memref<392x128xf32, #tpu.memory_space<vmem>>, vector<392x128xf32>
      tpu.vector_store %arg7[%c0_11, %c0_12], %12 {strides = array<i32>} : memref<392x128xf32, #tpu.memory_space<vmem>>, vector<392x128xf32>,
    } else {
    }
    %c0 = arith.constant 0 : index
    %c0_1 = arith.constant 0 : index
    %3 = vector.load %arg7[%c0, %c0_1] : memref<392x128xf32, #tpu.memory_space<vmem>>, vector<392x128xf32>
    %c0_2 = arith.constant 0 : index
    %c0_3 = arith.constant 0 : index
    %4 = vector.load %arg3[%c0_2, %c0_3] : memref<392x48xbf16, #tpu.memory_space<vmem>>, vector<392x48xbf16>
    %c0_4 = arith.constant 0 : index
    %c0_5 = arith.constant 0 : index
    %5 = vector.load %arg4[%c0_4, %c0_5] : memref<48x128xbf16, #tpu.memory_space<vmem>>, vector<48x128xbf16>
    %cst = arith.constant dense<0.000000e+00> : vector<392x128xf32>
    %6 = tpu.matmul %4, %5, %cst {dimension_numbers = #tpu.dot_dimension_numbers<[1], [0], [0], [1], [0, 0, 1, 1], [], []>} : vector<392x48xbf16>, vector<48x128xbf16>, vector<392x128xf32> -> vector<392x128xf32>
    %7 = arith.addf %3, %6 : vector<392x128xf32>
    %c0_6 = arith.constant 0 : index
    %c0_7 = arith.constant 0 : index
    %8 = vector.load %arg7[%c0_6, %c0_7] : memref<392x128xf32, #tpu.memory_space<vmem>>, vector<392x128xf32>
    tpu.vector_store %arg7[%c0_6, %c0_7], %7 {strides = array<i32>} : memref<392x128xf32, #tpu.memory_space<vmem>>, vector<392x128xf32>,
    %c0_i32_8 = arith.constant 0 : i32
    %9 = arith.cmpi eq, %arg2, %c0_i32_8 : i32
    %10 = arith.extui %9 : i1 to i32
    %c0_i32_9 = arith.constant 0 : i32
    %11 = arith.cmpi ne, %10, %c0_i32_9 : i32
    scf.if %11 {
      %c0_10 = arith.constant 0 : index
      %c0_11 = arith.constant 0 : index
      %12 = vector.load %arg7[%c0_10, %c0_11] : memref<392x128xf32, #tpu.memory_space<vmem>>, vector<392x128xf32>
      %c0_12 = arith.constant 0 : index
      %c0_13 = arith.constant 0 : index
      %13 = vector.load %arg5[%c0_12, %c0_13] : memref<1x128xf32, #tpu.memory_space<vmem>>, vector<1x128xf32>
      %14 = vector.broadcast %13 : vector<1x128xf32> to vector<392x128xf32>
      %15 = arith.addf %12, %14 : vector<392x128xf32>
      %cst_14 = arith.constant 0.000000e+00 : f32
      %16 = vector.broadcast %cst_14 : f32 to vector<392x128xf32>
      %17 = arith.cmpf ogt, %15, %16 : vector<392x128xf32>
      %cst_15 = arith.constant 1.000000e-01 : f32
      %18 = vector.broadcast %cst_15 : f32 to vector<392x128xf32>
      %19 = arith.mulf %18, %15 : vector<392x128xf32>
      %20 = arith.select %17, %15, %19 : vector<392x128xi1>, vector<392x128xf32>
      %21 = arith.truncf %20 : vector<392x128xf32> to vector<392x128xbf16>
      %c0_16 = arith.constant 0 : index
      %c0_17 = arith.constant 0 : index
      %22 = vector.load %arg6[%c0_16, %c0_17] : memref<392x128xbf16, #tpu.memory_space<vmem>>, vector<392x128xbf16>
      tpu.vector_store %arg6[%c0_16, %c0_17], %21 {strides = array<i32>} : memref<392x128xbf16, #tpu.memory_space<vmem>>, vector<392x128xbf16>,
    } else {
    }
    return
  }
  func.func @transform_0(%arg0: i32, %arg1: i32, %arg2: i32) -> (i32, i32) {
    %c0_i32 = arith.constant 0 : i32
    return %arg0, %arg2 : i32, i32
  }
  func.func @transform_1(%arg0: i32, %arg1: i32, %arg2: i32) -> (i32, i32) {
    %c0_i32 = arith.constant 0 : i32
    return %arg2, %arg1 : i32, i32
  }
  func.func @transform_2(%arg0: i32, %arg1: i32, %arg2: i32) -> (i32, i32) {
    %c0_i32 = arith.constant 0 : i32
    %c0_i32_0 = arith.constant 0 : i32
    return %c0_i32, %arg1 : i32, i32
  }
  func.func @transform_3(%arg0: i32, %arg1: i32, %arg2: i32) -> (i32, i32) {
    %c0_i32 = arith.constant 0 : i32
    return %arg0, %arg1 : i32, i32
  }
}

module attributes {stable_mosaic.version = 11 : i64} {
  func.func @_conv3x3_leaky_kernel(%arg0: i32, %arg1: memref<1x16x16x128xbf16, #tpu.memory_space<vmem>>, %arg2: memref<9x128x128xbf16, #tpu.memory_space<vmem>>, %arg3: memref<1x128xf32, #tpu.memory_space<vmem>>, %arg4: memref<1x14x14x128xbf16, #tpu.memory_space<vmem>>) attributes {dimension_semantics = [#tpu.dimension_semantics<parallel>], iteration_bounds = array<i64: 2>, scalar_prefetch = 0 : i64, scratch_operands = 0 : i64, tpu.core_type = #tpu.core_type<tc>, window_params = [{transform_indices = @transform_0, window_bounds = array<i64: 1, 16, 16, 128>}, {pipeline_mode = #tpu.pipeline_mode<synchronous>, transform_indices = @transform_1, window_bounds = array<i64: 9, 128, 128>}, {pipeline_mode = #tpu.pipeline_mode<synchronous>, transform_indices = @transform_2, window_bounds = array<i64: 1, 128>}, {transform_indices = @transform_3, window_bounds = array<i64: 1, 14, 14, 128>}]} {
    %c0 = arith.constant 0 : index
    %c0_0 = arith.constant 0 : index
    %0 = vector.load %arg3[%c0, %c0_0] : memref<1x128xf32, #tpu.memory_space<vmem>>, vector<1x128xf32>
    %c0_i32 = arith.constant 0 : i32
    %c14_i32 = arith.constant 14 : i32
    %1 = arith.addi %c0_i32, %c14_i32 : i32
    %c1_i32 = arith.constant 1 : i32
    scf.for %arg5 = %c0_i32 to %1 step %c1_i32  : i32 {
      %cst = arith.constant 0.000000e+00 : f32
      %2 = vector.broadcast %cst : f32 to vector<14x128xf32>
      %c0_i32_2 = arith.constant 0 : i32
      %3 = arith.addi %arg5, %c0_i32_2 : i32
      %c0_3 = arith.constant 0 : index
      %4 = arith.index_cast %3 : i32 to index
      %c0_4 = arith.constant 0 : index
      %c0_5 = arith.constant 0 : index
      %5 = vector.load %arg1[%c0_3, %4, %c0_4, %c0_5] : memref<1x16x16x128xbf16, #tpu.memory_space<vmem>>, vector<1x1x14x128xbf16>
      %6 = vector.shape_cast %5 : vector<1x1x14x128xbf16> to vector<14x128xbf16>
      %c0_6 = arith.constant 0 : index
      %c0_7 = arith.constant 0 : index
      %c0_8 = arith.constant 0 : index
      %7 = vector.load %arg2[%c0_6, %c0_7, %c0_8] : memref<9x128x128xbf16, #tpu.memory_space<vmem>>, vector<1x128x128xbf16>
      %8 = vector.shape_cast %7 : vector<1x128x128xbf16> to vector<128x128xbf16>
      %cst_9 = arith.constant dense<0.000000e+00> : vector<14x128xf32>
      %9 = tpu.matmul %6, %8, %cst_9 {dimension_numbers = #tpu.dot_dimension_numbers<[1], [0], [0], [1], [0, 0, 1, 1], [], []>} : vector<14x128xbf16>, vector<128x128xbf16>, vector<14x128xf32> -> vector<14x128xf32>
      %10 = arith.addf %2, %9 : vector<14x128xf32>
      %c0_i32_10 = arith.constant 0 : i32
      %11 = arith.addi %arg5, %c0_i32_10 : i32
      %c0_11 = arith.constant 0 : index
      %12 = arith.index_cast %11 : i32 to index
      %c1 = arith.constant 1 : index
      %c0_12 = arith.constant 0 : index
      %13 = vector.load %arg1[%c0_11, %12, %c1, %c0_12] : memref<1x16x16x128xbf16, #tpu.memory_space<vmem>>, vector<1x1x14x128xbf16>
      %14 = vector.shape_cast %13 : vector<1x1x14x128xbf16> to vector<14x128xbf16>
      %c1_13 = arith.constant 1 : index
      %c0_14 = arith.constant 0 : index
      %c0_15 = arith.constant 0 : index
      %15 = vector.load %arg2[%c1_13, %c0_14, %c0_15] : memref<9x128x128xbf16, #tpu.memory_space<vmem>>, vector<1x128x128xbf16>
      %16 = vector.shape_cast %15 : vector<1x128x128xbf16> to vector<128x128xbf16>
      %cst_16 = arith.constant dense<0.000000e+00> : vector<14x128xf32>
      %17 = tpu.matmul %14, %16, %cst_16 {dimension_numbers = #tpu.dot_dimension_numbers<[1], [0], [0], [1], [0, 0, 1, 1], [], []>} : vector<14x128xbf16>, vector<128x128xbf16>, vector<14x128xf32> -> vector<14x128xf32>
      %18 = arith.addf %10, %17 : vector<14x128xf32>
      %c0_i32_17 = arith.constant 0 : i32
      %19 = arith.addi %arg5, %c0_i32_17 : i32
      %c0_18 = arith.constant 0 : index
      %20 = arith.index_cast %19 : i32 to index
      %c2 = arith.constant 2 : index
      %c0_19 = arith.constant 0 : index
      %21 = vector.load %arg1[%c0_18, %20, %c2, %c0_19] : memref<1x16x16x128xbf16, #tpu.memory_space<vmem>>, vector<1x1x14x128xbf16>
      %22 = vector.shape_cast %21 : vector<1x1x14x128xbf16> to vector<14x128xbf16>
      %c2_20 = arith.constant 2 : index
      %c0_21 = arith.constant 0 : index
      %c0_22 = arith.constant 0 : index
      %23 = vector.load %arg2[%c2_20, %c0_21, %c0_22] : memref<9x128x128xbf16, #tpu.memory_space<vmem>>, vector<1x128x128xbf16>
      %24 = vector.shape_cast %23 : vector<1x128x128xbf16> to vector<128x128xbf16>
      %cst_23 = arith.constant dense<0.000000e+00> : vector<14x128xf32>
      %25 = tpu.matmul %22, %24, %cst_23 {dimension_numbers = #tpu.dot_dimension_numbers<[1], [0], [0], [1], [0, 0, 1, 1], [], []>} : vector<14x128xbf16>, vector<128x128xbf16>, vector<14x128xf32> -> vector<14x128xf32>
      %26 = arith.addf %18, %25 : vector<14x128xf32>
      %c1_i32_24 = arith.constant 1 : i32
      %27 = arith.addi %arg5, %c1_i32_24 : i32
      %c0_25 = arith.constant 0 : index
      %28 = arith.index_cast %27 : i32 to index
      %c0_26 = arith.constant 0 : index
      %c0_27 = arith.constant 0 : index
      %29 = vector.load %arg1[%c0_25, %28, %c0_26, %c0_27] : memref<1x16x16x128xbf16, #tpu.memory_space<vmem>>, vector<1x1x14x128xbf16>
      %30 = vector.shape_cast %29 : vector<1x1x14x128xbf16> to vector<14x128xbf16>
      %c3 = arith.constant 3 : index
      %c0_28 = arith.constant 0 : index
      %c0_29 = arith.constant 0 : index
      %31 = vector.load %arg2[%c3, %c0_28, %c0_29] : memref<9x128x128xbf16, #tpu.memory_space<vmem>>, vector<1x128x128xbf16>
      %32 = vector.shape_cast %31 : vector<1x128x128xbf16> to vector<128x128xbf16>
      %cst_30 = arith.constant dense<0.000000e+00> : vector<14x128xf32>
      %33 = tpu.matmul %30, %32, %cst_30 {dimension_numbers = #tpu.dot_dimension_numbers<[1], [0], [0], [1], [0, 0, 1, 1], [], []>} : vector<14x128xbf16>, vector<128x128xbf16>, vector<14x128xf32> -> vector<14x128xf32>
      %34 = arith.addf %26, %33 : vector<14x128xf32>
      %c1_i32_31 = arith.constant 1 : i32
      %35 = arith.addi %arg5, %c1_i32_31 : i32
      %c0_32 = arith.constant 0 : index
      %36 = arith.index_cast %35 : i32 to index
      %c1_33 = arith.constant 1 : index
      %c0_34 = arith.constant 0 : index
      %37 = vector.load %arg1[%c0_32, %36, %c1_33, %c0_34] : memref<1x16x16x128xbf16, #tpu.memory_space<vmem>>, vector<1x1x14x128xbf16>
      %38 = vector.shape_cast %37 : vector<1x1x14x128xbf16> to vector<14x128xbf16>
      %c4 = arith.constant 4 : index
      %c0_35 = arith.constant 0 : index
      %c0_36 = arith.constant 0 : index
      %39 = vector.load %arg2[%c4, %c0_35, %c0_36] : memref<9x128x128xbf16, #tpu.memory_space<vmem>>, vector<1x128x128xbf16>
      %40 = vector.shape_cast %39 : vector<1x128x128xbf16> to vector<128x128xbf16>
      %cst_37 = arith.constant dense<0.000000e+00> : vector<14x128xf32>
      %41 = tpu.matmul %38, %40, %cst_37 {dimension_numbers = #tpu.dot_dimension_numbers<[1], [0], [0], [1], [0, 0, 1, 1], [], []>} : vector<14x128xbf16>, vector<128x128xbf16>, vector<14x128xf32> -> vector<14x128xf32>
      %42 = arith.addf %34, %41 : vector<14x128xf32>
      %c1_i32_38 = arith.constant 1 : i32
      %43 = arith.addi %arg5, %c1_i32_38 : i32
      %c0_39 = arith.constant 0 : index
      %44 = arith.index_cast %43 : i32 to index
      %c2_40 = arith.constant 2 : index
      %c0_41 = arith.constant 0 : index
      %45 = vector.load %arg1[%c0_39, %44, %c2_40, %c0_41] : memref<1x16x16x128xbf16, #tpu.memory_space<vmem>>, vector<1x1x14x128xbf16>
      %46 = vector.shape_cast %45 : vector<1x1x14x128xbf16> to vector<14x128xbf16>
      %c5 = arith.constant 5 : index
      %c0_42 = arith.constant 0 : index
      %c0_43 = arith.constant 0 : index
      %47 = vector.load %arg2[%c5, %c0_42, %c0_43] : memref<9x128x128xbf16, #tpu.memory_space<vmem>>, vector<1x128x128xbf16>
      %48 = vector.shape_cast %47 : vector<1x128x128xbf16> to vector<128x128xbf16>
      %cst_44 = arith.constant dense<0.000000e+00> : vector<14x128xf32>
      %49 = tpu.matmul %46, %48, %cst_44 {dimension_numbers = #tpu.dot_dimension_numbers<[1], [0], [0], [1], [0, 0, 1, 1], [], []>} : vector<14x128xbf16>, vector<128x128xbf16>, vector<14x128xf32> -> vector<14x128xf32>
      %50 = arith.addf %42, %49 : vector<14x128xf32>
      %c2_i32 = arith.constant 2 : i32
      %51 = arith.addi %arg5, %c2_i32 : i32
      %c0_45 = arith.constant 0 : index
      %52 = arith.index_cast %51 : i32 to index
      %c0_46 = arith.constant 0 : index
      %c0_47 = arith.constant 0 : index
      %53 = vector.load %arg1[%c0_45, %52, %c0_46, %c0_47] : memref<1x16x16x128xbf16, #tpu.memory_space<vmem>>, vector<1x1x14x128xbf16>
      %54 = vector.shape_cast %53 : vector<1x1x14x128xbf16> to vector<14x128xbf16>
      %c6 = arith.constant 6 : index
      %c0_48 = arith.constant 0 : index
      %c0_49 = arith.constant 0 : index
      %55 = vector.load %arg2[%c6, %c0_48, %c0_49] : memref<9x128x128xbf16, #tpu.memory_space<vmem>>, vector<1x128x128xbf16>
      %56 = vector.shape_cast %55 : vector<1x128x128xbf16> to vector<128x128xbf16>
      %cst_50 = arith.constant dense<0.000000e+00> : vector<14x128xf32>
      %57 = tpu.matmul %54, %56, %cst_50 {dimension_numbers = #tpu.dot_dimension_numbers<[1], [0], [0], [1], [0, 0, 1, 1], [], []>} : vector<14x128xbf16>, vector<128x128xbf16>, vector<14x128xf32> -> vector<14x128xf32>
      %58 = arith.addf %50, %57 : vector<14x128xf32>
      %c2_i32_51 = arith.constant 2 : i32
      %59 = arith.addi %arg5, %c2_i32_51 : i32
      %c0_52 = arith.constant 0 : index
      %60 = arith.index_cast %59 : i32 to index
      %c1_53 = arith.constant 1 : index
      %c0_54 = arith.constant 0 : index
      %61 = vector.load %arg1[%c0_52, %60, %c1_53, %c0_54] : memref<1x16x16x128xbf16, #tpu.memory_space<vmem>>, vector<1x1x14x128xbf16>
      %62 = vector.shape_cast %61 : vector<1x1x14x128xbf16> to vector<14x128xbf16>
      %c7 = arith.constant 7 : index
      %c0_55 = arith.constant 0 : index
      %c0_56 = arith.constant 0 : index
      %63 = vector.load %arg2[%c7, %c0_55, %c0_56] : memref<9x128x128xbf16, #tpu.memory_space<vmem>>, vector<1x128x128xbf16>
      %64 = vector.shape_cast %63 : vector<1x128x128xbf16> to vector<128x128xbf16>
      %cst_57 = arith.constant dense<0.000000e+00> : vector<14x128xf32>
      %65 = tpu.matmul %62, %64, %cst_57 {dimension_numbers = #tpu.dot_dimension_numbers<[1], [0], [0], [1], [0, 0, 1, 1], [], []>} : vector<14x128xbf16>, vector<128x128xbf16>, vector<14x128xf32> -> vector<14x128xf32>
      %66 = arith.addf %58, %65 : vector<14x128xf32>
      %c2_i32_58 = arith.constant 2 : i32
      %67 = arith.addi %arg5, %c2_i32_58 : i32
      %c0_59 = arith.constant 0 : index
      %68 = arith.index_cast %67 : i32 to index
      %c2_60 = arith.constant 2 : index
      %c0_61 = arith.constant 0 : index
      %69 = vector.load %arg1[%c0_59, %68, %c2_60, %c0_61] : memref<1x16x16x128xbf16, #tpu.memory_space<vmem>>, vector<1x1x14x128xbf16>
      %70 = vector.shape_cast %69 : vector<1x1x14x128xbf16> to vector<14x128xbf16>
      %c8 = arith.constant 8 : index
      %c0_62 = arith.constant 0 : index
      %c0_63 = arith.constant 0 : index
      %71 = vector.load %arg2[%c8, %c0_62, %c0_63] : memref<9x128x128xbf16, #tpu.memory_space<vmem>>, vector<1x128x128xbf16>
      %72 = vector.shape_cast %71 : vector<1x128x128xbf16> to vector<128x128xbf16>
      %cst_64 = arith.constant dense<0.000000e+00> : vector<14x128xf32>
      %73 = tpu.matmul %70, %72, %cst_64 {dimension_numbers = #tpu.dot_dimension_numbers<[1], [0], [0], [1], [0, 0, 1, 1], [], []>} : vector<14x128xbf16>, vector<128x128xbf16>, vector<14x128xf32> -> vector<14x128xf32>
      %74 = arith.addf %66, %73 : vector<14x128xf32>
      %75 = vector.broadcast %0 : vector<1x128xf32> to vector<14x128xf32>
      %76 = arith.addf %74, %75 : vector<14x128xf32>
      %cst_65 = arith.constant 0.000000e+00 : f32
      %77 = vector.broadcast %cst_65 : f32 to vector<14x128xf32>
      %78 = arith.cmpf ogt, %76, %77 : vector<14x128xf32>
      %cst_66 = arith.constant 1.000000e-01 : f32
      %79 = vector.broadcast %cst_66 : f32 to vector<14x128xf32>
      %80 = arith.mulf %79, %76 : vector<14x128xf32>
      %81 = arith.select %78, %76, %80 : vector<14x128xi1>, vector<14x128xf32>
      %82 = arith.truncf %81 : vector<14x128xf32> to vector<14x128xbf16>
      %c0_67 = arith.constant 0 : index
      %83 = arith.index_cast %arg5 : i32 to index
      %c0_68 = arith.constant 0 : index
      %c0_69 = arith.constant 0 : index
      %84 = vector.load %arg4[%c0_67, %83, %c0_68, %c0_69] : memref<1x14x14x128xbf16, #tpu.memory_space<vmem>>, vector<1x1x14x128xbf16>
      %85 = vector.shape_cast %84 : vector<1x1x14x128xbf16> to vector<14x128xbf16>
      %86 = vector.shape_cast %82 : vector<14x128xbf16> to vector<1x1x14x128xbf16>
      tpu.vector_store %arg4[%c0_67, %83, %c0_68, %c0_69], %86 {strides = array<i32>} : memref<1x14x14x128xbf16, #tpu.memory_space<vmem>>, vector<1x1x14x128xbf16>,
    }
    %c14_i32_1 = arith.constant 14 : i32
    return
  }
  func.func @transform_0(%arg0: i32) -> (i32, i32, i32, i32) {
    %c0_i32 = arith.constant 0 : i32
    %c0_i32_0 = arith.constant 0 : i32
    %c0_i32_1 = arith.constant 0 : i32
    %c0_i32_2 = arith.constant 0 : i32
    return %arg0, %c0_i32, %c0_i32_0, %c0_i32_1 : i32, i32, i32, i32
  }
  func.func @transform_1(%arg0: i32) -> (i32, i32, i32) {
    %c0_i32 = arith.constant 0 : i32
    %c0_i32_0 = arith.constant 0 : i32
    %c0_i32_1 = arith.constant 0 : i32
    %c0_i32_2 = arith.constant 0 : i32
    return %c0_i32, %c0_i32_0, %c0_i32_1 : i32, i32, i32
  }
  func.func @transform_2(%arg0: i32) -> (i32, i32) {
    %c0_i32 = arith.constant 0 : i32
    %c0_i32_0 = arith.constant 0 : i32
    %c0_i32_1 = arith.constant 0 : i32
    return %c0_i32, %c0_i32_0 : i32, i32
  }
  func.func @transform_3(%arg0: i32) -> (i32, i32, i32, i32) {
    %c0_i32 = arith.constant 0 : i32
    %c0_i32_0 = arith.constant 0 : i32
    %c0_i32_1 = arith.constant 0 : i32
    %c0_i32_2 = arith.constant 0 : i32
    return %arg0, %c0_i32, %c0_i32_0, %c0_i32_1 : i32, i32, i32, i32
  }
}

module attributes {stable_mosaic.version = 11 : i64} {
  func.func @_conv3x3_leaky_kernel(%arg0: i32, %arg1: memref<1x9x9x128xbf16, #tpu.memory_space<vmem>>, %arg2: memref<9x128x128xbf16, #tpu.memory_space<vmem>>, %arg3: memref<1x128xf32, #tpu.memory_space<vmem>>, %arg4: memref<1x7x7x128xbf16, #tpu.memory_space<vmem>>) attributes {dimension_semantics = [#tpu.dimension_semantics<parallel>], iteration_bounds = array<i64: 2>, scalar_prefetch = 0 : i64, scratch_operands = 0 : i64, tpu.core_type = #tpu.core_type<tc>, window_params = [{transform_indices = @transform_0, window_bounds = array<i64: 1, 9, 9, 128>}, {pipeline_mode = #tpu.pipeline_mode<synchronous>, transform_indices = @transform_1, window_bounds = array<i64: 9, 128, 128>}, {pipeline_mode = #tpu.pipeline_mode<synchronous>, transform_indices = @transform_2, window_bounds = array<i64: 1, 128>}, {transform_indices = @transform_3, window_bounds = array<i64: 1, 7, 7, 128>}]} {
    %c0 = arith.constant 0 : index
    %c0_0 = arith.constant 0 : index
    %0 = vector.load %arg3[%c0, %c0_0] : memref<1x128xf32, #tpu.memory_space<vmem>>, vector<1x128xf32>
    %c0_i32 = arith.constant 0 : i32
    %c7_i32 = arith.constant 7 : i32
    %1 = arith.addi %c0_i32, %c7_i32 : i32
    %c1_i32 = arith.constant 1 : i32
    scf.for %arg5 = %c0_i32 to %1 step %c1_i32  : i32 {
      %cst = arith.constant 0.000000e+00 : f32
      %2 = vector.broadcast %cst : f32 to vector<7x128xf32>
      %c0_i32_2 = arith.constant 0 : i32
      %3 = arith.addi %arg5, %c0_i32_2 : i32
      %c0_3 = arith.constant 0 : index
      %4 = arith.index_cast %3 : i32 to index
      %c0_4 = arith.constant 0 : index
      %c0_5 = arith.constant 0 : index
      %5 = vector.load %arg1[%c0_3, %4, %c0_4, %c0_5] : memref<1x9x9x128xbf16, #tpu.memory_space<vmem>>, vector<1x1x7x128xbf16>
      %6 = vector.shape_cast %5 : vector<1x1x7x128xbf16> to vector<7x128xbf16>
      %c0_6 = arith.constant 0 : index
      %c0_7 = arith.constant 0 : index
      %c0_8 = arith.constant 0 : index
      %7 = vector.load %arg2[%c0_6, %c0_7, %c0_8] : memref<9x128x128xbf16, #tpu.memory_space<vmem>>, vector<1x128x128xbf16>
      %8 = vector.shape_cast %7 : vector<1x128x128xbf16> to vector<128x128xbf16>
      %cst_9 = arith.constant dense<0.000000e+00> : vector<7x128xf32>
      %9 = tpu.matmul %6, %8, %cst_9 {dimension_numbers = #tpu.dot_dimension_numbers<[1], [0], [0], [1], [0, 0, 1, 1], [], []>} : vector<7x128xbf16>, vector<128x128xbf16>, vector<7x128xf32> -> vector<7x128xf32>
      %10 = arith.addf %2, %9 : vector<7x128xf32>
      %c0_i32_10 = arith.constant 0 : i32
      %11 = arith.addi %arg5, %c0_i32_10 : i32
      %c0_11 = arith.constant 0 : index
      %12 = arith.index_cast %11 : i32 to index
      %c1 = arith.constant 1 : index
      %c0_12 = arith.constant 0 : index
      %13 = vector.load %arg1[%c0_11, %12, %c1, %c0_12] : memref<1x9x9x128xbf16, #tpu.memory_space<vmem>>, vector<1x1x7x128xbf16>
      %14 = vector.shape_cast %13 : vector<1x1x7x128xbf16> to vector<7x128xbf16>
      %c1_13 = arith.constant 1 : index
      %c0_14 = arith.constant 0 : index
      %c0_15 = arith.constant 0 : index
      %15 = vector.load %arg2[%c1_13, %c0_14, %c0_15] : memref<9x128x128xbf16, #tpu.memory_space<vmem>>, vector<1x128x128xbf16>
      %16 = vector.shape_cast %15 : vector<1x128x128xbf16> to vector<128x128xbf16>
      %cst_16 = arith.constant dense<0.000000e+00> : vector<7x128xf32>
      %17 = tpu.matmul %14, %16, %cst_16 {dimension_numbers = #tpu.dot_dimension_numbers<[1], [0], [0], [1], [0, 0, 1, 1], [], []>} : vector<7x128xbf16>, vector<128x128xbf16>, vector<7x128xf32> -> vector<7x128xf32>
      %18 = arith.addf %10, %17 : vector<7x128xf32>
      %c0_i32_17 = arith.constant 0 : i32
      %19 = arith.addi %arg5, %c0_i32_17 : i32
      %c0_18 = arith.constant 0 : index
      %20 = arith.index_cast %19 : i32 to index
      %c2 = arith.constant 2 : index
      %c0_19 = arith.constant 0 : index
      %21 = vector.load %arg1[%c0_18, %20, %c2, %c0_19] : memref<1x9x9x128xbf16, #tpu.memory_space<vmem>>, vector<1x1x7x128xbf16>
      %22 = vector.shape_cast %21 : vector<1x1x7x128xbf16> to vector<7x128xbf16>
      %c2_20 = arith.constant 2 : index
      %c0_21 = arith.constant 0 : index
      %c0_22 = arith.constant 0 : index
      %23 = vector.load %arg2[%c2_20, %c0_21, %c0_22] : memref<9x128x128xbf16, #tpu.memory_space<vmem>>, vector<1x128x128xbf16>
      %24 = vector.shape_cast %23 : vector<1x128x128xbf16> to vector<128x128xbf16>
      %cst_23 = arith.constant dense<0.000000e+00> : vector<7x128xf32>
      %25 = tpu.matmul %22, %24, %cst_23 {dimension_numbers = #tpu.dot_dimension_numbers<[1], [0], [0], [1], [0, 0, 1, 1], [], []>} : vector<7x128xbf16>, vector<128x128xbf16>, vector<7x128xf32> -> vector<7x128xf32>
      %26 = arith.addf %18, %25 : vector<7x128xf32>
      %c1_i32_24 = arith.constant 1 : i32
      %27 = arith.addi %arg5, %c1_i32_24 : i32
      %c0_25 = arith.constant 0 : index
      %28 = arith.index_cast %27 : i32 to index
      %c0_26 = arith.constant 0 : index
      %c0_27 = arith.constant 0 : index
      %29 = vector.load %arg1[%c0_25, %28, %c0_26, %c0_27] : memref<1x9x9x128xbf16, #tpu.memory_space<vmem>>, vector<1x1x7x128xbf16>
      %30 = vector.shape_cast %29 : vector<1x1x7x128xbf16> to vector<7x128xbf16>
      %c3 = arith.constant 3 : index
      %c0_28 = arith.constant 0 : index
      %c0_29 = arith.constant 0 : index
      %31 = vector.load %arg2[%c3, %c0_28, %c0_29] : memref<9x128x128xbf16, #tpu.memory_space<vmem>>, vector<1x128x128xbf16>
      %32 = vector.shape_cast %31 : vector<1x128x128xbf16> to vector<128x128xbf16>
      %cst_30 = arith.constant dense<0.000000e+00> : vector<7x128xf32>
      %33 = tpu.matmul %30, %32, %cst_30 {dimension_numbers = #tpu.dot_dimension_numbers<[1], [0], [0], [1], [0, 0, 1, 1], [], []>} : vector<7x128xbf16>, vector<128x128xbf16>, vector<7x128xf32> -> vector<7x128xf32>
      %34 = arith.addf %26, %33 : vector<7x128xf32>
      %c1_i32_31 = arith.constant 1 : i32
      %35 = arith.addi %arg5, %c1_i32_31 : i32
      %c0_32 = arith.constant 0 : index
      %36 = arith.index_cast %35 : i32 to index
      %c1_33 = arith.constant 1 : index
      %c0_34 = arith.constant 0 : index
      %37 = vector.load %arg1[%c0_32, %36, %c1_33, %c0_34] : memref<1x9x9x128xbf16, #tpu.memory_space<vmem>>, vector<1x1x7x128xbf16>
      %38 = vector.shape_cast %37 : vector<1x1x7x128xbf16> to vector<7x128xbf16>
      %c4 = arith.constant 4 : index
      %c0_35 = arith.constant 0 : index
      %c0_36 = arith.constant 0 : index
      %39 = vector.load %arg2[%c4, %c0_35, %c0_36] : memref<9x128x128xbf16, #tpu.memory_space<vmem>>, vector<1x128x128xbf16>
      %40 = vector.shape_cast %39 : vector<1x128x128xbf16> to vector<128x128xbf16>
      %cst_37 = arith.constant dense<0.000000e+00> : vector<7x128xf32>
      %41 = tpu.matmul %38, %40, %cst_37 {dimension_numbers = #tpu.dot_dimension_numbers<[1], [0], [0], [1], [0, 0, 1, 1], [], []>} : vector<7x128xbf16>, vector<128x128xbf16>, vector<7x128xf32> -> vector<7x128xf32>
      %42 = arith.addf %34, %41 : vector<7x128xf32>
      %c1_i32_38 = arith.constant 1 : i32
      %43 = arith.addi %arg5, %c1_i32_38 : i32
      %c0_39 = arith.constant 0 : index
      %44 = arith.index_cast %43 : i32 to index
      %c2_40 = arith.constant 2 : index
      %c0_41 = arith.constant 0 : index
      %45 = vector.load %arg1[%c0_39, %44, %c2_40, %c0_41] : memref<1x9x9x128xbf16, #tpu.memory_space<vmem>>, vector<1x1x7x128xbf16>
      %46 = vector.shape_cast %45 : vector<1x1x7x128xbf16> to vector<7x128xbf16>
      %c5 = arith.constant 5 : index
      %c0_42 = arith.constant 0 : index
      %c0_43 = arith.constant 0 : index
      %47 = vector.load %arg2[%c5, %c0_42, %c0_43] : memref<9x128x128xbf16, #tpu.memory_space<vmem>>, vector<1x128x128xbf16>
      %48 = vector.shape_cast %47 : vector<1x128x128xbf16> to vector<128x128xbf16>
      %cst_44 = arith.constant dense<0.000000e+00> : vector<7x128xf32>
      %49 = tpu.matmul %46, %48, %cst_44 {dimension_numbers = #tpu.dot_dimension_numbers<[1], [0], [0], [1], [0, 0, 1, 1], [], []>} : vector<7x128xbf16>, vector<128x128xbf16>, vector<7x128xf32> -> vector<7x128xf32>
      %50 = arith.addf %42, %49 : vector<7x128xf32>
      %c2_i32 = arith.constant 2 : i32
      %51 = arith.addi %arg5, %c2_i32 : i32
      %c0_45 = arith.constant 0 : index
      %52 = arith.index_cast %51 : i32 to index
      %c0_46 = arith.constant 0 : index
      %c0_47 = arith.constant 0 : index
      %53 = vector.load %arg1[%c0_45, %52, %c0_46, %c0_47] : memref<1x9x9x128xbf16, #tpu.memory_space<vmem>>, vector<1x1x7x128xbf16>
      %54 = vector.shape_cast %53 : vector<1x1x7x128xbf16> to vector<7x128xbf16>
      %c6 = arith.constant 6 : index
      %c0_48 = arith.constant 0 : index
      %c0_49 = arith.constant 0 : index
      %55 = vector.load %arg2[%c6, %c0_48, %c0_49] : memref<9x128x128xbf16, #tpu.memory_space<vmem>>, vector<1x128x128xbf16>
      %56 = vector.shape_cast %55 : vector<1x128x128xbf16> to vector<128x128xbf16>
      %cst_50 = arith.constant dense<0.000000e+00> : vector<7x128xf32>
      %57 = tpu.matmul %54, %56, %cst_50 {dimension_numbers = #tpu.dot_dimension_numbers<[1], [0], [0], [1], [0, 0, 1, 1], [], []>} : vector<7x128xbf16>, vector<128x128xbf16>, vector<7x128xf32> -> vector<7x128xf32>
      %58 = arith.addf %50, %57 : vector<7x128xf32>
      %c2_i32_51 = arith.constant 2 : i32
      %59 = arith.addi %arg5, %c2_i32_51 : i32
      %c0_52 = arith.constant 0 : index
      %60 = arith.index_cast %59 : i32 to index
      %c1_53 = arith.constant 1 : index
      %c0_54 = arith.constant 0 : index
      %61 = vector.load %arg1[%c0_52, %60, %c1_53, %c0_54] : memref<1x9x9x128xbf16, #tpu.memory_space<vmem>>, vector<1x1x7x128xbf16>
      %62 = vector.shape_cast %61 : vector<1x1x7x128xbf16> to vector<7x128xbf16>
      %c7 = arith.constant 7 : index
      %c0_55 = arith.constant 0 : index
      %c0_56 = arith.constant 0 : index
      %63 = vector.load %arg2[%c7, %c0_55, %c0_56] : memref<9x128x128xbf16, #tpu.memory_space<vmem>>, vector<1x128x128xbf16>
      %64 = vector.shape_cast %63 : vector<1x128x128xbf16> to vector<128x128xbf16>
      %cst_57 = arith.constant dense<0.000000e+00> : vector<7x128xf32>
      %65 = tpu.matmul %62, %64, %cst_57 {dimension_numbers = #tpu.dot_dimension_numbers<[1], [0], [0], [1], [0, 0, 1, 1], [], []>} : vector<7x128xbf16>, vector<128x128xbf16>, vector<7x128xf32> -> vector<7x128xf32>
      %66 = arith.addf %58, %65 : vector<7x128xf32>
      %c2_i32_58 = arith.constant 2 : i32
      %67 = arith.addi %arg5, %c2_i32_58 : i32
      %c0_59 = arith.constant 0 : index
      %68 = arith.index_cast %67 : i32 to index
      %c2_60 = arith.constant 2 : index
      %c0_61 = arith.constant 0 : index
      %69 = vector.load %arg1[%c0_59, %68, %c2_60, %c0_61] : memref<1x9x9x128xbf16, #tpu.memory_space<vmem>>, vector<1x1x7x128xbf16>
      %70 = vector.shape_cast %69 : vector<1x1x7x128xbf16> to vector<7x128xbf16>
      %c8 = arith.constant 8 : index
      %c0_62 = arith.constant 0 : index
      %c0_63 = arith.constant 0 : index
      %71 = vector.load %arg2[%c8, %c0_62, %c0_63] : memref<9x128x128xbf16, #tpu.memory_space<vmem>>, vector<1x128x128xbf16>
      %72 = vector.shape_cast %71 : vector<1x128x128xbf16> to vector<128x128xbf16>
      %cst_64 = arith.constant dense<0.000000e+00> : vector<7x128xf32>
      %73 = tpu.matmul %70, %72, %cst_64 {dimension_numbers = #tpu.dot_dimension_numbers<[1], [0], [0], [1], [0, 0, 1, 1], [], []>} : vector<7x128xbf16>, vector<128x128xbf16>, vector<7x128xf32> -> vector<7x128xf32>
      %74 = arith.addf %66, %73 : vector<7x128xf32>
      %75 = vector.broadcast %0 : vector<1x128xf32> to vector<7x128xf32>
      %76 = arith.addf %74, %75 : vector<7x128xf32>
      %cst_65 = arith.constant 0.000000e+00 : f32
      %77 = vector.broadcast %cst_65 : f32 to vector<7x128xf32>
      %78 = arith.cmpf ogt, %76, %77 : vector<7x128xf32>
      %cst_66 = arith.constant 1.000000e-01 : f32
      %79 = vector.broadcast %cst_66 : f32 to vector<7x128xf32>
      %80 = arith.mulf %79, %76 : vector<7x128xf32>
      %81 = arith.select %78, %76, %80 : vector<7x128xi1>, vector<7x128xf32>
      %82 = arith.truncf %81 : vector<7x128xf32> to vector<7x128xbf16>
      %c0_67 = arith.constant 0 : index
      %83 = arith.index_cast %arg5 : i32 to index
      %c0_68 = arith.constant 0 : index
      %c0_69 = arith.constant 0 : index
      %84 = vector.load %arg4[%c0_67, %83, %c0_68, %c0_69] : memref<1x7x7x128xbf16, #tpu.memory_space<vmem>>, vector<1x1x7x128xbf16>
      %85 = vector.shape_cast %84 : vector<1x1x7x128xbf16> to vector<7x128xbf16>
      %86 = vector.shape_cast %82 : vector<7x128xbf16> to vector<1x1x7x128xbf16>
      tpu.vector_store %arg4[%c0_67, %83, %c0_68, %c0_69], %86 {strides = array<i32>} : memref<1x7x7x128xbf16, #tpu.memory_space<vmem>>, vector<1x1x7x128xbf16>,
    }
    %c7_i32_1 = arith.constant 7 : i32
    return
  }
  func.func @transform_0(%arg0: i32) -> (i32, i32, i32, i32) {
    %c0_i32 = arith.constant 0 : i32
    %c0_i32_0 = arith.constant 0 : i32
    %c0_i32_1 = arith.constant 0 : i32
    %c0_i32_2 = arith.constant 0 : i32
    return %arg0, %c0_i32, %c0_i32_0, %c0_i32_1 : i32, i32, i32, i32
  }
  func.func @transform_1(%arg0: i32) -> (i32, i32, i32) {
    %c0_i32 = arith.constant 0 : i32
    %c0_i32_0 = arith.constant 0 : i32
    %c0_i32_1 = arith.constant 0 : i32
    %c0_i32_2 = arith.constant 0 : i32
    return %c0_i32, %c0_i32_0, %c0_i32_1 : i32, i32, i32
  }
  func.func @transform_2(%arg0: i32) -> (i32, i32) {
    %c0_i32 = arith.constant 0 : i32
    %c0_i32_0 = arith.constant 0 : i32
    %c0_i32_1 = arith.constant 0 : i32
    return %c0_i32, %c0_i32_0 : i32, i32
  }
  func.func @transform_3(%arg0: i32) -> (i32, i32, i32, i32) {
    %c0_i32 = arith.constant 0 : i32
    %c0_i32_0 = arith.constant 0 : i32
    %c0_i32_1 = arith.constant 0 : i32
    %c0_i32_2 = arith.constant 0 : i32
    return %arg0, %c0_i32, %c0_i32_0, %c0_i32_1 : i32, i32, i32, i32
  }
}

module attributes {stable_mosaic.version = 11 : i64} {
  func.func @_mm_act_kernel(%arg0: i32, %arg1: i32, %arg2: i32, %arg3: memref<2x896xbf16, #tpu.memory_space<vmem>>, %arg4: memref<896x256xbf16, #tpu.memory_space<vmem>>, %arg5: memref<1x256xf32, #tpu.memory_space<vmem>>, %arg6: memref<2x256xbf16, #tpu.memory_space<vmem>>, %arg7: memref<2x256xf32, #tpu.memory_space<vmem>>) attributes {dimension_semantics = [#tpu.dimension_semantics<parallel>, #tpu.dimension_semantics<parallel>, #tpu.dimension_semantics<arbitrary>], iteration_bounds = array<i64: 1, 1, 7>, scalar_prefetch = 0 : i64, scratch_operands = 1 : i64, tpu.core_type = #tpu.core_type<tc>, window_params = [{transform_indices = @transform_0, window_bounds = array<i64: 2, 896>}, {transform_indices = @transform_1, window_bounds = array<i64: 896, 256>}, {transform_indices = @transform_2, window_bounds = array<i64: 1, 256>}, {transform_indices = @transform_3, window_bounds = array<i64: 2, 256>}]} {
    %c0_i32 = arith.constant 0 : i32
    %0 = arith.cmpi eq, %arg2, %c0_i32 : i32
    %1 = arith.extui %0 : i1 to i32
    %c0_i32_0 = arith.constant 0 : i32
    %2 = arith.cmpi ne, %1, %c0_i32_0 : i32
    scf.if %2 {
      %cst_9 = arith.constant 0.000000e+00 : f32
      %12 = vector.broadcast %cst_9 : f32 to vector<2x256xf32>
      %c0_10 = arith.constant 0 : index
      %c0_11 = arith.constant 0 : index
      %13 = vector.load %arg7[%c0_10, %c0_11] : memref<2x256xf32, #tpu.memory_space<vmem>>, vector<2x256xf32>
      tpu.vector_store %arg7[%c0_10, %c0_11], %12 {strides = array<i32>} : memref<2x256xf32, #tpu.memory_space<vmem>>, vector<2x256xf32>,
    } else {
    }
    %c0 = arith.constant 0 : index
    %c0_1 = arith.constant 0 : index
    %3 = vector.load %arg7[%c0, %c0_1] : memref<2x256xf32, #tpu.memory_space<vmem>>, vector<2x256xf32>
    %c0_2 = arith.constant 0 : index
    %c0_3 = arith.constant 0 : index
    %4 = vector.load %arg3[%c0_2, %c0_3] : memref<2x896xbf16, #tpu.memory_space<vmem>>, vector<2x896xbf16>
    %c0_4 = arith.constant 0 : index
    %c0_5 = arith.constant 0 : index
    %5 = vector.load %arg4[%c0_4, %c0_5] : memref<896x256xbf16, #tpu.memory_space<vmem>>, vector<896x256xbf16>
    %cst = arith.constant dense<0.000000e+00> : vector<2x256xf32>
    %6 = tpu.matmul %4, %5, %cst {dimension_numbers = #tpu.dot_dimension_numbers<[1], [0], [0], [1], [0, 0, 1, 1], [], []>} : vector<2x896xbf16>, vector<896x256xbf16>, vector<2x256xf32> -> vector<2x256xf32>
    %7 = arith.addf %3, %6 : vector<2x256xf32>
    %c0_6 = arith.constant 0 : index
    %c0_7 = arith.constant 0 : index
    %8 = vector.load %arg7[%c0_6, %c0_7] : memref<2x256xf32, #tpu.memory_space<vmem>>, vector<2x256xf32>
    tpu.vector_store %arg7[%c0_6, %c0_7], %7 {strides = array<i32>} : memref<2x256xf32, #tpu.memory_space<vmem>>, vector<2x256xf32>,
    %c6_i32 = arith.constant 6 : i32
    %9 = arith.cmpi eq, %arg2, %c6_i32 : i32
    %10 = arith.extui %9 : i1 to i32
    %c0_i32_8 = arith.constant 0 : i32
    %11 = arith.cmpi ne, %10, %c0_i32_8 : i32
    scf.if %11 {
      %c0_9 = arith.constant 0 : index
      %c0_10 = arith.constant 0 : index
      %12 = vector.load %arg7[%c0_9, %c0_10] : memref<2x256xf32, #tpu.memory_space<vmem>>, vector<2x256xf32>
      %c0_11 = arith.constant 0 : index
      %c0_12 = arith.constant 0 : index
      %13 = vector.load %arg5[%c0_11, %c0_12] : memref<1x256xf32, #tpu.memory_space<vmem>>, vector<1x256xf32>
      %14 = vector.broadcast %13 : vector<1x256xf32> to vector<2x256xf32>
      %15 = arith.addf %12, %14 : vector<2x256xf32>
      %16 = arith.truncf %15 : vector<2x256xf32> to vector<2x256xbf16>
      %c0_13 = arith.constant 0 : index
      %c0_14 = arith.constant 0 : index
      %17 = vector.load %arg6[%c0_13, %c0_14] : memref<2x256xbf16, #tpu.memory_space<vmem>>, vector<2x256xbf16>
      tpu.vector_store %arg6[%c0_13, %c0_14], %16 {strides = array<i32>} : memref<2x256xbf16, #tpu.memory_space<vmem>>, vector<2x256xbf16>,
    } else {
    }
    return
  }
  func.func @transform_0(%arg0: i32, %arg1: i32, %arg2: i32) -> (i32, i32) {
    %c0_i32 = arith.constant 0 : i32
    return %arg0, %arg2 : i32, i32
  }
  func.func @transform_1(%arg0: i32, %arg1: i32, %arg2: i32) -> (i32, i32) {
    %c0_i32 = arith.constant 0 : i32
    return %arg2, %arg1 : i32, i32
  }
  func.func @transform_2(%arg0: i32, %arg1: i32, %arg2: i32) -> (i32, i32) {
    %c0_i32 = arith.constant 0 : i32
    %c0_i32_0 = arith.constant 0 : i32
    return %c0_i32, %arg1 : i32, i32
  }
  func.func @transform_3(%arg0: i32, %arg1: i32, %arg2: i32) -> (i32, i32) {
    %c0_i32 = arith.constant 0 : i32
    return %arg0, %arg1 : i32, i32
  }
}

module attributes {stable_mosaic.version = 11 : i64} {
  func.func @_mm_act_kernel(%arg0: i32, %arg1: i32, %arg2: i32, %arg3: memref<2x256xbf16, #tpu.memory_space<vmem>>, %arg4: memref<256x512xbf16, #tpu.memory_space<vmem>>, %arg5: memref<1x512xf32, #tpu.memory_space<vmem>>, %arg6: memref<2x512xf32, #tpu.memory_space<vmem>>, %arg7: memref<2x512xf32, #tpu.memory_space<vmem>>) attributes {dimension_semantics = [#tpu.dimension_semantics<parallel>, #tpu.dimension_semantics<parallel>, #tpu.dimension_semantics<arbitrary>], iteration_bounds = array<i64: 1, 3, 1>, scalar_prefetch = 0 : i64, scratch_operands = 1 : i64, tpu.core_type = #tpu.core_type<tc>, window_params = [{transform_indices = @transform_0, window_bounds = array<i64: 2, 256>}, {transform_indices = @transform_1, window_bounds = array<i64: 256, 512>}, {transform_indices = @transform_2, window_bounds = array<i64: 1, 512>}, {transform_indices = @transform_3, window_bounds = array<i64: 2, 512>}]} {
    %c0_i32 = arith.constant 0 : i32
    %0 = arith.cmpi eq, %arg2, %c0_i32 : i32
    %1 = arith.extui %0 : i1 to i32
    %c0_i32_0 = arith.constant 0 : i32
    %2 = arith.cmpi ne, %1, %c0_i32_0 : i32
    scf.if %2 {
      %cst_10 = arith.constant 0.000000e+00 : f32
      %12 = vector.broadcast %cst_10 : f32 to vector<2x512xf32>
      %c0_11 = arith.constant 0 : index
      %c0_12 = arith.constant 0 : index
      %13 = vector.load %arg7[%c0_11, %c0_12] : memref<2x512xf32, #tpu.memory_space<vmem>>, vector<2x512xf32>
      tpu.vector_store %arg7[%c0_11, %c0_12], %12 {strides = array<i32>} : memref<2x512xf32, #tpu.memory_space<vmem>>, vector<2x512xf32>,
    } else {
    }
    %c0 = arith.constant 0 : index
    %c0_1 = arith.constant 0 : index
    %3 = vector.load %arg7[%c0, %c0_1] : memref<2x512xf32, #tpu.memory_space<vmem>>, vector<2x512xf32>
    %c0_2 = arith.constant 0 : index
    %c0_3 = arith.constant 0 : index
    %4 = vector.load %arg3[%c0_2, %c0_3] : memref<2x256xbf16, #tpu.memory_space<vmem>>, vector<2x256xbf16>
    %c0_4 = arith.constant 0 : index
    %c0_5 = arith.constant 0 : index
    %5 = vector.load %arg4[%c0_4, %c0_5] : memref<256x512xbf16, #tpu.memory_space<vmem>>, vector<256x512xbf16>
    %cst = arith.constant dense<0.000000e+00> : vector<2x512xf32>
    %6 = tpu.matmul %4, %5, %cst {dimension_numbers = #tpu.dot_dimension_numbers<[1], [0], [0], [1], [0, 0, 1, 1], [], []>} : vector<2x256xbf16>, vector<256x512xbf16>, vector<2x512xf32> -> vector<2x512xf32>
    %7 = arith.addf %3, %6 : vector<2x512xf32>
    %c0_6 = arith.constant 0 : index
    %c0_7 = arith.constant 0 : index
    %8 = vector.load %arg7[%c0_6, %c0_7] : memref<2x512xf32, #tpu.memory_space<vmem>>, vector<2x512xf32>
    tpu.vector_store %arg7[%c0_6, %c0_7], %7 {strides = array<i32>} : memref<2x512xf32, #tpu.memory_space<vmem>>, vector<2x512xf32>,
    %c0_i32_8 = arith.constant 0 : i32
    %9 = arith.cmpi eq, %arg2, %c0_i32_8 : i32
    %10 = arith.extui %9 : i1 to i32
    %c0_i32_9 = arith.constant 0 : i32
    %11 = arith.cmpi ne, %10, %c0_i32_9 : i32
    scf.if %11 {
      %c0_10 = arith.constant 0 : index
      %c0_11 = arith.constant 0 : index
      %12 = vector.load %arg7[%c0_10, %c0_11] : memref<2x512xf32, #tpu.memory_space<vmem>>, vector<2x512xf32>
      %c0_12 = arith.constant 0 : index
      %c0_13 = arith.constant 0 : index
      %13 = vector.load %arg5[%c0_12, %c0_13] : memref<1x512xf32, #tpu.memory_space<vmem>>, vector<1x512xf32>
      %14 = vector.broadcast %13 : vector<1x512xf32> to vector<2x512xf32>
      %15 = arith.addf %12, %14 : vector<2x512xf32>
      %16 = math.absf %15 : vector<2x512xf32>
      %cst_14 = arith.constant 0.000000e+00 : f32
      %17 = vector.broadcast %cst_14 : f32 to vector<2x512xf32>
      %18 = arith.subf %17, %16 : vector<2x512xf32>
      %19 = math.exp %18 : vector<2x512xf32>
      %cst_15 = arith.constant 1.000000e+00 : f32
      %20 = vector.broadcast %cst_15 : f32 to vector<2x512xf32>
      %21 = arith.addf %20, %19 : vector<2x512xf32>
      %22 = tpu.reciprocal %21 : vector<2x512xf32> -> vector<2x512xf32>
      %cst_16 = arith.constant 0.000000e+00 : f32
      %23 = vector.broadcast %cst_16 : f32 to vector<2x512xf32>
      %24 = arith.cmpf oge, %15, %23 : vector<2x512xf32>
      %cst_17 = arith.constant 1.000000e+00 : f32
      %25 = vector.broadcast %cst_17 : f32 to vector<2x512xf32>
      %26 = arith.subf %25, %22 : vector<2x512xf32>
      %27 = arith.select %24, %22, %26 : vector<2x512xi1>, vector<2x512xf32>
      %c0_18 = arith.constant 0 : index
      %c0_19 = arith.constant 0 : index
      %28 = vector.load %arg6[%c0_18, %c0_19] : memref<2x512xf32, #tpu.memory_space<vmem>>, vector<2x512xf32>
      tpu.vector_store %arg6[%c0_18, %c0_19], %27 {strides = array<i32>} : memref<2x512xf32, #tpu.memory_space<vmem>>, vector<2x512xf32>,
    } else {
    }
    return
  }
  func.func @transform_0(%arg0: i32, %arg1: i32, %arg2: i32) -> (i32, i32) {
    %c0_i32 = arith.constant 0 : i32
    return %arg0, %arg2 : i32, i32
  }
  func.func @transform_1(%arg0: i32, %arg1: i32, %arg2: i32) -> (i32, i32) {
    %c0_i32 = arith.constant 0 : i32
    return %arg2, %arg1 : i32, i32
  }
  func.func @transform_2(%arg0: i32, %arg1: i32, %arg2: i32) -> (i32, i32) {
    %c0_i32 = arith.constant 0 : i32
    %c0_i32_0 = arith.constant 0 : i32
    return %c0_i32, %arg1 : i32, i32
  }
  func.func @transform_3(%arg0: i32, %arg1: i32, %arg2: i32) -> (i32, i32) {
    %c0_i32 = arith.constant 0 : i32
    return %arg0, %arg1 : i32, i32
  }
}

</mosaic_0001>

<bundles_post_ra>
// kernel: yolo_forward.7
= control target key start
LH: loop header
LB: loop body
LE: loop exit
PB: predicated region body
PF: predicated region fallthrough
CT: control target
= control target key end

     0   :  { %v1689_v0 = vmov 0.0   ;;  %vm1690_vm0 = vmmov 0   ;;  %vm313_vm1 = vcmask 392192   ;;  %s2005_s1 = inlined_call_operand.vmem [shape: bf16[48,128], index: 1, kind: input, shape index: {}]   ;;  %s2006_s0 = inlined_call_operand.vmem [shape: bf16[392,48], index: 0, kind: input, shape index: {}]   ;;  %s2007_s2 = inlined_call_operand.vmem [shape: f32[1,128], index: 2, kind: input, shape index: {}]   ;;  %s2008_s3 = inlined_call_operand.vmem [shape: bf16[392,128], index: 3, kind: output, shape index: {}]  }
   0x1   :  { %1547 = vmatprep.subr.bf16.mxu0 %v1689_v0  ;;  %v1661_v1 = vld [vmem:[%s2005_s1] sm:$0xff]   ;;  %1653 = vmatprep.subr.bf16.mxu1 %v1689_v0  ;;  %v1662_v2 = vld [vmem:[%s2005_s1 + $0x8] sm:$0xff]   ;;  %v1663_v3 = vld [vmem:[%s2005_s1 + $0x10] sm:$0xff]  }
   0x2   :  { %1553 = vmatprep.mubr.msk.bf16.mxu0 %vm1690_vm0, %v1689_v0  ;;  %1605 = vmatprep.mubr.msk.bf16.mxu1 %vm1690_vm0, %v1689_v0  ;;  %v1664_v4 = vld [vmem:[%s2006_s0] sm:$0xff]   ;;  %v1665_v5 = vld [vmem:[%s2006_s0 + $0x68] sm:$0xff]   ;;  %v1667_v7 = vld [vmem:[%s2006_s0 + $0x70] sm:$0xff]  }
   0x3   :  { %1548 = vmatpush3.bf16.msra.mxu0 %v1661_v1  ;;  %1656 = vmatpush3.bf16.msra.mxu1 %v1661_v1  ;;  %v1666_v6 = vld [vmem:[%s2006_s0 + $0x8] sm:$0xff]   ;;  %v1668_v8 = vld [vmem:[%s2006_s0 + $0x10] sm:$0xff]   ;;  %v1669_v9 = vld [vmem:[%s2006_s0 + $0x78] sm:$0xff]  }
   0x4   :  { %1549 = vmatprep.subr.bf16.mxu0 %v1689_v0  ;;  %1654 = vmatprep.subr.bf16.mxu1 %v1689_v0  ;;  %v1670_v10 = vld [vmem:[%s2006_s0 + $0x18] sm:$0xff]   ;;  %v1671_v11 = vld [vmem:[%s2006_s0 + $0x80] sm:$0xff]   ;;  %v1673_v13 = vld [vmem:[%s2006_s0 + $0x88] sm:$0xff]  }
   0x5   :  { %v1672_v12 = vld [vmem:[%s2006_s0 + $0x20] sm:$0xff]   ;;  %v1674_v14 = vld [vmem:[%s2006_s0 + $0x28] sm:$0xff]   ;;  %v1675_v15 = vld [vmem:[%s2006_s0 + $0x90] sm:$0xff]  }
   0x6   :  { %v1676_v16 = vld [vmem:[%s2006_s0 + $0x30] sm:$0xff]   ;;  %v1677_v17 = vld [vmem:[%s2006_s0 + $0x98] sm:$0xff]   ;;  %v1679_v19 = vld [vmem:[%s2006_s0 + $0xa0] sm:$0xff]  }
   0x7   :  { %1550 = vmatpush3.bf16.msra.mxu0 %v1662_v2  ;;  %1657 = vmatpush3.bf16.msra.mxu1 %v1662_v2  ;;  %v1678_v18 = vld [vmem:[%s2006_s0 + $0x38] sm:$0xff]   ;;  %v1680_v20 = vld [vmem:[%s2006_s0 + $0x40] sm:$0xff]   ;;  %v1681_v21 = vld [vmem:[%s2006_s0 + $0xa8] sm:$0xff]  }
   0x8   :  { %1551 = vmatprep.subr.bf16.mxu0 %v1689_v0  ;;  %1655 = vmatprep.subr.bf16.mxu1 %v1689_v0  ;;  %v1682_v22 = vld [vmem:[%s2006_s0 + $0x48] sm:$0xff]   ;;  %v1683_v23 = vld [vmem:[%s2006_s0 + $0xb0] sm:$0xff]   ;;  %v1685_v25 = vld [vmem:[%s2006_s0 + $0xb8] sm:$0xff]  }
   0x9   :  { %v1684_v24 = vld [vmem:[%s2006_s0 + $0x50] sm:$0xff]   ;;  %v1686_v26 = vld [vmem:[%s2006_s0 + $0x58] sm:$0xff]   ;;  %v1687_v27 = vld [vmem:[%s2006_s0 + $0xc0] ss:$0 sps:$4 sm:$0xff]  }
   0xa   :  { %v1688_v28 = vld [vmem:[%s2006_s0 + $0x60] sm:$0xff]  }
   0xb   :  { %1552 = vmatpush3.bf16.msra.mxu0 %v1663_v3  ;;  %1658 = vmatpush3.bf16.msra.mxu1 %v1663_v3  ;;  %v1879_v29 = vld [vmem:[%s2007_s2] ss:$0 sm:$0xff] }
   0xe   :  { %1554 = vmatmul.mubr.msk.bf16.vlgmr.msra.gmra.mrb[0].mxu0 %vm313_vm1, %v1664_v4  ;;  %1606 = vmatmul.mubr.msk.bf16.vlgmr.msra.gmra.mrb[0].mxu1 %vm313_vm1, %v1665_v5 }
   0xf   :  { %1557 = vmatprep.mubr.msk.bf16.mxu0 %vm1690_vm0, %v1689_v0  ;;  %1609 = vmatprep.mubr.msk.bf16.mxu1 %vm1690_vm0, %v1689_v0 }
  0x16   :  { %1558 = vmatmul.mubr.msk.bf16.gmra.mrb[4].mxu0 %vm313_vm1, %v1666_v6  ;;  %1610 = vmatmul.mubr.msk.bf16.gmra.mrb[4].mxu1 %vm313_vm1, %v1667_v7 }
  0x17   :  { %1561 = vmatprep.mubr.msk.bf16.mxu0 %vm1690_vm0, %v1689_v0  ;;  %1613 = vmatprep.mubr.msk.bf16.mxu1 %vm1690_vm0, %v1689_v0 }
  0x1e   :  { %1562 = vmatmul.mubr.msk.bf16.gmra.mrb[8].mxu0 %vm313_vm1, %v1668_v8  ;;  %1614 = vmatmul.mubr.msk.bf16.gmra.mrb[8].mxu1 %vm313_vm1, %v1669_v9 }
  0x1f   :  { %1565 = vmatprep.mubr.msk.bf16.mxu0 %vm1690_vm0, %v1689_v0  ;;  %1617 = vmatprep.mubr.msk.bf16.mxu1 %vm1690_vm0, %v1689_v0 }
  0x26   :  { %1566 = vmatmul.mubr.msk.bf16.gmra.mrb[12].mxu0 %vm313_vm1, %v1670_v10  ;;  %1618 = vmatmul.mubr.msk.bf16.gmra.mrb[12].mxu1 %vm313_vm1, %v1671_v11 }
  0x27   :  { %1569 = vmatprep.mubr.msk.bf16.mxu0 %vm1690_vm0, %v1689_v0  ;;  %1621 = vmatprep.mubr.msk.bf16.mxu1 %vm1690_vm0, %v1689_v0 }
  0x2e   :  { %1570 = vmatmul.mubr.msk.bf16.gmra.mrb[16].mxu0 %vm313_vm1, %v1672_v12  ;;  %1622 = vmatmul.mubr.msk.bf16.gmra.mrb[16].mxu1 %vm313_vm1, %v1673_v13 }
  0x2f   :  { %1573 = vmatprep.mubr.msk.bf16.mxu0 %vm1690_vm0, %v1689_v0  ;;  %1625 = vmatprep.mubr.msk.bf16.mxu1 %vm1690_vm0, %v1689_v0 }
  0x36   :  { %1574 = vmatmul.mubr.msk.bf16.gmra.mrb[20].mxu0 %vm313_vm1, %v1674_v14  ;;  %1626 = vmatmul.mubr.msk.bf16.gmra.mrb[20].mxu1 %vm313_vm1, %v1675_v15 }
  0x37   :  { %1577 = vmatprep.mubr.msk.bf16.mxu0 %vm1690_vm0, %v1689_v0  ;;  %1629 = vmatprep.mubr.msk.bf16.mxu1 %vm1690_vm0, %v1689_v0 }
  0x3e   :  { %1578 = vmatmul.mubr.msk.bf16.gmra.mrb[24].mxu0 %vm313_vm1, %v1676_v16  ;;  %1630 = vmatmul.mubr.msk.bf16.gmra.mrb[24].mxu1 %vm313_vm1, %v1677_v17 }
  0x3f   :  { %1581 = vmatprep.mubr.msk.bf16.mxu0 %vm1690_vm0, %v1689_v0  ;;  %1633 = vmatprep.mubr.msk.bf16.mxu1 %vm1690_vm0, %v1689_v0 }
  0x46   :  { %1582 = vmatmul.mubr.msk.bf16.gmra.mrb[28].mxu0 %vm313_vm1, %v1678_v18  ;;  %1634 = vmatmul.mubr.msk.bf16.gmra.mrb[28].mxu1 %vm313_vm1, %v1679_v19 }
  0x47   :  { %1585 = vmatprep.mubr.msk.bf16.mxu0 %vm1690_vm0, %v1689_v0  ;;  %1637 = vmatprep.mubr.msk.bf16.mxu1 %vm1690_vm0, %v1689_v0 }
  0x4e   :  { %1586 = vmatmul.mubr.msk.bf16.gmra.mrb[32].mxu0 %vm313_vm1, %v1680_v20  ;;  %1638 = vmatmul.mubr.msk.bf16.gmra.mrb[32].mxu1 %vm313_vm1, %v1681_v21 }
  0x4f   :  { %1589 = vmatprep.mubr.msk.bf16.mxu0 %vm1690_vm0, %v1689_v0  ;;  %1641 = vmatprep.mubr.msk.bf16.mxu1 %vm1690_vm0, %v1689_v0 }
  0x56   :  { %1590 = vmatmul.mubr.msk.bf16.gmra.mrb[36].mxu0 %vm313_vm1, %v1682_v22  ;;  %1642 = vmatmul.mubr.msk.bf16.gmra.mrb[36].mxu1 %vm313_vm1, %v1683_v23 }
  0x57   :  { %1593 = vmatprep.mubr.msk.bf16.mxu0 %vm1690_vm0, %v1689_v0  ;;  %1645 = vmatprep.mubr.msk.bf16.mxu1 %vm1690_vm0, %v1689_v0 }
  0x5e   :  { %1594 = vmatmul.mubr.msk.bf16.gmra.mrb[40].mxu0 %vm313_vm1, %v1684_v24  ;;  %1646 = vmatmul.mubr.msk.bf16.gmra.mrb[40].mxu1 %vm313_vm1, %v1685_v25 }
  0x5f   :  { %1597 = vmatprep.mubr.msk.bf16.mxu0 %vm1690_vm0, %v1689_v0  ;;  %1649 = vmatprep.mubr.msk.bf16.mxu1 %vm1690_vm0, %v1689_v0 }
  0x66   :  { %1598 = vmatmul.mubr.msk.bf16.gmra.mrb[44].mxu0 %vm313_vm1, %v1686_v26  ;;  %1650 = vmatmul.mubr.msk.bf16.gmra.mrb[44].mxu1 %vm313_vm1, %v1687_v27 }
  0x67   :  { %1601 = vmatprep.mubr.msk.bf16.mxu0 %vm1690_vm0, %v1689_v0 }
  0x6e   :  { %1602 = vmatmul.mubr.msk.bf16.gmra.mrb[48].mxu0 %vm313_vm1, %v1688_v28 }
  0xe1   :  { %v423_v30 = vpop.f32.mrb[0].mxu0  ;;  %v527_v31 = vpop.f32.mrb[0].mxu1 }
  0xe2   :  { %v778_v32 = vadd.f32 %v1879_v29, %v423_v30  ;;  %v1555_v33 = vpop.f32.mrb[1].mxu0  ;;  %v804_v34 = vadd.f32 %v1879_v29, %v527_v31  ;;  %v1607_v35 = vpop.f32.mrb[1].mxu1 }
  0xe3   :  { %v426_v36 = vpop.f32.mrb[2].mxu0  ;;  %v530_v37 = vpop.f32.mrb[2].mxu1 }
  0xe4   :  { %v876_v38 = vmul.f32 0.1, %v778_v32  ;;  %v779_v39 = vadd.f32 %v1879_v29, %v426_v36  ;;  %v1556_v40 = vpop.f32.mrb[3].mxu0  ;;  %vm853_vm2 = vcmp.gt.f32.partialorder %v804_v34, 0.0  ;;  %v1608_v41 = vpop.f32.mrb[3].mxu1  ;;  %vm827_vm3 = vcmp.gt.f32.partialorder %v778_v32, 0.0 }
  0xe5   :  { %v902_v42 = vmul.f32 0.1, %v804_v34  ;;  %v805_v43 = vadd.f32 %v1879_v29, %v530_v37 }
  0xe6   :  { %vm828_vm4 = vcmp.gt.f32.partialorder %v779_v39, 0.0  ;;  %v877_v44 = vmul.f32 0.1, %v779_v39  ;;  %v925_v47 = vsel %vm827_vm3, %v778_v32, %v876_v38 }
  0xe7   :  { %v951_v45 = vsel %vm853_vm2, %v804_v34, %v902_v42  ;;  %vm854_vm5 = vcmp.gt.f32.partialorder %v805_v43, 0.0  ;;  %v903_v46 = vmul.f32 0.1, %v805_v43 }
  0xe8   :  { %v926_v48 = vsel %vm828_vm4, %v779_v39, %v877_v44 }
  0xe9   :  { %v1379_v49 = vpack.c.bf16 %v926_v48, %v925_v47  ;;  %v431_v50 = vpop.f32.mrb[4].mxu0  ;;  %v952_v51 = vsel %vm854_vm5, %v805_v43, %v903_v46  ;;  %v535_v52 = vpop.f32.mrb[4].mxu1 }
  0xea   :  { %v780_v53 = vadd.f32 %v1879_v29, %v431_v50  ;;  %v1444_v54 = vpack.c.bf16 %v952_v51, %v951_v45  ;;  %v1559_v55 = vpop.f32.mrb[5].mxu0  ;;  %v806_v56 = vadd.f32 %v1879_v29, %v535_v52  ;;  %v1611_v57 = vpop.f32.mrb[5].mxu1 }
  0xeb   :  { %1380 = vst [vmem:[%s2008_s3] sm:$0xff] %v1379_v49   ;;  %v434_v58 = vpop.f32.mrb[6].mxu0  ;;  %v538_v59 = vpop.f32.mrb[6].mxu1 }
  0xec   :  { %v878_v60 = vmul.f32 0.1, %v780_v53  ;;  %1508 = vst [vmem:[%s2008_s3 + $0x68] sm:$0xff] %v1444_v54   ;;  %v781_v61 = vadd.f32 %v1879_v29, %v434_v58  ;;  %v1560_v62 = vpop.f32.mrb[7].mxu0  ;;  %vm855_vm6 = vcmp.gt.f32.partialorder %v806_v56, 0.0  ;;  %v1612_v63 = vpop.f32.mrb[7].mxu1  ;;  %v807_v1 = vadd.f32 %v1879_v29, %v538_v59 }
  0xed   :  { %vm829_vm7 = vcmp.gt.f32.partialorder %v780_v53, 0.0  ;;  %v904_v0 = vmul.f32 0.1, %v806_v56 }
  0xee   :  { %vm830_vm8 = vcmp.gt.f32.partialorder %v781_v61, 0.0  ;;  %v879_v2 = vmul.f32 0.1, %v781_v61  ;;  %vm856_vm9 = vcmp.gt.f32.partialorder %v807_v1, 0.0  ;;  %v905_v4 = vmul.f32 0.1, %v807_v1 }
  0xef   :  { %v953_v3 = vsel %vm855_vm6, %v806_v56, %v904_v0  ;;  %v927_v5 = vsel %vm829_vm7, %v780_v53, %v878_v60 }
  0xf0   :  { %v928_v6 = vsel %vm830_vm8, %v781_v61, %v879_v2  ;;  %v954_v9 = vsel %vm856_vm9, %v807_v1, %v905_v4 }
  0xf1   :  { %v1384_v7 = vpack.c.bf16 %v928_v6, %v927_v5  ;;  %v439_v8 = vpop.f32.mrb[8].mxu0  ;;  %v543_v10 = vpop.f32.mrb[8].mxu1  ;;  %v1449_v12 = vpack.c.bf16 %v954_v9, %v953_v3 }
  0xf2   :  { %v782_v11 = vadd.f32 %v1879_v29, %v439_v8  ;;  %v1563_v13 = vpop.f32.mrb[9].mxu0  ;;  %v808_v14 = vadd.f32 %v1879_v29, %v543_v10  ;;  %v1615_v15 = vpop.f32.mrb[9].mxu1 }
  0xf3   :  { %1496 = vst [vmem:[%s2008_s3 + $0x8] sm:$0xff] %v1384_v7   ;;  %v442_v16 = vpop.f32.mrb[10].mxu0  ;;  %v546_v17 = vpop.f32.mrb[10].mxu1  ;;  %1509 = vst [vmem:[%s2008_s3 + $0x70] sm:$0xff] %v1449_v12  }
  0xf4   :  { %v880_v18 = vmul.f32 0.1, %v782_v11  ;;  %v783_v19 = vadd.f32 %v1879_v29, %v442_v16  ;;  %v1564_v20 = vpop.f32.mrb[11].mxu0  ;;  %vm857_vm10 = vcmp.gt.f32.partialorder %v808_v14, 0.0  ;;  %v1616_v21 = vpop.f32.mrb[11].mxu1  ;;  %vm831_vm11 = vcmp.gt.f32.partialorder %v782_v11, 0.0 }
  0xf5   :  { %v906_v22 = vmul.f32 0.1, %v808_v14  ;;  %v809_v23 = vadd.f32 %v1879_v29, %v546_v17 }
  0xf6   :  { %vm832_vm12 = vcmp.gt.f32.partialorder %v783_v19, 0.0  ;;  %v881_v24 = vmul.f32 0.1, %v783_v19  ;;  %v929_v27 = vsel %vm831_vm11, %v782_v11, %v880_v18 }
  0xf7   :  { %v955_v25 = vsel %vm857_vm10, %v808_v14, %v906_v22  ;;  %vm858_vm13 = vcmp.gt.f32.partialorder %v809_v23, 0.0  ;;  %v907_v26 = vmul.f32 0.1, %v809_v23 }
  0xf8   :  { %v930_v28 = vsel %vm832_vm12, %v783_v19, %v881_v24 }
  0xf9   :  { %v1389_v30 = vpack.c.bf16 %v930_v28, %v929_v27  ;;  %v447_v31 = vpop.f32.mrb[12].mxu0  ;;  %v956_v32 = vsel %vm858_vm13, %v809_v23, %v907_v26  ;;  %v551_v33 = vpop.f32.mrb[12].mxu1 }
  0xfa   :  { %v784_v34 = vadd.f32 %v1879_v29, %v447_v31  ;;  %v1454_v35 = vpack.c.bf16 %v956_v32, %v955_v25  ;;  %v1567_v36 = vpop.f32.mrb[13].mxu0  ;;  %v810_v37 = vadd.f32 %v1879_v29, %v551_v33  ;;  %v1619_v38 = vpop.f32.mrb[13].mxu1 }
  0xfb   :  { %1497 = vst [vmem:[%s2008_s3 + $0x10] sm:$0xff] %v1389_v30   ;;  %v450_v39 = vpop.f32.mrb[14].mxu0  ;;  %v554_v40 = vpop.f32.mrb[14].mxu1 }
  0xfc   :  { %v882_v41 = vmul.f32 0.1, %v784_v34  ;;  %1510 = vst [vmem:[%s2008_s3 + $0x78] sm:$0xff] %v1454_v35   ;;  %v785_v42 = vadd.f32 %v1879_v29, %v450_v39  ;;  %v1568_v43 = vpop.f32.mrb[15].mxu0  ;;  %vm859_vm14 = vcmp.gt.f32.partialorder %v810_v37, 0.0  ;;  %v1620_v44 = vpop.f32.mrb[15].mxu1  ;;  %v811_v46 = vadd.f32 %v1879_v29, %v554_v40 }
  0xfd   :  { %vm833_vm15 = vcmp.gt.f32.partialorder %v784_v34, 0.0  ;;  %v908_v45 = vmul.f32 0.1, %v810_v37 }
  0xfe   :  { %vm834_vm0 = vcmp.gt.f32.partialorder %v785_v42, 0.0  ;;  %v883_v47 = vmul.f32 0.1, %v785_v42  ;;  %vm860_vm1 = vcmp.gt.f32.partialorder %v811_v46, 0.0  ;;  %v909_v49 = vmul.f32 0.1, %v811_v46 }
  0xff   :  { %v957_v48 = vsel %vm859_vm14, %v810_v37, %v908_v45  ;;  %v931_v50 = vsel %vm833_vm15, %v784_v34, %v882_v41 }
 0x100   :  { %v932_v51 = vsel %vm834_vm0, %v785_v42, %v883_v47  ;;  %v958_v54 = vsel %vm860_vm1, %v811_v46, %v909_v49 }
 0x101   :  { %v1394_v52 = vpack.c.bf16 %v932_v51, %v931_v50  ;;  %v455_v53 = vpop.f32.mrb[16].mxu0  ;;  %v559_v55 = vpop.f32.mrb[16].mxu1  ;;  %v1459_v57 = vpack.c.bf16 %v958_v54, %v957_v48 }
 0x102   :  { %v786_v56 = vadd.f32 %v1879_v29, %v455_v53  ;;  %v1571_v58 = vpop.f32.mrb[17].mxu0  ;;  %v812_v59 = vadd.f32 %v1879_v29, %v559_v55  ;;  %v1623_v60 = vpop.f32.mrb[17].mxu1 }
 0x103   :  { %1498 = vst [vmem:[%s2008_s3 + $0x18] sm:$0xff] %v1394_v52   ;;  %v458_v61 = vpop.f32.mrb[18].mxu0  ;;  %v562_v62 = vpop.f32.mrb[18].mxu1  ;;  %1511 = vst [vmem:[%s2008_s3 + $0x80] sm:$0xff] %v1459_v57  }
 0x104   :  { %v884_v63 = vmul.f32 0.1, %v786_v56  ;;  %v787_v0 = vadd.f32 %v1879_v29, %v458_v61  ;;  %v1572_v1 = vpop.f32.mrb[19].mxu0  ;;  %vm861_vm2 = vcmp.gt.f32.partialorder %v812_v59, 0.0  ;;  %v1624_v2 = vpop.f32.mrb[19].mxu1  ;;  %vm835_vm3 = vcmp.gt.f32.partialorder %v786_v56, 0.0 }
 0x105   :  { %v910_v3 = vmul.f32 0.1, %v812_v59  ;;  %v813_v4 = vadd.f32 %v1879_v29, %v562_v62 }
 0x106   :  { %vm836_vm4 = vcmp.gt.f32.partialorder %v787_v0, 0.0  ;;  %v885_v5 = vmul.f32 0.1, %v787_v0  ;;  %v933_v8 = vsel %vm835_vm3, %v786_v56, %v884_v63 }
 0x107   :  { %v959_v6 = vsel %vm861_vm2, %v812_v59, %v910_v3  ;;  %vm862_vm5 = vcmp.gt.f32.partialorder %v813_v4, 0.0  ;;  %v911_v7 = vmul.f32 0.1, %v813_v4 }
 0x108   :  { %v934_v9 = vsel %vm836_vm4, %v787_v0, %v885_v5 }
 0x109   :  { %v1399_v10 = vpack.c.bf16 %v934_v9, %v933_v8  ;;  %v463_v11 = vpop.f32.mrb[20].mxu0  ;;  %v960_v12 = vsel %vm862_vm5, %v813_v4, %v911_v7  ;;  %v567_v13 = vpop.f32.mrb[20].mxu1 }
 0x10a   :  { %v788_v14 = vadd.f32 %v1879_v29, %v463_v11  ;;  %v1464_v15 = vpack.c.bf16 %v960_v12, %v959_v6  ;;  %v1575_v16 = vpop.f32.mrb[21].mxu0  ;;  %v814_v17 = vadd.f32 %v1879_v29, %v567_v13  ;;  %v1627_v18 = vpop.f32.mrb[21].mxu1 }
 0x10b   :  { %1499 = vst [vmem:[%s2008_s3 + $0x20] sm:$0xff] %v1399_v10   ;;  %v466_v19 = vpop.f32.mrb[22].mxu0  ;;  %v570_v20 = vpop.f32.mrb[22].mxu1 }
 0x10c   :  { %v886_v21 = vmul.f32 0.1, %v788_v14  ;;  %1512 = vst [vmem:[%s2008_s3 + $0x88] sm:$0xff] %v1464_v15   ;;  %v789_v22 = vadd.f32 %v1879_v29, %v466_v19  ;;  %v1576_v23 = vpop.f32.mrb[23].mxu0  ;;  %vm863_vm6 = vcmp.gt.f32.partialorder %v814_v17, 0.0  ;;  %v1628_v24 = vpop.f32.mrb[23].mxu1  ;;  %v815_v26 = vadd.f32 %v1879_v29, %v570_v20 }
 0x10d   :  { %vm837_vm7 = vcmp.gt.f32.partialorder %v788_v14, 0.0  ;;  %v912_v25 = vmul.f32 0.1, %v814_v17 }
 0x10e   :  { %vm838_vm8 = vcmp.gt.f32.partialorder %v789_v22, 0.0  ;;  %v887_v27 = vmul.f32 0.1, %v789_v22  ;;  %vm864_vm9 = vcmp.gt.f32.partialorder %v815_v26, 0.0  ;;  %v913_v30 = vmul.f32 0.1, %v815_v26 }
 0x10f   :  { %v961_v28 = vsel %vm863_vm6, %v814_v17, %v912_v25  ;;  %v935_v31 = vsel %vm837_vm7, %v788_v14, %v886_v21 }
 0x110   :  { %v936_v32 = vsel %vm838_vm8, %v789_v22, %v887_v27  ;;  %v962_v35 = vsel %vm864_vm9, %v815_v26, %v913_v30 }
 0x111   :  { %v1404_v33 = vpack.c.bf16 %v936_v32, %v935_v31  ;;  %v471_v34 = vpop.f32.mrb[24].mxu0  ;;  %v575_v36 = vpop.f32.mrb[24].mxu1  ;;  %v1469_v38 = vpack.c.bf16 %v962_v35, %v961_v28 }
 0x112   :  { %v790_v37 = vadd.f32 %v1879_v29, %v471_v34  ;;  %v1579_v39 = vpop.f32.mrb[25].mxu0  ;;  %v816_v40 = vadd.f32 %v1879_v29, %v575_v36  ;;  %v1631_v41 = vpop.f32.mrb[25].mxu1 }
 0x113   :  { %1500 = vst [vmem:[%s2008_s3 + $0x28] sm:$0xff] %v1404_v33   ;;  %v474_v42 = vpop.f32.mrb[26].mxu0  ;;  %v578_v43 = vpop.f32.mrb[26].mxu1  ;;  %1513 = vst [vmem:[%s2008_s3 + $0x90] sm:$0xff] %v1469_v38  }
 0x114   :  { %v888_v44 = vmul.f32 0.1, %v790_v37  ;;  %v791_v45 = vadd.f32 %v1879_v29, %v474_v42  ;;  %v1580_v46 = vpop.f32.mrb[27].mxu0  ;;  %vm865_vm10 = vcmp.gt.f32.partialorder %v816_v40, 0.0  ;;  %v1632_v47 = vpop.f32.mrb[27].mxu1  ;;  %vm839_vm11 = vcmp.gt.f32.partialorder %v790_v37, 0.0 }
 0x115   :  { %v914_v48 = vmul.f32 0.1, %v816_v40  ;;  %v817_v49 = vadd.f32 %v1879_v29, %v578_v43 }
 0x116   :  { %vm840_vm12 = vcmp.gt.f32.partialorder %v791_v45, 0.0  ;;  %v889_v50 = vmul.f32 0.1, %v791_v45  ;;  %v937_v53 = vsel %vm839_vm11, %v790_v37, %v888_v44 }
 0x117   :  { %v963_v51 = vsel %vm865_vm10, %v816_v40, %v914_v48  ;;  %vm866_vm13 = vcmp.gt.f32.partialorder %v817_v49, 0.0  ;;  %v915_v52 = vmul.f32 0.1, %v817_v49 }
 0x118   :  { %v938_v54 = vsel %vm840_vm12, %v791_v45, %v889_v50 }
 0x119   :  { %v1409_v55 = vpack.c.bf16 %v938_v54, %v937_v53  ;;  %v479_v56 = vpop.f32.mrb[28].mxu0  ;;  %v964_v57 = vsel %vm866_vm13, %v817_v49, %v915_v52  ;;  %v583_v58 = vpop.f32.mrb[28].mxu1 }
 0x11a   :  { %v792_v59 = vadd.f32 %v1879_v29, %v479_v56  ;;  %v1474_v60 = vpack.c.bf16 %v964_v57, %v963_v51  ;;  %v1583_v61 = vpop.f32.mrb[29].mxu0  ;;  %v818_v62 = vadd.f32 %v1879_v29, %v583_v58  ;;  %v1635_v63 = vpop.f32.mrb[29].mxu1 }
 0x11b   :  { %1501 = vst [vmem:[%s2008_s3 + $0x30] sm:$0xff] %v1409_v55   ;;  %v482_v0 = vpop.f32.mrb[30].mxu0  ;;  %v586_v1 = vpop.f32.mrb[30].mxu1 }
 0x11c   :  { %v890_v2 = vmul.f32 0.1, %v792_v59  ;;  %1514 = vst [vmem:[%s2008_s3 + $0x98] sm:$0xff] %v1474_v60   ;;  %v793_v3 = vadd.f32 %v1879_v29, %v482_v0  ;;  %v1584_v4 = vpop.f32.mrb[31].mxu0  ;;  %vm867_vm14 = vcmp.gt.f32.partialorder %v818_v62, 0.0  ;;  %v1636_v5 = vpop.f32.mrb[31].mxu1  ;;  %v819_v7 = vadd.f32 %v1879_v29, %v586_v1 }
 0x11d   :  { %vm841_vm15 = vcmp.gt.f32.partialorder %v792_v59, 0.0  ;;  %v916_v6 = vmul.f32 0.1, %v818_v62 }
 0x11e   :  { %vm842_vm0 = vcmp.gt.f32.partialorder %v793_v3, 0.0  ;;  %v891_v8 = vmul.f32 0.1, %v793_v3  ;;  %vm868_vm1 = vcmp.gt.f32.partialorder %v819_v7, 0.0  ;;  %v917_v10 = vmul.f32 0.1, %v819_v7 }
 0x11f   :  { %v965_v9 = vsel %vm867_vm14, %v818_v62, %v916_v6  ;;  %v939_v11 = vsel %vm841_vm15, %v792_v59, %v890_v2 }
 0x120   :  { %v940_v12 = vsel %vm842_vm0, %v793_v3, %v891_v8  ;;  %v966_v15 = vsel %vm868_vm1, %v819_v7, %v917_v10 }
 0x121   :  { %v1414_v13 = vpack.c.bf16 %v940_v12, %v939_v11  ;;  %v487_v14 = vpop.f32.mrb[32].mxu0  ;;  %v591_v16 = vpop.f32.mrb[32].mxu1  ;;  %v1479_v18 = vpack.c.bf16 %v966_v15, %v965_v9 }
 0x122   :  { %v794_v17 = vadd.f32 %v1879_v29, %v487_v14  ;;  %v1587_v19 = vpop.f32.mrb[33].mxu0  ;;  %v820_v20 = vadd.f32 %v1879_v29, %v591_v16  ;;  %v1639_v21 = vpop.f32.mrb[33].mxu1 }
 0x123   :  { %1502 = vst [vmem:[%s2008_s3 + $0x38] sm:$0xff] %v1414_v13   ;;  %v490_v22 = vpop.f32.mrb[34].mxu0  ;;  %v594_v23 = vpop.f32.mrb[34].mxu1  ;;  %1515 = vst [vmem:[%s2008_s3 + $0xa0] sm:$0xff] %v1479_v18  }
 0x124   :  { %v892_v24 = vmul.f32 0.1, %v794_v17  ;;  %v795_v25 = vadd.f32 %v1879_v29, %v490_v22  ;;  %v1588_v26 = vpop.f32.mrb[35].mxu0  ;;  %vm869_vm2 = vcmp.gt.f32.partialorder %v820_v20, 0.0  ;;  %v1640_v27 = vpop.f32.mrb[35].mxu1  ;;  %vm843_vm3 = vcmp.gt.f32.partialorder %v794_v17, 0.0 }
 0x125   :  { %v918_v28 = vmul.f32 0.1, %v820_v20  ;;  %v821_v30 = vadd.f32 %v1879_v29, %v594_v23 }
 0x126   :  { %vm844_vm4 = vcmp.gt.f32.partialorder %v795_v25, 0.0  ;;  %v893_v31 = vmul.f32 0.1, %v795_v25  ;;  %v941_v34 = vsel %vm843_vm3, %v794_v17, %v892_v24 }
 0x127   :  { %v967_v32 = vsel %vm869_vm2, %v820_v20, %v918_v28  ;;  %vm870_vm5 = vcmp.gt.f32.partialorder %v821_v30, 0.0  ;;  %v919_v33 = vmul.f32 0.1, %v821_v30 }
 0x128   :  { %v942_v35 = vsel %vm844_vm4, %v795_v25, %v893_v31 }
 0x129   :  { %v1419_v36 = vpack.c.bf16 %v942_v35, %v941_v34  ;;  %v495_v37 = vpop.f32.mrb[36].mxu0  ;;  %v968_v38 = vsel %vm870_vm5, %v821_v30, %v919_v33  ;;  %v599_v39 = vpop.f32.mrb[36].mxu1 }
 0x12a   :  { %v796_v40 = vadd.f32 %v1879_v29, %v495_v37  ;;  %v1484_v41 = vpack.c.bf16 %v968_v38, %v967_v32  ;;  %v1591_v42 = vpop.f32.mrb[37].mxu0  ;;  %v822_v43 = vadd.f32 %v1879_v29, %v599_v39  ;;  %v1643_v44 = vpop.f32.mrb[37].mxu1 }
 0x12b   :  { %1503 = vst [vmem:[%s2008_s3 + $0x40] sm:$0xff] %v1419_v36   ;;  %v498_v45 = vpop.f32.mrb[38].mxu0  ;;  %v602_v46 = vpop.f32.mrb[38].mxu1 }
 0x12c   :  { %v894_v47 = vmul.f32 0.1, %v796_v40  ;;  %1516 = vst [vmem:[%s2008_s3 + $0xa8] sm:$0xff] %v1484_v41   ;;  %v797_v48 = vadd.f32 %v1879_v29, %v498_v45  ;;  %v1592_v49 = vpop.f32.mrb[39].mxu0  ;;  %vm871_vm6 = vcmp.gt.f32.partialorder %v822_v43, 0.0  ;;  %v1644_v50 = vpop.f32.mrb[39].mxu1  ;;  %v823_v52 = vadd.f32 %v1879_v29, %v602_v46 }
 0x12d   :  { %vm845_vm7 = vcmp.gt.f32.partialorder %v796_v40, 0.0  ;;  %v920_v51 = vmul.f32 0.1, %v822_v43 }
 0x12e   :  { %vm846_vm8 = vcmp.gt.f32.partialorder %v797_v48, 0.0  ;;  %v895_v53 = vmul.f32 0.1, %v797_v48  ;;  %vm872_vm9 = vcmp.gt.f32.partialorder %v823_v52, 0.0  ;;  %v921_v55 = vmul.f32 0.1, %v823_v52 }
 0x12f   :  { %v969_v54 = vsel %vm871_vm6, %v822_v43, %v920_v51  ;;  %v943_v56 = vsel %vm845_vm7, %v796_v40, %v894_v47 }
 0x130   :  { %v944_v57 = vsel %vm846_vm8, %v797_v48, %v895_v53  ;;  %v970_v60 = vsel %vm872_vm9, %v823_v52, %v921_v55 }
 0x131   :  { %v1424_v58 = vpack.c.bf16 %v944_v57, %v943_v56  ;;  %v503_v59 = vpop.f32.mrb[40].mxu0  ;;  %v607_v61 = vpop.f32.mrb[40].mxu1  ;;  %v1489_v63 = vpack.c.bf16 %v970_v60, %v969_v54 }
 0x132   :  { %v798_v62 = vadd.f32 %v1879_v29, %v503_v59  ;;  %v1595_v0 = vpop.f32.mrb[41].mxu0  ;;  %v824_v1 = vadd.f32 %v1879_v29, %v607_v61  ;;  %v1647_v2 = vpop.f32.mrb[41].mxu1 }
 0x133   :  { %1504 = vst [vmem:[%s2008_s3 + $0x48] sm:$0xff] %v1424_v58   ;;  %v506_v3 = vpop.f32.mrb[42].mxu0  ;;  %v610_v4 = vpop.f32.mrb[42].mxu1  ;;  %1517 = vst [vmem:[%s2008_s3 + $0xb0] sm:$0xff] %v1489_v63  }
 0x134   :  { %v896_v5 = vmul.f32 0.1, %v798_v62  ;;  %v799_v6 = vadd.f32 %v1879_v29, %v506_v3  ;;  %v1596_v7 = vpop.f32.mrb[43].mxu0  ;;  %vm873_vm10 = vcmp.gt.f32.partialorder %v824_v1, 0.0  ;;  %v1648_v8 = vpop.f32.mrb[43].mxu1  ;;  %vm847_vm11 = vcmp.gt.f32.partialorder %v798_v62, 0.0 }
 0x135   :  { %v922_v9 = vmul.f32 0.1, %v824_v1  ;;  %v825_v10 = vadd.f32 %v1879_v29, %v610_v4 }
 0x136   :  { %vm848_vm12 = vcmp.gt.f32.partialorder %v799_v6, 0.0  ;;  %v897_v11 = vmul.f32 0.1, %v799_v6  ;;  %v945_v14 = vsel %vm847_vm11, %v798_v62, %v896_v5 }
 0x137   :  { %v971_v12 = vsel %vm873_vm10, %v824_v1, %v922_v9  ;;  %vm874_vm13 = vcmp.gt.f32.partialorder %v825_v10, 0.0  ;;  %v923_v13 = vmul.f32 0.1, %v825_v10 }
 0x138   :  { %v946_v15 = vsel %vm848_vm12, %v799_v6, %v897_v11 }
 0x139   :  { %v1429_v16 = vpack.c.bf16 %v946_v15, %v945_v14  ;;  %v511_v17 = vpop.f32.mrb[44].mxu0  ;;  %v972_v18 = vsel %vm874_vm13, %v825_v10, %v923_v13  ;;  %v615_v19 = vpop.f32.mrb[44].mxu1 }
 0x13a   :  { %v800_v20 = vadd.f32 %v1879_v29, %v511_v17  ;;  %v1494_v21 = vpack.c.bf16 %v972_v18, %v971_v12  ;;  %v1599_v22 = vpop.f32.mrb[45].mxu0  ;;  %v826_v23 = vadd.f32 %v1879_v29, %v615_v19  ;;  %v1651_v24 = vpop.f32.mrb[45].mxu1 }
 0x13b   :  { %1505 = vst [vmem:[%s2008_s3 + $0x50] sm:$0xff] %v1429_v16   ;;  %v514_v25 = vpop.f32.mrb[46].mxu0  ;;  %v618_v26 = vpop.f32.mrb[46].mxu1 }
 0x13c   :  { %v898_v27 = vmul.f32 0.1, %v800_v20  ;;  %1518 = vst [vmem:[%s2008_s3 + $0xb8] sm:$0xff] %v1494_v21   ;;  %v801_v28 = vadd.f32 %v1879_v29, %v514_v25  ;;  %v1600_v30 = vpop.f32.mrb[47].mxu0  ;;  %vm875_vm14 = vcmp.gt.f32.partialorder %v826_v23, 0.0  ;;  %v1652_v31 = vpop.f32.mrb[47].mxu1 }
 0x13d   :  { %vm849_vm15 = vcmp.gt.f32.partialorder %v800_v20, 0.0  ;;  %v924_v32 = vmul.f32 0.1, %v826_v23 }
 0x13e   :  { %vm850_vm0 = vcmp.gt.f32.partialorder %v801_v28, 0.0  ;;  %v899_v33 = vmul.f32 0.1, %v801_v28  ;;  %v947_v35 = vsel %vm849_vm15, %v800_v20, %v898_v27 }
 0x13f   :  { %v973_v34 = vsel %vm875_vm14, %v826_v23, %v924_v32 }
 0x140   :  { %v948_v36 = vsel %vm850_vm0, %v801_v28, %v899_v33  ;;  %v1375_v37 = vpack.c.bf16 %v973_v34, %v973_v34 }
 0x141   :  { %v1434_v38 = vpack.c.bf16 %v948_v36, %v947_v35  ;;  %v519_v39 = vpop.f32.mrb[48].mxu0 }
 0x142   :  { %1219 = vst [vmem:[%s2008_s3 + $0xc0] sm:$0xf] %v1375_v37  ;;  %v802_v40 = vadd.f32 %v1879_v29, %v519_v39  ;;  %v1603_v41 = vpop.f32.mrb[49].mxu0 }
 0x143   :  { %1506 = vst [vmem:[%s2008_s3 + $0x58] sm:$0xff] %v1434_v38   ;;  %v522_v42 = vpop.f32.mrb[50].mxu0 }
 0x144   :  { %v900_v43 = vmul.f32 0.1, %v802_v40  ;;  %v803_v44 = vadd.f32 %v1879_v29, %v522_v42  ;;  %v1604_v45 = vpop.f32.mrb[51].mxu0  ;;  %vm851_vm1 = vcmp.gt.f32.partialorder %v802_v40, 0.0 }
 0x146   :  { %vm852_vm2 = vcmp.gt.f32.partialorder %v803_v44, 0.0  ;;  %v901_v46 = vmul.f32 0.1, %v803_v44  ;;  %v949_v47 = vsel %vm851_vm1, %v802_v40, %v900_v43 }
 0x148   :  { %v950_v48 = vsel %vm852_vm2, %v803_v44, %v901_v46 }
 0x149   :  { %v1439_v49 = vpack.c.bf16 %v950_v48, %v949_v47 }
 0x14b   :  { %1507 = vst [vmem:[%s2008_s3 + $0x60] sm:$0xff] %v1439_v49  }

// kernel: yolo_forward.8
= control target key start
LH: loop header
LB: loop body
LE: loop exit
PB: predicated region body
PF: predicated region fallthrough
CT: control target
= control target key end

     0   :  { %s1970_s12 = smov 0   ;;  %s2337_s0 = inlined_call_operand.vmem [shape: bf16[2,16,16,128], index: 0, kind: input, shape index: {}]   ;;  %s2338_s1 = inlined_call_operand.vmem [shape: bf16[9,128,128], index: 1, kind: input, shape index: {}]   ;;  %s2339_s2 = inlined_call_operand.vmem [shape: f32[1,128], index: 2, kind: input, shape index: {}]   ;;  %s2340_s3 = inlined_call_operand.vmem [shape: bf16[2,14,14,128], index: 3, kind: output, shape index: {}]  }
   0x1 LB: > { %s1331_s13 = sadd.s32 4294967295, %s1942_s12   ;;  %p1335_p0 = scmp.ge.s32.totalorder %s1942_s12, 1  ;;  %s1942_s12 = sphi %s1970_s12, %s13_s12  }
   0x2   : > { %p137_p1 = scmp.lt.s32.totalorder %s1942_s12, 3 }
   0x4   : > { %p138_p2 = pnand %p1335_p0, %p137_p1 }
   0x5   : > { %p161_p3 = scmp.lt.s32.totalorder (!%p138_p2), %s1331_s13, 1  ;;  %v1981_v0 = vld [vmem:[%s2339_s2] ss:$0 sm:$0xff] (!%p138_p2)  ;;  %s1993_s24 = smov (!%p138_p2), 0  }
   0x6   : > { %141 = sbr.rel (%p138_p2) target bundleno = 402 (0x192), region = 32 }
   0xd   : > { %s2342_s13 = smov (!%p161_p3, %s1331_s13), 1 }
   0xe   : > { %s1566_s16 = sshll.u32 %s2342_s13, 7  ;;  %s1832_s17 = smul.u32 112, %s2342_s13 }
   0xf   : > { %s1986_s20 = scalar_lea.vmem %s2337_s0, %s1566_s16 }
  0x10   : > { %s1991_s23 = scalar_lea.vmem %s2340_s3, %s1832_s17 }
  0x11 LB: >> { %v1851_v1 = vld [vmem:[%s2338_s1 + $0x40] sm:$0xff]   ;;  %v1948_v2 = vmov 0.0   ;;  %v1853_v4 = vld [vmem:[%s2338_s1 + $0x48] sm:$0xff]   ;;  %vm1949_vm0 = vmmov 0   ;;  %v1855_v6 = vld [vmem:[%s2338_s1 + $0x50] sm:$0xff]   ;;  %s1567_s13 = sshll.u32 %s1946_s24, 3  ;;  %s1946_s24 = sphi %s1993_s24, %s178_s24  }
  0x12   : >> { %1652 = vmatprep.subr.bf16.mxu0 %v1948_v2  ;;  %1672 = vmatprep.subr.bf16.mxu1 %v1948_v2  ;;  %v1852_v3 = vld [vmem:[%s2338_s1] sm:$0xff]   ;;  %v1854_v5 = vld [vmem:[%s2338_s1 + $0x8] sm:$0xff]   ;;  %v1856_v7 = vld [vmem:[%s2338_s1 + $0x10] sm:$0xff]   ;;  %s2038_s16 = scalar_lea.vmem %s1986_s20, %s1567_s13  ;;  %s178_s24 = sadd.s32 1, %s1946_s24  }
  0x13   : >> { %1653 = vmatpush3.bf16.msra.mxu0 %v1851_v1  ;;  %1668 = vmatprep.mubr.msk.bf16.mxu0 %vm1949_vm0, %v1948_v2  ;;  %v1857_v8 = vld [vmem:[%s2338_s1 + $0x58] sm:$0xff]   ;;  %v1859_v10 = vld [vmem:[%s2338_s1 + $0x60] sm:$0xff]   ;;  %v1861_v15 = vld [vmem:[%s2338_s1 + $0x68] sm:$0xff]   ;;  %p175_p4 = scmp.ge.s32.totalorder %s178_s24, 14  }
  0x14   : >> { %1673 = vmatpush3.bf16.msra.mxu1 %v1852_v3  ;;  %1654 = vmatprep.subr.bf16.mxu0 %v1948_v2  ;;  %v1858_v9 = vld [vmem:[%s2338_s1 + $0x18] sm:$0xff]   ;;  %v1860_v11 = vld [vmem:[%s2338_s1 + $0x20] sm:$0xff]   ;;  %v1862_v16 = vld [vmem:[%s2338_s1 + $0x28] sm:$0xff]  }
  0x15   : >> { %1674 = vmatprep.subr.bf16.mxu1 %v1948_v2  ;;  %1688 = vmatprep.mubr.msk.bf16.mxu1 %vm1949_vm0, %v1948_v2  ;;  %v182_v12 = vld [vmem:[%s2038_s16] sm:$0xf]  ;;  %v2050_v13 = vld [vmem:[%s2038_s16 + $0x4] sm:$0xf]  ;;  %v1863_v18 = vld [vmem:[%s2338_s1 + $0x70] sm:$0xff]  }
  0x16   : >> { %v1357_v14 = vcombine.low %v182_v12, %v2050_v13  ;;  %v1864_v19 = vld [vmem:[%s2338_s1 + $0x30] sm:$0xff]   ;;  %v1865_v20 = vld [vmem:[%s2338_s1 + $0x78] sm:$0xff]   ;;  %v183_v24 = vld [vmem:[%s2038_s16 + $0x4] sm:$0x7] }
  0x17   : >> { %1655 = vmatpush3.bf16.msra.mxu0 %v1853_v4  ;;  %v1866_v23 = vld [vmem:[%s2338_s1 + $0x38] sm:$0xff]   ;;  %v1366_v26 = vcombine.low %v182_v12, %v183_v24  ;;  %v1869_v27 = vld [vmem:[%s2338_s1 + $0x80] sm:$0xff]   ;;  %v1871_v29 = vld [vmem:[%s2338_s1 + $0x88] sm:$0xff]  }
  0x18   : >> { %1675 = vmatpush3.bf16.msra.mxu1 %v1854_v5  ;;  %1656 = vmatprep.subr.bf16.mxu0 %v1948_v2  ;;  %v226_v17 = vshll.u32 %v1357_v14, 16  ;;  %v224_v21 = vshrl.u32 %v1357_v14, 16  ;;  %v1870_v28 = vld [vmem:[%s2338_s1 + $0xc0] sm:$0xff]   ;;  %v1872_v30 = vld [vmem:[%s2338_s1 + $0xc8] sm:$0xff]   ;;  %v1873_v31 = vld [vmem:[%s2338_s1 + $0x90] sm:$0xff]  }
  0x19   : >> { %1676 = vmatprep.subr.bf16.mxu1 %v1948_v2  ;;  %v1874_v32 = vld [vmem:[%s2338_s1 + $0xd0] sm:$0xff]   ;;  %v1875_v33 = vld [vmem:[%s2338_s1 + $0x98] sm:$0xff]   ;;  %v1877_v35 = vld [vmem:[%s2338_s1 + $0xa0] sm:$0xff]  }
  0x1a   : >> { %v228_v22 = vrot.slane %v226_v17, 1  ;;  %v1876_v34 = vld [vmem:[%s2338_s1 + $0xd8] sm:$0xff]   ;;  %v1878_v36 = vld [vmem:[%s2338_s1 + $0xe0] sm:$0xff]   ;;  %v1879_v37 = vld [vmem:[%s2338_s1 + $0xa8] sm:$0xff]  }
  0x1b   : >> { %1657 = vmatpush3.bf16.msra.mxu0 %v1855_v6  ;;  %v1880_v38 = vld [vmem:[%s2338_s1 + $0xe8] sm:$0xff]   ;;  %v1881_v39 = vld [vmem:[%s2338_s1 + $0xb0] sm:$0xff]   ;;  %v413_v40 = vld [vmem:[%s2038_s16] sm:$0xe] }
  0x1c   : >> { %1677 = vmatpush3.bf16.msra.mxu1 %v1856_v7  ;;  %1658 = vmatprep.subr.bf16.mxu0 %v1948_v2  ;;  %v229_v25 = vor.u32 %v228_v22, %v224_v21  ;;  %v1882_v41 = vld [vmem:[%s2338_s1 + $0xf0] sm:$0xff]   ;;  %v1883_v42 = vld [vmem:[%s2338_s1 + $0xb8] sm:$0xff]   ;;  %v1391_v44 = vcombine.low %v413_v40, %v2050_v13  ;;  %v1401_v45 = vld [vmem:[%s2038_s16 + $0x8] sm:$0xf] }
  0x1d   : >> { %1678 = vmatprep.subr.bf16.mxu1 %v1948_v2  ;;  %v1884_v43 = vld [vmem:[%s2338_s1 + $0xf8] sm:$0xff]   ;;  %v1402_v46 = vld [vmem:[%s2038_s16 + $0xc] sm:$0x7]  ;;  %v1886_v48 = vld [vmem:[%s2338_s1 + $0x100] sm:$0xff]  }
  0x1e   : >> { %v434_v47 = vrot.slane %v1391_v44, 1  ;;  %v1419_v49 = vcombine.low %v1401_v45, %v1402_v46  ;;  %v1889_v50 = vld [vmem:[%s2338_s1 + $0x140] sm:$0xff]   ;;  %v1890_v51 = vld [vmem:[%s2338_s1 + $0x108] sm:$0xff]   ;;  %v1892_v53 = vld [vmem:[%s2338_s1 + $0x110] sm:$0xff]  }
  0x1f   : >> { %1659 = vmatpush3.bf16.msra.mxu0 %v1857_v8  ;;  %v1891_v52 = vld [vmem:[%s2338_s1 + $0x148] sm:$0xff]   ;;  %v1893_v54 = vld [vmem:[%s2338_s1 + $0x150] sm:$0xff]   ;;  %v1894_v55 = vld [vmem:[%s2338_s1 + $0x118] sm:$0xff]  }
  0x20   : >> { %1679 = vmatpush3.bf16.msra.mxu1 %v1858_v9  ;;  %1660 = vmatprep.subr.bf16.mxu0 %v1948_v2  ;;  %v1895_v56 = vld [vmem:[%s2338_s1 + $0x158] sm:$0xff]   ;;  %v1428_v57 = vld [vmem:[%s2038_s16 + $0xc] sm:$0xf]  ;;  %v1896_v58 = vld [vmem:[%s2338_s1 + $0x120] sm:$0xff]  }
  0x21   : >> { %1680 = vmatprep.subr.bf16.mxu1 %v1948_v2  ;;  %v1897_v59 = vld [vmem:[%s2338_s1 + $0x160] sm:$0xff]   ;;  %v1445_v60 = vcombine.low %v1401_v45, %v1428_v57  ;;  %v1898_v61 = vld [vmem:[%s2338_s1 + $0x128] sm:$0xff]   ;;  %v1900_v1 = vld [vmem:[%s2338_s1 + $0x130] sm:$0xff]  }
  0x22   : >> { %v1899_v62 = vld [vmem:[%s2338_s1 + $0x168] sm:$0xff]   ;;  %v1901_v3 = vld [vmem:[%s2338_s1 + $0x170] sm:$0xff]   ;;  %v1902_v7 = vld [vmem:[%s2338_s1 + $0x138] sm:$0xff]  }
  0x23   : >> { %1661 = vmatpush3.bf16.msra.mxu0 %v1859_v10  ;;  %v671_v63 = vshll.u32 %v1445_v60, 16  ;;  %v1454_v4 = vld [vmem:[%s2038_s16 + $0x8] sm:$0xe]  ;;  %v669_v5 = vshrl.u32 %v1445_v60, 16  ;;  %v1903_v9 = vld [vmem:[%s2338_s1 + $0x178] sm:$0xff]   ;;  %v1906_v13 = vld [vmem:[%s2338_s1 + $0x1c0] sm:$0xff]  }
  0x24   : >> { %1681 = vmatpush3.bf16.msra.mxu1 %v1860_v11  ;;  %1662 = vmatprep.subr.bf16.mxu0 %v1948_v2  ;;  %v1471_v8 = vcombine.low %v1454_v4, %v1428_v57  ;;  %v1904_v11 = vld [vmem:[%s2338_s1 + $0x180] sm:$0xff]   ;;  %v1907_v14 = vld [vmem:[%s2338_s1 + $0x188] sm:$0xff]   ;;  %v1910_v17 = vld [vmem:[%s2338_s1 + $0x1d0] sm:$0xff]  }
  0x25   : >> { %1682 = vmatprep.subr.bf16.mxu1 %v1948_v2  ;;  %v673_v6 = vrot.slane %v671_v63, 1  ;;  %v1914_v21 = vld [vmem:[%s2338_s1 + $0x1e0] sm:$0xff]   ;;  %v1481_v22 = vld [vmem:[%s2038_s16 + $0x10] sm:$0xf]  ;;  %v1915_v24 = vld [vmem:[%s2338_s1 + $0x1a8] sm:$0xff]  }
  0x26   : >> { %v788_v12 = vrot.slane %v1471_v8, 1  ;;  %v1926_v40 = vld [vmem:[%s2338_s1 + $0x218] sm:$0xff]   ;;  %v1534_v44 = vld [vmem:[%s2038_s16 + $0x10] sm:$0xe] }
  0x27   : >> { %1663 = vmatpush3.bf16.msra.mxu0 %v1861_v15  ;;  %v674_v10 = vor.u32 %v673_v6, %v669_v5  ;;  %v1908_v15 = vld [vmem:[%s2338_s1 + $0x1c8] sm:$0xff]   ;;  %v1930_v46 = vld [vmem:[%s2338_s1 + $0x238] sm:$0xff]  }
  0x28   : >> { %1683 = vmatpush3.bf16.msra.mxu1 %v1862_v16  ;;  %1664 = vmatprep.subr.bf16.mxu0 %v1948_v2  ;;  %v1909_v16 = vld [vmem:[%s2338_s1 + $0x190] sm:$0xff]  }
  0x29   : >> { %1684 = vmatprep.subr.bf16.mxu1 %v1948_v2 }
  0x2b   : >> { %1665 = vmatpush3.bf16.msra.mxu0 %v1863_v18  ;;  %v1911_v18 = vld [vmem:[%s2338_s1 + $0x198] sm:$0xff]  }
  0x2c   : >> { %1685 = vmatpush3.bf16.msra.mxu1 %v1864_v19  ;;  %1666 = vmatprep.subr.bf16.mxu0 %v1948_v2  ;;  %v1912_v19 = vld [vmem:[%s2338_s1 + $0x1d8] sm:$0xff]  }
  0x2d   : >> { %1686 = vmatprep.subr.bf16.mxu1 %v1948_v2 }
  0x2f   : >> { %1667 = vmatpush3.bf16.msra.mxu0 %v1865_v20  ;;  %v1913_v20 = vld [vmem:[%s2338_s1 + $0x1a0] sm:$0xff]  }
  0x30   : >> { %1687 = vmatpush3.bf16.msra.mxu1 %v1866_v23  ;;  %1692 = vmatprep.subr.bf16.mxu0 %v1948_v2  ;;  %v1508_v23 = vld [vmem:[%s2038_s16 + $0x14] sm:$0xf] }
  0x31   : >> { %1712 = vmatprep.subr.bf16.mxu1 %v1948_v2  ;;  %v1551_v45 = vcombine.low %v1534_v44, %v1508_v23 }
  0x32   : >> { %1669 = vmatmul.mubr.bf16.vlgmr.msra.gmra.mrb[0].mxu0 %v229_v25  ;;  %v1525_v25 = vcombine.low %v1481_v22, %v1508_v23 }
  0x33   : >> { %1689 = vmatmul.mubr.bf16.vlgmr.msra.gmra.mrb[0].mxu1 %v1366_v26  ;;  %1693 = vmatpush3.bf16.msra.mxu0 %v1869_v27  ;;  %v1916_v26 = vld [vmem:[%s2338_s1 + $0x1e8] sm:$0xff]   ;;  %v1917_v27 = vld [vmem:[%s2338_s1 + $0x1b0] sm:$0xff]  }
  0x34   : >> { %1713 = vmatpush3.bf16.msra.mxu1 %v1870_v28  ;;  %1694 = vmatprep.subr.bf16.mxu0 %v1948_v2  ;;  %v1025_v28 = vshll.u32 %v1525_v25, 16 }
  0x35   : >> { %1714 = vmatprep.subr.bf16.mxu1 %v1948_v2  ;;  %1708 = vmatprep.mubr.msk.bf16.mxu0 %vm1949_vm0, %v1948_v2 }
  0x36   : >> { %1728 = vmatprep.mubr.msk.bf16.mxu1 %vm1949_vm0, %v1948_v2 }
  0x37   : >> { %1695 = vmatpush3.bf16.msra.mxu0 %v1871_v29  ;;  %v1918_v29 = vld [vmem:[%s2338_s1 + $0x1f0] sm:$0xff]  }
  0x38   : >> { %1715 = vmatpush3.bf16.msra.mxu1 %v1872_v30  ;;  %1696 = vmatprep.subr.bf16.mxu0 %v1948_v2  ;;  %v1919_v30 = vld [vmem:[%s2338_s1 + $0x1b8] sm:$0xff]  }
  0x39   : >> { %1716 = vmatprep.subr.bf16.mxu1 %v1948_v2 }
  0x3b   : >> { %1697 = vmatpush3.bf16.msra.mxu0 %v1873_v31  ;;  %v1482_v31 = vld [vmem:[%s2038_s16 + $0x14] sm:$0x7]  ;;  %s1258_s16 = scalar_lea.vmem %s1991_s23, %s1567_s13 }
  0x3c   : >> { %1717 = vmatpush3.bf16.msra.mxu1 %v1874_v32  ;;  %1698 = vmatprep.subr.bf16.mxu0 %v1948_v2  ;;  %v1023_v32 = vshrl.u32 %v1525_v25, 16 }
  0x3d   : >> { %1718 = vmatprep.subr.bf16.mxu1 %v1948_v2 }
  0x3f   : >> { %1699 = vmatpush3.bf16.msra.mxu0 %v1875_v33  ;;  %v1027_v33 = vrot.slane %v1025_v28, 1 }
  0x40   : >> { %1719 = vmatpush3.bf16.msra.mxu1 %v1876_v34  ;;  %1700 = vmatprep.subr.bf16.mxu0 %v1948_v2  ;;  %v1920_v34 = vld [vmem:[%s2338_s1 + $0x1f8] sm:$0xff]  }
  0x41   : >> { %1720 = vmatprep.subr.bf16.mxu1 %v1948_v2 }
  0x43   : >> { %1701 = vmatpush3.bf16.msra.mxu0 %v1877_v35  ;;  %v1499_v35 = vcombine.low %v1481_v22, %v1482_v31 }
  0x44   : >> { %1721 = vmatpush3.bf16.msra.mxu1 %v1878_v36  ;;  %1702 = vmatprep.subr.bf16.mxu0 %v1948_v2  ;;  %v1923_v36 = vld [vmem:[%s2338_s1 + $0x200] sm:$0xff]  }
  0x45   : >> { %1722 = vmatprep.subr.bf16.mxu1 %v1948_v2 }
  0x47   : >> { %1703 = vmatpush3.bf16.msra.mxu0 %v1879_v37  ;;  %v1028_v37 = vor.u32 %v1027_v33, %v1023_v32 }
  0x48   : >> { %1723 = vmatpush3.bf16.msra.mxu1 %v1880_v38  ;;  %1704 = vmatprep.subr.bf16.mxu0 %v1948_v2  ;;  %v1924_v38 = vld [vmem:[%s2338_s1 + $0x208] sm:$0xff]  }
  0x49   : >> { %1724 = vmatprep.subr.bf16.mxu1 %v1948_v2 }
  0x4b   : >> { %1705 = vmatpush3.bf16.msra.mxu0 %v1881_v39  ;;  %v1925_v39 = vld [vmem:[%s2338_s1 + $0x210] sm:$0xff]  }
  0x4c   : >> { %1725 = vmatpush3.bf16.msra.mxu1 %v1882_v41  ;;  %1706 = vmatprep.subr.bf16.mxu0 %v1948_v2  ;;  %v1927_v41 = vld [vmem:[%s2338_s1 + $0x220] sm:$0xff]  }
  0x4d   : >> { %1726 = vmatprep.subr.bf16.mxu1 %v1948_v2 }
  0x4f   : >> { %1707 = vmatpush3.bf16.msra.mxu0 %v1883_v42  ;;  %v1928_v42 = vld [vmem:[%s2338_s1 + $0x228] sm:$0xff]  }
  0x50   : >> { %1727 = vmatpush3.bf16.msra.mxu1 %v1884_v43  ;;  %1732 = vmatprep.subr.bf16.mxu0 %v1948_v2  ;;  %v1929_v43 = vld [vmem:[%s2338_s1 + $0x230] sm:$0xff]  }
  0x51   : >> { %1752 = vmatprep.subr.bf16.mxu1 %v1948_v2 }
  0x52   : >> { %1709 = vmatmul.mubr.bf16.vlgmr.msra.gmra.mrb[4].mxu0 %v434_v47  ;;  %v1142_v47 = vrot.slane %v1551_v45, 1 }
  0x53   : >> { %1733 = vmatpush3.bf16.msra.mxu0 %v1886_v48  ;;  %1729 = vmatmul.mubr.bf16.vlgmr.msra.gmra.mrb[4].mxu1 %v1419_v49 }
  0x54   : >> { %1753 = vmatpush3.bf16.msra.mxu1 %v1889_v50  ;;  %1734 = vmatprep.subr.bf16.mxu0 %v1948_v2 }
  0x55   : >> { %1754 = vmatprep.subr.bf16.mxu1 %v1948_v2  ;;  %1748 = vmatprep.mubr.msk.bf16.mxu0 %vm1949_vm0, %v1948_v2 }
  0x56   : >> { %1768 = vmatprep.mubr.msk.bf16.mxu1 %vm1949_vm0, %v1948_v2 }
  0x57   : >> { %1735 = vmatpush3.bf16.msra.mxu0 %v1890_v51 }
  0x58   : >> { %1755 = vmatpush3.bf16.msra.mxu1 %v1891_v52  ;;  %1736 = vmatprep.subr.bf16.mxu0 %v1948_v2 }
  0x59   : >> { %1756 = vmatprep.subr.bf16.mxu1 %v1948_v2 }
  0x5b   : >> { %1737 = vmatpush3.bf16.msra.mxu0 %v1892_v53 }
  0x5c   : >> { %1757 = vmatpush3.bf16.msra.mxu1 %v1893_v54  ;;  %1738 = vmatprep.subr.bf16.mxu0 %v1948_v2 }
  0x5d   : >> { %1758 = vmatprep.subr.bf16.mxu1 %v1948_v2 }
  0x5f   : >> { %1739 = vmatpush3.bf16.msra.mxu0 %v1894_v55 }
  0x60   : >> { %1759 = vmatpush3.bf16.msra.mxu1 %v1895_v56  ;;  %1740 = vmatprep.subr.bf16.mxu0 %v1948_v2 }
  0x61   : >> { %1760 = vmatprep.subr.bf16.mxu1 %v1948_v2 }
  0x63   : >> { %1741 = vmatpush3.bf16.msra.mxu0 %v1896_v58 }
  0x64   : >> { %1761 = vmatpush3.bf16.msra.mxu1 %v1897_v59  ;;  %1742 = vmatprep.subr.bf16.mxu0 %v1948_v2 }
  0x65   : >> { %1762 = vmatprep.subr.bf16.mxu1 %v1948_v2 }
  0x67   : >> { %1743 = vmatpush3.bf16.msra.mxu0 %v1898_v61 }
  0x68   : >> { %1763 = vmatpush3.bf16.msra.mxu1 %v1899_v62  ;;  %1744 = vmatprep.subr.bf16.mxu0 %v1948_v2 }
  0x69   : >> { %1764 = vmatprep.subr.bf16.mxu1 %v1948_v2 }
  0x6b   : >> { %1745 = vmatpush3.bf16.msra.mxu0 %v1900_v1 }
  0x6c   : >> { %1765 = vmatpush3.bf16.msra.mxu1 %v1901_v3  ;;  %1746 = vmatprep.subr.bf16.mxu0 %v1948_v2 }
  0x6d   : >> { %1766 = vmatprep.subr.bf16.mxu1 %v1948_v2 }
  0x6f   : >> { %1747 = vmatpush3.bf16.msra.mxu0 %v1902_v7 }
  0x70   : >> { %1767 = vmatpush3.bf16.msra.mxu1 %v1903_v9  ;;  %1772 = vmatprep.subr.bf16.mxu0 %v1948_v2 }
  0x71   : >> { %1792 = vmatprep.subr.bf16.mxu1 %v1948_v2 }
  0x72   : >> { %1749 = vmatmul.mubr.bf16.vlgmr.msra.gmra.mrb[8].mxu0 %v674_v10 }
  0x73   : >> { %1773 = vmatpush3.bf16.msra.mxu0 %v1904_v11  ;;  %1769 = vmatmul.mubr.bf16.vlgmr.msra.gmra.mrb[8].mxu1 %v788_v12 }
  0x74   : >> { %1793 = vmatpush3.bf16.msra.mxu1 %v1906_v13  ;;  %1774 = vmatprep.subr.bf16.mxu0 %v1948_v2 }
  0x75   : >> { %1794 = vmatprep.subr.bf16.mxu1 %v1948_v2  ;;  %1788 = vmatprep.mubr.msk.bf16.mxu0 %vm1949_vm0, %v1948_v2 }
  0x76   : >> { %1808 = vmatprep.mubr.msk.bf16.mxu1 %vm1949_vm0, %v1948_v2 }
  0x77   : >> { %1775 = vmatpush3.bf16.msra.mxu0 %v1907_v14 }
  0x78   : >> { %1795 = vmatpush3.bf16.msra.mxu1 %v1908_v15  ;;  %1776 = vmatprep.subr.bf16.mxu0 %v1948_v2 }
  0x79   : >> { %1796 = vmatprep.subr.bf16.mxu1 %v1948_v2 }
  0x7b   : >> { %1777 = vmatpush3.bf16.msra.mxu0 %v1909_v16 }
  0x7c   : >> { %1797 = vmatpush3.bf16.msra.mxu1 %v1910_v17  ;;  %1778 = vmatprep.subr.bf16.mxu0 %v1948_v2 }
  0x7d   : >> { %1798 = vmatprep.subr.bf16.mxu1 %v1948_v2 }
  0x7f   : >> { %1779 = vmatpush3.bf16.msra.mxu0 %v1911_v18 }
  0x80   : >> { %1799 = vmatpush3.bf16.msra.mxu1 %v1912_v19  ;;  %1780 = vmatprep.subr.bf16.mxu0 %v1948_v2 }
  0x81   : >> { %1800 = vmatprep.subr.bf16.mxu1 %v1948_v2 }
  0x83   : >> { %1781 = vmatpush3.bf16.msra.mxu0 %v1913_v20 }
  0x84   : >> { %1801 = vmatpush3.bf16.msra.mxu1 %v1914_v21  ;;  %1782 = vmatprep.subr.bf16.mxu0 %v1948_v2 }
  0x85   : >> { %1802 = vmatprep.subr.bf16.mxu1 %v1948_v2 }
  0x87   : >> { %1783 = vmatpush3.bf16.msra.mxu0 %v1915_v24 }
  0x88   : >> { %1803 = vmatpush3.bf16.msra.mxu1 %v1916_v26  ;;  %1784 = vmatprep.subr.bf16.mxu0 %v1948_v2 }
  0x89   : >> { %1804 = vmatprep.subr.bf16.mxu1 %v1948_v2 }
  0x8b   : >> { %1785 = vmatpush3.bf16.msra.mxu0 %v1917_v27 }
  0x8c   : >> { %1805 = vmatpush3.bf16.msra.mxu1 %v1918_v29  ;;  %1786 = vmatprep.subr.bf16.mxu0 %v1948_v2 }
  0x8d   : >> { %1806 = vmatprep.subr.bf16.mxu1 %v1948_v2 }
  0x8f   : >> { %1787 = vmatpush3.bf16.msra.mxu0 %v1919_v30 }
  0x90   : >> { %1807 = vmatpush3.bf16.msra.mxu1 %v1920_v34  ;;  %1812 = vmatprep.subr.bf16.mxu0 %v1948_v2 }
  0x92   : >> { %1789 = vmatmul.mubr.bf16.vlgmr.msra.gmra.mrb[12].mxu0 %v1499_v35 }
  0x93   : >> { %1813 = vmatpush3.bf16.msra.mxu0 %v1923_v36  ;;  %1809 = vmatmul.mubr.bf16.vlgmr.msra.gmra.mrb[12].mxu1 %v1028_v37 }
  0x94   : >> { %1814 = vmatprep.subr.bf16.mxu0 %v1948_v2  ;;  %1828 = vmatprep.mubr.msk.bf16.mxu0 %vm1949_vm0, %v1948_v2 }
  0x97   : >> { %1815 = vmatpush3.bf16.msra.mxu0 %v1924_v38 }
  0x98   : >> { %1816 = vmatprep.subr.bf16.mxu0 %v1948_v2 }
  0x9b   : >> { %1817 = vmatpush3.bf16.msra.mxu0 %v1925_v39 }
  0x9c   : >> { %1818 = vmatprep.subr.bf16.mxu0 %v1948_v2 }
  0x9f   : >> { %1819 = vmatpush3.bf16.msra.mxu0 %v1926_v40 }
  0xa0   : >> { %1820 = vmatprep.subr.bf16.mxu0 %v1948_v2 }
  0xa3   : >> { %1821 = vmatpush3.bf16.msra.mxu0 %v1927_v41 }
  0xa4   : >> { %1822 = vmatprep.subr.bf16.mxu0 %v1948_v2 }
  0xa7   : >> { %1823 = vmatpush3.bf16.msra.mxu0 %v1928_v42 }
  0xa8   : >> { %1824 = vmatprep.subr.bf16.mxu0 %v1948_v2 }
  0xab   : >> { %1825 = vmatpush3.bf16.msra.mxu0 %v1929_v43 }
  0xac   : >> { %1826 = vmatprep.subr.bf16.mxu0 %v1948_v2 }
  0xaf   : >> { %1827 = vmatpush3.bf16.msra.mxu0 %v1930_v46 }
  0xb2   : >> { %1829 = vmatmul.mubr.bf16.vlgmr.msra.gmra.mrb[16].mxu0 %v1142_v47 }
 0x105   : >> { %v313_v48 = vpop.f32.mrb[0].mxu0 }
 0x106   : >> { %v406_v49 = vpop.f32.mrb[0].mxu1  ;;  %v1670_v50 = vpop.f32.mrb[1].mxu0 }
 0x107   : >> { %v407_v51 = vadd.f32 %v406_v49, %v313_v48  ;;  %v1690_v52 = vpop.f32.mrb[1].mxu1  ;;  %v316_v53 = vpop.f32.mrb[2].mxu0 }
 0x108   : >> { %v409_v54 = vpop.f32.mrb[2].mxu1  ;;  %v1671_v55 = vpop.f32.mrb[3].mxu0 }
 0x109   : >> { %v410_v56 = vadd.f32 %v409_v54, %v316_v53  ;;  %v1691_v57 = vpop.f32.mrb[3].mxu1 }
 0x125   : >> { %v518_v58 = vpop.f32.mrb[4].mxu0 }
 0x126   : >> { %v525_v59 = vadd.f32 %v518_v58, %v407_v51  ;;  %v1710_v60 = vpop.f32.mrb[5].mxu0  ;;  %v638_v61 = vpop.f32.mrb[4].mxu1 }
 0x127   : >> { %v521_v62 = vpop.f32.mrb[6].mxu0  ;;  %v1730_v63 = vpop.f32.mrb[5].mxu1 }
 0x128   : >> { %v526_v2 = vadd.f32 %v521_v62, %v410_v56  ;;  %v645_v1 = vadd.f32 %v638_v61, %v525_v59  ;;  %v1711_v3 = vpop.f32.mrb[7].mxu0  ;;  %v641_v4 = vpop.f32.mrb[6].mxu1 }
 0x129   : >> { %v1731_v5 = vpop.f32.mrb[7].mxu1 }
 0x12a   : >> { %v646_v6 = vadd.f32 %v641_v4, %v526_v2 }
 0x145   : >> { %v758_v7 = vpop.f32.mrb[8].mxu0 }
 0x146   : >> { %v765_v8 = vadd.f32 %v758_v7, %v645_v1  ;;  %v1750_v9 = vpop.f32.mrb[9].mxu0  ;;  %v872_v10 = vpop.f32.mrb[8].mxu1 }
 0x147   : >> { %v761_v11 = vpop.f32.mrb[10].mxu0  ;;  %v1770_v12 = vpop.f32.mrb[9].mxu1 }
 0x148   : >> { %v766_v13 = vadd.f32 %v761_v11, %v646_v6  ;;  %v879_v14 = vadd.f32 %v872_v10, %v765_v8  ;;  %v1751_v15 = vpop.f32.mrb[11].mxu0  ;;  %v875_v16 = vpop.f32.mrb[10].mxu1 }
 0x149   : >> { %v1771_v17 = vpop.f32.mrb[11].mxu1 }
 0x14a   : >> { %v880_v18 = vadd.f32 %v875_v16, %v766_v13 }
 0x165   : >> { %v992_v19 = vpop.f32.mrb[12].mxu0 }
 0x166   : >> { %v999_v20 = vadd.f32 %v992_v19, %v879_v14  ;;  %v1790_v21 = vpop.f32.mrb[13].mxu0  ;;  %v1112_v22 = vpop.f32.mrb[12].mxu1 }
 0x167   : >> { %v995_v23 = vpop.f32.mrb[14].mxu0  ;;  %v1810_v24 = vpop.f32.mrb[13].mxu1 }
 0x168   : >> { %v1000_v25 = vadd.f32 %v995_v23, %v880_v18  ;;  %v1119_v26 = vadd.f32 %v1112_v22, %v999_v20  ;;  %v1791_v27 = vpop.f32.mrb[15].mxu0  ;;  %v1115_v28 = vpop.f32.mrb[14].mxu1 }
 0x169   : >> { %v1811_v29 = vpop.f32.mrb[15].mxu1 }
 0x16a   : >> { %v1120_v30 = vadd.f32 %v1115_v28, %v1000_v25 }
 0x185   : >> { %v1226_v31 = vpop.f32.mrb[16].mxu0 }
 0x186   : >> { %v1233_v32 = vadd.f32 %v1226_v31, %v1119_v26  ;;  %v1830_v33 = vpop.f32.mrb[17].mxu0 }
 0x187   : >> { %v1229_v34 = vpop.f32.mrb[18].mxu0 }
 0x188   : >> { %v1241_v35 = vadd.f32 %v1981_v0, %v1233_v32  ;;  %v1234_v36 = vadd.f32 %v1229_v34, %v1120_v30  ;;  %v1831_v37 = vpop.f32.mrb[19].mxu0 }
 0x18a   : >> { %vm1243_vm1 = vcmp.gt.f32.partialorder %v1241_v35, 0.0  ;;  %v1245_v38 = vmul.f32 0.1, %v1241_v35  ;;  %v1242_v39 = vadd.f32 %v1981_v0, %v1234_v36 }
 0x18b   : > { %177 = sbr.rel (!%p175_p4) target bundleno = 17 (0x11), region = 81 }
 0x18c   : >> { %v1247_v40 = vsel %vm1243_vm1, %v1241_v35, %v1245_v38  ;;  %vm1244_vm2 = vcmp.gt.f32.partialorder %v1242_v39, 0.0  ;;  %v1246_v41 = vmul.f32 0.1, %v1242_v39 }
 0x18d   : >> { %v1568_v42 = vpack.c.bf16 %v1247_v40, %v1247_v40 }
 0x18e   : >> { %v1248_v43 = vsel %vm1244_vm2, %v1242_v39, %v1246_v41 }
 0x18f   : >> { %1259 = vst [vmem:[%s1258_s16] sm:$0xf] %v1568_v42  ;;  %v1569_v44 = vpack.c.bf16 %v1248_v43, %v1248_v43 }
 0x191   : >> { %1260 = vst [vmem:[%s1258_s16 + $0x4] sm:$0x7] %v1569_v44 }
 0x192 PF: > { %s13_s12 = sadd.s32 1, %s1942_s12  }
 0x193   : > { %p10_p5 = scmp.ge.s32.totalorder %s13_s12, 4  }
 0x195   :  { %12 = sbr.rel (!%p10_p5) target bundleno = 1 (0x1), region = 92 }

// kernel: yolo_forward.10
= control target key start
LH: loop header
LB: loop body
LE: loop exit
PB: predicated region body
PF: predicated region fallthrough
CT: control target
= control target key end

     0   :  { %s1918_s12 = smov 0   ;;  %s2271_s0 = inlined_call_operand.vmem [shape: bf16[2,9,9,128], index: 0, kind: input, shape index: {}]   ;;  %s2272_s1 = inlined_call_operand.vmem [shape: bf16[9,128,128], index: 1, kind: input, shape index: {}]   ;;  %s2273_s2 = inlined_call_operand.vmem [shape: f32[1,128], index: 2, kind: input, shape index: {}]   ;;  %s2274_s3 = inlined_call_operand.vmem [shape: bf16[2,7,7,128], index: 3, kind: output, shape index: {}]  }
   0x1 LB: > { %s1293_s13 = sadd.s32 4294967295, %s1890_s12   ;;  %p1297_p0 = scmp.ge.s32.totalorder %s1890_s12, 1  ;;  %s1890_s12 = sphi %s1918_s12, %s13_s12  }
   0x2   : > { %p137_p1 = scmp.lt.s32.totalorder %s1890_s12, 3 }
   0x4   : > { %p138_p2 = pnand %p1297_p0, %p137_p1 }
   0x5   : > { %p161_p3 = scmp.lt.s32.totalorder (!%p138_p2), %s1293_s13, 1  ;;  %v1929_v0 = vld [vmem:[%s2273_s2] ss:$0 sm:$0xff] (!%p138_p2)  ;;  %s1941_s24 = smov (!%p138_p2), 0  }
   0x6   : > { %141 = sbr.rel (%p138_p2) target bundleno = 402 (0x192), region = 32 }
   0xd   : > { %s2276_s13 = smov (!%p161_p3, %s1293_s13), 1 }
   0xe   : > { %s1782_s16 = smul.u32 72, %s2276_s13 }
   0xf   : > { %s1783_s17 = smul.u32 28, %s2276_s13 }
  0x10   : > { %s1934_s20 = scalar_lea.vmem %s2271_s0, %s1782_s16 }
  0x11   : > { %s1939_s23 = scalar_lea.vmem %s2274_s3, %s1783_s17 }
  0x12 LB: >> { %v1802_v1 = vld [vmem:[%s2272_s1 + $0x40] sm:$0xff]   ;;  %v1896_v2 = vmov 0.0   ;;  %v1804_v4 = vld [vmem:[%s2272_s1 + $0x48] sm:$0xff]   ;;  %vm1897_vm0 = vmmov 0   ;;  %v1806_v6 = vld [vmem:[%s2272_s1 + $0x50] sm:$0xff]   ;;  %s1520_s13 = sshll.u32 %s1894_s24, 3  ;;  %s1894_s24 = sphi %s1941_s24, %s178_s24  }
  0x13   : >> { %1602 = vmatprep.subr.bf16.mxu0 %v1896_v2  ;;  %1622 = vmatprep.subr.bf16.mxu1 %v1896_v2  ;;  %v1803_v3 = vld [vmem:[%s2272_s1] sm:$0xff]   ;;  %v1805_v5 = vld [vmem:[%s2272_s1 + $0x8] sm:$0xff]   ;;  %v1807_v7 = vld [vmem:[%s2272_s1 + $0x10] sm:$0xff]   ;;  %s1984_s16 = scalar_lea.vmem %s1934_s20, %s1520_s13  ;;  %vm1217_vm1 = vcmask 1043456   ;;  %vm1218_vm2 = vsmask.f32 3328 }
  0x14   : >> { %1603 = vmatpush3.bf16.msra.mxu0 %v1802_v1  ;;  %1618 = vmatprep.mubr.msk.bf16.mxu0 %vm1897_vm0, %v1896_v2  ;;  %v1808_v8 = vld [vmem:[%s2272_s1 + $0x58] sm:$0xff]   ;;  %v1810_v10 = vld [vmem:[%s2272_s1 + $0x60] sm:$0xff]   ;;  %v1812_v14 = vld [vmem:[%s2272_s1 + $0x68] sm:$0xff]  }
  0x15   : >> { %1623 = vmatpush3.bf16.msra.mxu1 %v1803_v3  ;;  %1604 = vmatprep.subr.bf16.mxu0 %v1896_v2  ;;  %v1809_v9 = vld [vmem:[%s2272_s1 + $0x18] sm:$0xff]   ;;  %v1811_v11 = vld [vmem:[%s2272_s1 + $0x20] sm:$0xff]   ;;  %v1813_v15 = vld [vmem:[%s2272_s1 + $0x28] sm:$0xff]  }
  0x16   : >> { %1624 = vmatprep.subr.bf16.mxu1 %v1896_v2  ;;  %1638 = vmatprep.mubr.msk.bf16.mxu1 %vm1897_vm0, %v1896_v2  ;;  %v182_v12 = vld [vmem:[%s1984_s16] sm:$0xf]  ;;  %v1814_v17 = vld [vmem:[%s2272_s1 + $0x70] sm:$0xff]   ;;  %v1816_v21 = vld [vmem:[%s2272_s1 + $0x78] sm:$0xff]  }
  0x17   : >> { %v1318_v13 = vcombine.low %v182_v12, %v182_v12  ;;  %v1815_v18 = vld [vmem:[%s2272_s1 + $0x30] sm:$0xff]   ;;  %v1817_v22 = vld [vmem:[%s2272_s1 + $0x38] sm:$0xff]   ;;  %v1819_v24 = vld [vmem:[%s2272_s1 + $0x80] sm:$0xff]  }
  0x18   : >> { %1605 = vmatpush3.bf16.msra.mxu0 %v1804_v4  ;;  %v1820_v25 = vld [vmem:[%s2272_s1 + $0xc0] sm:$0xff]   ;;  %v1821_v26 = vld [vmem:[%s2272_s1 + $0x88] sm:$0xff]   ;;  %v1823_v28 = vld [vmem:[%s2272_s1 + $0x90] sm:$0xff]  }
  0x19   : >> { %1625 = vmatpush3.bf16.msra.mxu1 %v1805_v5  ;;  %1606 = vmatprep.subr.bf16.mxu0 %v1896_v2  ;;  %v222_v16 = vshll.u32 %v1318_v13, 16  ;;  %v220_v19 = vshrl.u32 %v1318_v13, 16  ;;  %v1822_v27 = vld [vmem:[%s2272_s1 + $0xc8] sm:$0xff]   ;;  %v1824_v29 = vld [vmem:[%s2272_s1 + $0xd0] sm:$0xff]   ;;  %v1825_v30 = vld [vmem:[%s2272_s1 + $0x98] sm:$0xff]  }
  0x1a   : >> { %1626 = vmatprep.subr.bf16.mxu1 %v1896_v2  ;;  %v1826_v31 = vld [vmem:[%s2272_s1 + $0xd8] sm:$0xff]   ;;  %v1827_v32 = vld [vmem:[%s2272_s1 + $0xa0] sm:$0xff]   ;;  %v1829_v34 = vld [vmem:[%s2272_s1 + $0xa8] sm:$0xff]  }
  0x1b   : >> { %v224_v20 = vrot.slane %v222_v16, 1  ;;  %v1828_v33 = vld [vmem:[%s2272_s1 + $0xe0] sm:$0xff]   ;;  %v1830_v35 = vld [vmem:[%s2272_s1 + $0xe8] sm:$0xff]   ;;  %v1831_v36 = vld [vmem:[%s2272_s1 + $0xb0] sm:$0xff]  }
  0x1c   : >> { %1607 = vmatpush3.bf16.msra.mxu0 %v1806_v6  ;;  %v1832_v37 = vld [vmem:[%s2272_s1 + $0xf0] sm:$0xff]   ;;  %v1835_v38 = vld [vmem:[%s1984_s16] sm:$0x1e]   ;;  %v1833_v39 = vld [vmem:[%s2272_s1 + $0xb8] sm:$0xff]  }
  0x1d   : >> { %1627 = vmatpush3.bf16.msra.mxu1 %v1807_v7  ;;  %1608 = vmatprep.subr.bf16.mxu0 %v1896_v2  ;;  %v225_v23 = vor.u32 %v224_v20, %v220_v19  ;;  %v1834_v40 = vld [vmem:[%s2272_s1 + $0xf8] sm:$0xff]   ;;  %v427_v41 = vrot.slane %v1835_v38, 1  ;;  %v1836_v42 = vld [vmem:[%s2272_s1 + $0x100] sm:$0xff]   ;;  %v1361_v43 = vld [vmem:[%s1984_s16 + $0x8] sm:$0xf] }
  0x1e   : >> { %1628 = vmatprep.subr.bf16.mxu1 %v1896_v2  ;;  %v1838_v44 = vld [vmem:[%s2272_s1 + $0x140] sm:$0xff]   ;;  %v1839_v45 = vld [vmem:[%s2272_s1 + $0x108] sm:$0xff]   ;;  %v1841_v47 = vld [vmem:[%s2272_s1 + $0x110] sm:$0xff]   ;;  %v1402_v53 = vcombine.low %v1361_v43, %v1361_v43 }
  0x1f   : >> { %v1840_v46 = vld [vmem:[%s2272_s1 + $0x148] sm:$0xff]   ;;  %v1842_v48 = vld [vmem:[%s2272_s1 + $0x150] sm:$0xff]   ;;  %v1843_v49 = vld [vmem:[%s2272_s1 + $0x118] sm:$0xff]  }
  0x20   : >> { %1609 = vmatpush3.bf16.msra.mxu0 %v1808_v8  ;;  %v1844_v50 = vld [vmem:[%s2272_s1 + $0x158] sm:$0xff]   ;;  %v1845_v51 = vld [vmem:[%s2272_s1 + $0x120] sm:$0xff]   ;;  %v1847_v54 = vld [vmem:[%s2272_s1 + $0x128] sm:$0xff]   ;;  %v652_v56 = vshll.u32 %v1402_v53, 16  ;;  %v650_v59 = vshrl.u32 %v1402_v53, 16 }
  0x21   : >> { %1629 = vmatpush3.bf16.msra.mxu1 %v1809_v9  ;;  %1610 = vmatprep.subr.bf16.mxu0 %v1896_v2  ;;  %v1846_v52 = vld [vmem:[%s2272_s1 + $0x160] sm:$0xff]   ;;  %v1848_v55 = vld [vmem:[%s2272_s1 + $0x168] sm:$0xff]   ;;  %v1849_v57 = vld [vmem:[%s2272_s1 + $0x130] sm:$0xff]  }
  0x22   : >> { %1630 = vmatprep.subr.bf16.mxu1 %v1896_v2  ;;  %v1850_v58 = vld [vmem:[%s2272_s1 + $0x170] sm:$0xff]   ;;  %v654_v60 = vrot.slane %v652_v56, 1  ;;  %v1851_v61 = vld [vmem:[%s2272_s1 + $0x138] sm:$0xff]   ;;  %v1854_v62 = vld [vmem:[%s1984_s16 + $0x8] sm:$0x1e]  }
  0x23   : >> { %v1852_v63 = vld [vmem:[%s2272_s1 + $0x178] sm:$0xff]   ;;  %v1853_v3 = vld [vmem:[%s2272_s1 + $0x180] sm:$0xff]   ;;  %v770_v4 = vrot.slane %v1854_v62, 1  ;;  %v1856_v6 = vld [vmem:[%s2272_s1 + $0x188] sm:$0xff]  }
  0x24   : >> { %1611 = vmatpush3.bf16.msra.mxu0 %v1810_v10  ;;  %v655_v1 = vor.u32 %v654_v60, %v650_v59  ;;  %v1855_v5 = vld [vmem:[%s2272_s1 + $0x1c0] sm:$0xff]   ;;  %v1857_v7 = vld [vmem:[%s2272_s1 + $0x1c8] sm:$0xff]   ;;  %v1858_v8 = vld [vmem:[%s2272_s1 + $0x190] sm:$0xff]  }
  0x25   : >> { %1631 = vmatpush3.bf16.msra.mxu1 %v1811_v11  ;;  %1612 = vmatprep.subr.bf16.mxu0 %v1896_v2  ;;  %v1859_v9 = vld [vmem:[%s2272_s1 + $0x1d0] sm:$0xff]   ;;  %v1860_v10 = vld [vmem:[%s2272_s1 + $0x198] sm:$0xff]   ;;  %v1863_v13 = vld [vmem:[%s2272_s1 + $0x1e0] sm:$0xff]  }
  0x26   : >> { %1632 = vmatprep.subr.bf16.mxu1 %v1896_v2  ;;  %v1861_v11 = vld [vmem:[%s2272_s1 + $0x1d8] sm:$0xff]   ;;  %v1867_v20 = vld [vmem:[%s2272_s1 + $0x1f0] sm:$0xff]   ;;  %vm1219_vm4 = vmand %vm1217_vm1, %vm1218_vm2 }
  0x28   : >> { %1613 = vmatpush3.bf16.msra.mxu0 %v1812_v14  ;;  %v1439_v14 = vld [vmem:[%s1984_s16 + $0x10] sm:$0xf] }
  0x29   : >> { %1633 = vmatpush3.bf16.msra.mxu1 %v1813_v15  ;;  %1614 = vmatprep.subr.bf16.mxu0 %v1896_v2  ;;  %v1864_v15 = vld [vmem:[%s2272_s1 + $0x1a8] sm:$0xff]   ;;  %v1480_v16 = vcombine.low %v1439_v14, %v1439_v14 }
  0x2a   : >> { %1634 = vmatprep.subr.bf16.mxu1 %v1896_v2 }
  0x2b   : >> { %v995_v19 = vshll.u32 %v1480_v16, 16 }
  0x2c   : >> { %1615 = vmatpush3.bf16.msra.mxu0 %v1814_v17  ;;  %v1865_v17 = vld [vmem:[%s2272_s1 + $0x1e8] sm:$0xff]  }
  0x2d   : >> { %1635 = vmatpush3.bf16.msra.mxu1 %v1815_v18  ;;  %1616 = vmatprep.subr.bf16.mxu0 %v1896_v2  ;;  %v1866_v18 = vld [vmem:[%s2272_s1 + $0x1b0] sm:$0xff]  }
  0x2e   : >> { %1636 = vmatprep.subr.bf16.mxu1 %v1896_v2 }
  0x30   : >> { %1617 = vmatpush3.bf16.msra.mxu0 %v1816_v21  ;;  %v1868_v21 = vld [vmem:[%s2272_s1 + $0x1b8] sm:$0xff]  }
  0x31   : >> { %1637 = vmatpush3.bf16.msra.mxu1 %v1817_v22  ;;  %1642 = vmatprep.subr.bf16.mxu0 %v1896_v2  ;;  %v993_v22 = vshrl.u32 %v1480_v16, 16 }
  0x32   : >> { %1662 = vmatprep.subr.bf16.mxu1 %v1896_v2 }
  0x33   : >> { %1619 = vmatmul.mubr.bf16.vlgmr.msra.gmra.mrb[0].mxu0 %v225_v23  ;;  %v997_v23 = vrot.slane %v995_v19, 1 }
  0x34   : >> { %1639 = vmatmul.mubr.bf16.vlgmr.msra.gmra.mrb[0].mxu1 %v182_v12  ;;  %1643 = vmatpush3.bf16.msra.mxu0 %v1819_v24  ;;  %v1862_v12 = vld [vmem:[%s2272_s1 + $0x1a0] sm:$0xff]   ;;  %v1869_v24 = vld [vmem:[%s2272_s1 + $0x1f8] sm:$0xff]  }
  0x35   : >> { %1663 = vmatpush3.bf16.msra.mxu1 %v1820_v25  ;;  %1644 = vmatprep.subr.bf16.mxu0 %v1896_v2  ;;  %v1871_v25 = vld [vmem:[%s2272_s1 + $0x200] sm:$0xff]  }
  0x36   : >> { %1664 = vmatprep.subr.bf16.mxu1 %v1896_v2  ;;  %1658 = vmatprep.mubr.msk.bf16.mxu0 %vm1897_vm0, %v1896_v2 }
  0x37   : >> { %1678 = vmatprep.mubr.msk.bf16.mxu1 %vm1897_vm0, %v1896_v2 }
  0x38   : >> { %1645 = vmatpush3.bf16.msra.mxu0 %v1821_v26  ;;  %v998_v26 = vor.u32 %v997_v23, %v993_v22 }
  0x39   : >> { %1665 = vmatpush3.bf16.msra.mxu1 %v1822_v27  ;;  %1646 = vmatprep.subr.bf16.mxu0 %v1896_v2  ;;  %v1872_v27 = vld [vmem:[%s2272_s1 + $0x208] sm:$0xff]  }
  0x3a   : >> { %1666 = vmatprep.subr.bf16.mxu1 %v1896_v2 }
  0x3c   : >> { %1647 = vmatpush3.bf16.msra.mxu0 %v1823_v28  ;;  %v1873_v28 = vld [vmem:[%s2272_s1 + $0x210] sm:$0xff]  }
  0x3d   : >> { %1667 = vmatpush3.bf16.msra.mxu1 %v1824_v29  ;;  %1648 = vmatprep.subr.bf16.mxu0 %v1896_v2  ;;  %v1874_v29 = vld [vmem:[%s2272_s1 + $0x218] sm:$0xff]  }
  0x3e   : >> { %1668 = vmatprep.subr.bf16.mxu1 %v1896_v2 }
  0x40   : >> { %1649 = vmatpush3.bf16.msra.mxu0 %v1825_v30  ;;  %v1875_v30 = vld [vmem:[%s2272_s1 + $0x220] sm:$0xff]  }
  0x41   : >> { %1669 = vmatpush3.bf16.msra.mxu1 %v1826_v31  ;;  %1650 = vmatprep.subr.bf16.mxu0 %v1896_v2  ;;  %v1876_v31 = vld [vmem:[%s2272_s1 + $0x228] sm:$0xff]  }
  0x42   : >> { %1670 = vmatprep.subr.bf16.mxu1 %v1896_v2 }
  0x44   : >> { %1651 = vmatpush3.bf16.msra.mxu0 %v1827_v32  ;;  %v1877_v32 = vld [vmem:[%s2272_s1 + $0x230] sm:$0xff]  }
  0x45   : >> { %1671 = vmatpush3.bf16.msra.mxu1 %v1828_v33  ;;  %1652 = vmatprep.subr.bf16.mxu0 %v1896_v2  ;;  %v1879_v33 = vld [vmem:[%s1984_s16 + $0x10] sm:$0x1e]   ;;  %s1517_s16 = sshll.u32 %s1894_s24, 2  ;;  %s178_s24 = sadd.s32 1, %s1894_s24  }
  0x46   : >> { %1672 = vmatprep.subr.bf16.mxu1 %v1896_v2  ;;  %s1216_s11 = scalar_lea.vmem %s1939_s23, %s1517_s16  ;;  %p175_p4 = scmp.ge.s32.totalorder %s178_s24, 7  }
  0x48   : >> { %1653 = vmatpush3.bf16.msra.mxu0 %v1829_v34  ;;  %v1878_v34 = vld [vmem:[%s2272_s1 + $0x238] sm:$0xff]  }
  0x49   : >> { %1673 = vmatpush3.bf16.msra.mxu1 %v1830_v35  ;;  %1654 = vmatprep.subr.bf16.mxu0 %v1896_v2  ;;  %v1113_v35 = vrot.slane %v1879_v33, 1 }
  0x4a   : >> { %1674 = vmatprep.subr.bf16.mxu1 %v1896_v2 }
  0x4c   : >> { %1655 = vmatpush3.bf16.msra.mxu0 %v1831_v36 }
  0x4d   : >> { %1675 = vmatpush3.bf16.msra.mxu1 %v1832_v37  ;;  %1656 = vmatprep.subr.bf16.mxu0 %v1896_v2 }
  0x4e   : >> { %1676 = vmatprep.subr.bf16.mxu1 %v1896_v2 }
  0x50   : >> { %1657 = vmatpush3.bf16.msra.mxu0 %v1833_v39 }
  0x51   : >> { %1677 = vmatpush3.bf16.msra.mxu1 %v1834_v40  ;;  %1682 = vmatprep.subr.bf16.mxu0 %v1896_v2 }
  0x52   : >> { %1702 = vmatprep.subr.bf16.mxu1 %v1896_v2 }
  0x53   : >> { %1659 = vmatmul.mubr.bf16.vlgmr.msra.gmra.mrb[4].mxu0 %v427_v41 }
  0x54   : >> { %1683 = vmatpush3.bf16.msra.mxu0 %v1836_v42  ;;  %1679 = vmatmul.mubr.bf16.vlgmr.msra.gmra.mrb[4].mxu1 %v1361_v43 }
  0x55   : >> { %1703 = vmatpush3.bf16.msra.mxu1 %v1838_v44  ;;  %1684 = vmatprep.subr.bf16.mxu0 %v1896_v2 }
  0x56   : >> { %1704 = vmatprep.subr.bf16.mxu1 %v1896_v2  ;;  %1698 = vmatprep.mubr.msk.bf16.mxu0 %vm1897_vm0, %v1896_v2 }
  0x57   : >> { %1718 = vmatprep.mubr.msk.bf16.mxu1 %vm1897_vm0, %v1896_v2 }
  0x58   : >> { %1685 = vmatpush3.bf16.msra.mxu0 %v1839_v45 }
  0x59   : >> { %1705 = vmatpush3.bf16.msra.mxu1 %v1840_v46  ;;  %1686 = vmatprep.subr.bf16.mxu0 %v1896_v2 }
  0x5a   : >> { %1706 = vmatprep.subr.bf16.mxu1 %v1896_v2 }
  0x5c   : >> { %1687 = vmatpush3.bf16.msra.mxu0 %v1841_v47 }
  0x5d   : >> { %1707 = vmatpush3.bf16.msra.mxu1 %v1842_v48  ;;  %1688 = vmatprep.subr.bf16.mxu0 %v1896_v2 }
  0x5e   : >> { %1708 = vmatprep.subr.bf16.mxu1 %v1896_v2 }
  0x60   : >> { %1689 = vmatpush3.bf16.msra.mxu0 %v1843_v49 }
  0x61   : >> { %1709 = vmatpush3.bf16.msra.mxu1 %v1844_v50  ;;  %1690 = vmatprep.subr.bf16.mxu0 %v1896_v2 }
  0x62   : >> { %1710 = vmatprep.subr.bf16.mxu1 %v1896_v2 }
  0x64   : >> { %1691 = vmatpush3.bf16.msra.mxu0 %v1845_v51 }
  0x65   : >> { %1711 = vmatpush3.bf16.msra.mxu1 %v1846_v52  ;;  %1692 = vmatprep.subr.bf16.mxu0 %v1896_v2 }
  0x66   : >> { %1712 = vmatprep.subr.bf16.mxu1 %v1896_v2 }
  0x68   : >> { %1693 = vmatpush3.bf16.msra.mxu0 %v1847_v54 }
  0x69   : >> { %1713 = vmatpush3.bf16.msra.mxu1 %v1848_v55  ;;  %1694 = vmatprep.subr.bf16.mxu0 %v1896_v2 }
  0x6a   : >> { %1714 = vmatprep.subr.bf16.mxu1 %v1896_v2 }
  0x6c   : >> { %1695 = vmatpush3.bf16.msra.mxu0 %v1849_v57 }
  0x6d   : >> { %1715 = vmatpush3.bf16.msra.mxu1 %v1850_v58  ;;  %1696 = vmatprep.subr.bf16.mxu0 %v1896_v2 }
  0x6e   : >> { %1716 = vmatprep.subr.bf16.mxu1 %v1896_v2 }
  0x70   : >> { %1697 = vmatpush3.bf16.msra.mxu0 %v1851_v61 }
  0x71   : >> { %1717 = vmatpush3.bf16.msra.mxu1 %v1852_v63  ;;  %1722 = vmatprep.subr.bf16.mxu0 %v1896_v2 }
  0x72   : >> { %1742 = vmatprep.subr.bf16.mxu1 %v1896_v2 }
  0x73   : >> { %1699 = vmatmul.mubr.bf16.vlgmr.msra.gmra.mrb[8].mxu0 %v655_v1 }
  0x74   : >> { %1723 = vmatpush3.bf16.msra.mxu0 %v1853_v3  ;;  %1719 = vmatmul.mubr.bf16.vlgmr.msra.gmra.mrb[8].mxu1 %v770_v4 }
  0x75   : >> { %1743 = vmatpush3.bf16.msra.mxu1 %v1855_v5  ;;  %1724 = vmatprep.subr.bf16.mxu0 %v1896_v2 }
  0x76   : >> { %1744 = vmatprep.subr.bf16.mxu1 %v1896_v2  ;;  %1738 = vmatprep.mubr.msk.bf16.mxu0 %vm1897_vm0, %v1896_v2 }
  0x77   : >> { %1758 = vmatprep.mubr.msk.bf16.mxu1 %vm1897_vm0, %v1896_v2 }
  0x78   : >> { %1725 = vmatpush3.bf16.msra.mxu0 %v1856_v6 }
  0x79   : >> { %1745 = vmatpush3.bf16.msra.mxu1 %v1857_v7  ;;  %1726 = vmatprep.subr.bf16.mxu0 %v1896_v2 }
  0x7a   : >> { %1746 = vmatprep.subr.bf16.mxu1 %v1896_v2 }
  0x7c   : >> { %1727 = vmatpush3.bf16.msra.mxu0 %v1858_v8 }
  0x7d   : >> { %1747 = vmatpush3.bf16.msra.mxu1 %v1859_v9  ;;  %1728 = vmatprep.subr.bf16.mxu0 %v1896_v2 }
  0x7e   : >> { %1748 = vmatprep.subr.bf16.mxu1 %v1896_v2 }
  0x80   : >> { %1729 = vmatpush3.bf16.msra.mxu0 %v1860_v10 }
  0x81   : >> { %1749 = vmatpush3.bf16.msra.mxu1 %v1861_v11  ;;  %1730 = vmatprep.subr.bf16.mxu0 %v1896_v2 }
  0x82   : >> { %1750 = vmatprep.subr.bf16.mxu1 %v1896_v2 }
  0x84   : >> { %1731 = vmatpush3.bf16.msra.mxu0 %v1862_v12 }
  0x85   : >> { %1751 = vmatpush3.bf16.msra.mxu1 %v1863_v13  ;;  %1732 = vmatprep.subr.bf16.mxu0 %v1896_v2 }
  0x86   : >> { %1752 = vmatprep.subr.bf16.mxu1 %v1896_v2 }
  0x88   : >> { %1733 = vmatpush3.bf16.msra.mxu0 %v1864_v15 }
  0x89   : >> { %1753 = vmatpush3.bf16.msra.mxu1 %v1865_v17  ;;  %1734 = vmatprep.subr.bf16.mxu0 %v1896_v2 }
  0x8a   : >> { %1754 = vmatprep.subr.bf16.mxu1 %v1896_v2 }
  0x8c   : >> { %1735 = vmatpush3.bf16.msra.mxu0 %v1866_v18 }
  0x8d   : >> { %1755 = vmatpush3.bf16.msra.mxu1 %v1867_v20  ;;  %1736 = vmatprep.subr.bf16.mxu0 %v1896_v2  ;;  %v1220_v20 = vld [vmem:[%s1216_s11] sm:$0xf] }
  0x8e   : >> { %1756 = vmatprep.subr.bf16.mxu1 %v1896_v2 }
  0x90   : >> { %1737 = vmatpush3.bf16.msra.mxu0 %v1868_v21 }
  0x91   : >> { %1757 = vmatpush3.bf16.msra.mxu1 %v1869_v24  ;;  %1762 = vmatprep.subr.bf16.mxu0 %v1896_v2 }
  0x93   : >> { %1739 = vmatmul.mubr.bf16.vlgmr.msra.gmra.mrb[12].mxu0 %v1439_v14 }
  0x94   : >> { %1763 = vmatpush3.bf16.msra.mxu0 %v1871_v25  ;;  %1759 = vmatmul.mubr.bf16.vlgmr.msra.gmra.mrb[12].mxu1 %v998_v26 }
  0x95   : >> { %1764 = vmatprep.subr.bf16.mxu0 %v1896_v2  ;;  %1778 = vmatprep.mubr.msk.bf16.mxu0 %vm1897_vm0, %v1896_v2 }
  0x98   : >> { %1765 = vmatpush3.bf16.msra.mxu0 %v1872_v27 }
  0x99   : >> { %1766 = vmatprep.subr.bf16.mxu0 %v1896_v2 }
  0x9c   : >> { %1767 = vmatpush3.bf16.msra.mxu0 %v1873_v28 }
  0x9d   : >> { %1768 = vmatprep.subr.bf16.mxu0 %v1896_v2 }
  0xa0   : >> { %1769 = vmatpush3.bf16.msra.mxu0 %v1874_v29 }
  0xa1   : >> { %1770 = vmatprep.subr.bf16.mxu0 %v1896_v2 }
  0xa4   : >> { %1771 = vmatpush3.bf16.msra.mxu0 %v1875_v30 }
  0xa5   : >> { %1772 = vmatprep.subr.bf16.mxu0 %v1896_v2 }
  0xa8   : >> { %1773 = vmatpush3.bf16.msra.mxu0 %v1876_v31 }
  0xa9   : >> { %1774 = vmatprep.subr.bf16.mxu0 %v1896_v2 }
  0xac   : >> { %1775 = vmatpush3.bf16.msra.mxu0 %v1877_v32 }
  0xad   : >> { %1776 = vmatprep.subr.bf16.mxu0 %v1896_v2 }
  0xb0   : >> { %1777 = vmatpush3.bf16.msra.mxu0 %v1878_v34 }
  0xb3   : >> { %1779 = vmatmul.mubr.bf16.vlgmr.msra.gmra.mrb[16].mxu0 %v1113_v35 }
 0x106   : >> { %v309_v36 = vpop.f32.mrb[0].mxu0 }
 0x107   : >> { %v1620_v37 = vpop.f32.mrb[1].mxu0  ;;  %v397_v38 = vpop.f32.mrb[0].mxu1 }
 0x108   : >> { %v398_v39 = vadd.f32 %v397_v38, %v309_v36  ;;  %v312_v40 = vpop.f32.mrb[2].mxu0  ;;  %v1640_v41 = vpop.f32.mrb[1].mxu1 }
 0x109   : >> { %v1621_v42 = vpop.f32.mrb[3].mxu0  ;;  %v400_v43 = vpop.f32.mrb[2].mxu1 }
 0x10a   : >> { %v1641_v44 = vpop.f32.mrb[3].mxu1 }
 0x126   : >> { %v511_v45 = vpop.f32.mrb[4].mxu0 }
 0x127   : >> { %v517_v46 = vadd.f32 %v511_v45, %v398_v39  ;;  %v1660_v47 = vpop.f32.mrb[5].mxu0  ;;  %v622_v48 = vpop.f32.mrb[4].mxu1 }
 0x128   : >> { %v514_v49 = vpop.f32.mrb[6].mxu0  ;;  %v1680_v50 = vpop.f32.mrb[5].mxu1 }
 0x129   : >> { %v628_v51 = vadd.f32 %v622_v48, %v517_v46  ;;  %v1661_v2 = vpop.f32.mrb[7].mxu0  ;;  %v625_v52 = vpop.f32.mrb[6].mxu1 }
 0x12a   : >> { %v1681_v53 = vpop.f32.mrb[7].mxu1 }
 0x146   : >> { %v739_v54 = vpop.f32.mrb[8].mxu0 }
 0x147   : >> { %v745_v55 = vadd.f32 %v739_v54, %v628_v51  ;;  %v1700_v56 = vpop.f32.mrb[9].mxu0  ;;  %v854_v57 = vpop.f32.mrb[8].mxu1 }
 0x148   : >> { %v742_v58 = vpop.f32.mrb[10].mxu0  ;;  %v1720_v59 = vpop.f32.mrb[9].mxu1 }
 0x149   : >> { %v860_v60 = vadd.f32 %v854_v57, %v745_v55  ;;  %v1701_v61 = vpop.f32.mrb[11].mxu0  ;;  %v857_v62 = vpop.f32.mrb[10].mxu1 }
 0x14a   : >> { %v1721_v63 = vpop.f32.mrb[11].mxu1 }
 0x166   : >> { %v965_v1 = vpop.f32.mrb[12].mxu0 }
 0x167   : >> { %v971_v3 = vadd.f32 %v965_v1, %v860_v60  ;;  %v1740_v4 = vpop.f32.mrb[13].mxu0  ;;  %v1082_v5 = vpop.f32.mrb[12].mxu1 }
 0x168   : >> { %v968_v6 = vpop.f32.mrb[14].mxu0  ;;  %v1760_v7 = vpop.f32.mrb[13].mxu1 }
 0x169   : >> { %v1088_v8 = vadd.f32 %v1082_v5, %v971_v3  ;;  %v1741_v9 = vpop.f32.mrb[15].mxu0  ;;  %v1085_v10 = vpop.f32.mrb[14].mxu1 }
 0x16a   : >> { %v1761_v11 = vpop.f32.mrb[15].mxu1 }
 0x186   : >> { %v1197_v12 = vpop.f32.mrb[16].mxu0 }
 0x187   : >> { %v1203_v13 = vadd.f32 %v1197_v12, %v1088_v8  ;;  %v1780_v14 = vpop.f32.mrb[17].mxu0 }
 0x188   : >> { %v1200_v15 = vpop.f32.mrb[18].mxu0 }
 0x189   : >> { %v1210_v16 = vadd.f32 %v1929_v0, %v1203_v13  ;;  %v1781_v17 = vpop.f32.mrb[19].mxu0 }
 0x18b   : >> { %vm1211_vm3 = vcmp.gt.f32.partialorder %v1210_v16, 0.0  ;;  %v1212_v18 = vmul.f32 0.1, %v1210_v16  ;;  %177 = sbr.rel (!%p175_p4) target bundleno = 18 (0x12), region = 81 }
 0x18d   : >> { %v1213_v19 = vsel %vm1211_vm3, %v1210_v16, %v1212_v18 }
 0x18e   : >> { %v1214_v21 = vpack.c.bf16 %v1213_v19, %v1213_v19 }
 0x190   : >> { %v1221_v22 = vsel %vm1219_vm4, %v1214_v21, %v1220_v20 }
 0x191   : >> { %1222 = vst [vmem:[%s1216_s11] sm:$0xf] %v1221_v22 }
 0x192 PF: > { %s13_s12 = sadd.s32 1, %s1890_s12  }
 0x193   : > { %p10_p5 = scmp.ge.s32.totalorder %s13_s12, 4  }
 0x195   :  { %12 = sbr.rel (!%p10_p5) target bundleno = 1 (0x1), region = 92 }

// kernel: yolo_forward.12
= control target key start
LH: loop header
LB: loop body
LE: loop exit
PB: predicated region body
PF: predicated region fallthrough
CT: control target
= control target key end

     0   :  { %s1733_s12 = smov 0   ;;  %s1735_s13 = smov 0   ;;  %s1925_s0 = inlined_call_operand.vmem [shape: bf16[2,6272], index: 0, kind: input, shape index: {}]   ;;  %s1926_s1 = inlined_call_operand.vmem [shape: bf16[6272,256], index: 1, kind: input, shape index: {}]   ;;  %s1927_s2 = inlined_call_operand.vmem [shape: f32[1,256], index: 2, kind: input, shape index: {}]   ;;  %s1928_s3 = inlined_call_operand.vmem [shape: bf16[2,256], index: 3, kind: output, shape index: {}]  }
   0x1   :  { %s1737_s14 = smov 0  }
   0x2 LB: > { %s25_s15 = sadd.s32 1, %s1703_s13  ;;  %p1354_p0 = scmp.ge.s32.totalorder %s1707_s14, 1  ;;  %s1707_s14 = sphi %s1737_s14, %s13_s14   ;;  %s1703_s13 = sphi %s1735_s13, %s1930_s13   ;;  %s1699_s12 = sphi %s1733_s12, %s1929_s12  }
   0x3   : > { %p26_p1 = scmp.ge.s32.totalorder %s25_s15, 7  ;;  %p193_p2 = scmp.lt.s32.totalorder %s1707_s14, 8 }
   0x5   : > { %s1932_s15 = smov (%p26_p1, %s25_s15), 0  ;;  %p194_p3 = pnand %p1354_p0, %p193_p2 }
   0x6   : > { %s237_s16 = smul.u32 (!%p194_p3), 7, %s1699_s12  ;;  %p1357_p6 = scmp.ne.s32.totalorder (!%p194_p3), %s1699_s12, 0 }
   0x7   : > { %197 = sbr.rel (%p194_p3) target bundleno = 392 (0x188), region = 32 }
   0x8   : > { %s246_s17 = smul.u32 (!%p194_p3), 112, %s1699_s12  ;;  %p240_p4 = scmp.lt.s32.totalorder (!%p194_p3), %s237_s16, 48 }
   0xa   : > { %p248_p5 = scmp.lt.s32.totalorder (!%p194_p3), %s246_s17, 783 }
   0xe   : > { %s1934_s16 = smov (!%p240_p4, %s237_s16), 48  ;;  %s1936_s17 = smov (!%p248_p5, %s246_s17), 783 }
   0xf   : > { %s244_s20 = scalar_lea.vmem %s1925_s0, %s1934_s16  ;;  %s1477_s21 = sshll.u32 %s1936_s17, 3  ;;  %v1709_v0 = vmov (!%p1357_p6), 0.0  }
  0x10   : > { %s1764_s24 = scalar_lea.vmem %s1926_s1, %s1477_s21  ;;  %276 = sbr.rel (%p1357_p6) target bundleno = 23 (0x17), region = 36  ;;  %277 = vst [vmem:[#allocation2] sm:$0xf] (!%p1357_p6), %v1709_v0 }
  0x17 PF: > { %v1516_v1 = vld [vmem:[%s1764_s24 + $0x4] ss:$8 sps:$4 sm:$0xff]   ;;  %v1520_v3 = vld [vmem:[%s1764_s24] ss:$8 sps:$4 sm:$0xff]   ;;  %v1522_v5 = vld [vmem:[%s1764_s24 + $0x14] ss:$8 sps:$4 sm:$0xff]   ;;  %v397_v39 = vlaneseq }
  0x18   : > { %v1518_v2 = vld [vmem:[%s1764_s24 + $0x204] ss:$8 sps:$4 sm:$0xff]   ;;  %1008 = vmatprep.subr.bf16.mxu1 %v1516_v1  ;;  %v1521_v4 = vld [vmem:[%s1764_s24 + $0x200] ss:$8 sps:$4 sm:$0xff]   ;;  %v1524_v6 = vld [vmem:[%s1764_s24 + $0x214] ss:$8 sps:$4 sm:$0xff]  }
  0x19   : > { %1090 = vmatprep.subr.bf16.mxu0 %v1518_v2  ;;  %1009 = vmatpush1.bf16.msra.mxu1 %v1520_v3  ;;  %v1526_v7 = vld [vmem:[%s1764_s24 + $0x10] ss:$8 sps:$4 sm:$0xff]   ;;  %v1528_v9 = vld [vmem:[%s1764_s24 + $0x24] ss:$8 sps:$4 sm:$0xff]   ;;  %v1532_v11 = vld [vmem:[%s1764_s24 + $0x20] ss:$8 sps:$4 sm:$0xff]  }
  0x1a   : > { %1091 = vmatpush1.bf16.msra.mxu0 %v1521_v4  ;;  %1010 = vmatprep.subr.bf16.mxu1 %v1522_v5  ;;  %v1527_v8 = vld [vmem:[%s1764_s24 + $0x210] ss:$8 sps:$4 sm:$0xff]   ;;  %v1530_v10 = vld [vmem:[%s1764_s24 + $0x224] ss:$8 sps:$4 sm:$0xff]   ;;  %v1533_v12 = vld [vmem:[%s1764_s24 + $0x220] ss:$8 sps:$4 sm:$0xff]  }
  0x1b   : > { %1092 = vmatprep.subr.bf16.mxu0 %v1524_v6  ;;  %v1534_v13 = vld [vmem:[%s1764_s24 + $0x34] ss:$8 sps:$4 sm:$0xff]   ;;  %v1538_v15 = vld [vmem:[%s1764_s24 + $0x30] ss:$8 sps:$4 sm:$0xff]   ;;  %v1540_v17 = vld [vmem:[%s1764_s24 + $0x44] ss:$8 sps:$4 sm:$0xff]  }
  0x1c   : > { %v1536_v14 = vld [vmem:[%s1764_s24 + $0x234] ss:$8 sps:$4 sm:$0xff]   ;;  %v1539_v16 = vld [vmem:[%s1764_s24 + $0x230] ss:$8 sps:$4 sm:$0xff]   ;;  %v1542_v18 = vld [vmem:[%s1764_s24 + $0x244] ss:$8 sps:$4 sm:$0xff]  }
  0x1d   : > { %1011 = vmatpush1.bf16.msra.mxu1 %v1526_v7  ;;  %v1544_v19 = vld [vmem:[%s1764_s24 + $0x40] ss:$8 sps:$4 sm:$0xff]   ;;  %v1546_v21 = vld [vmem:[%s1764_s24 + $0x54] ss:$8 sps:$4 sm:$0xff]   ;;  %v1550_v23 = vld [vmem:[%s1764_s24 + $0x50] ss:$8 sps:$4 sm:$0xff]  }
  0x1e   : > { %1093 = vmatpush1.bf16.msra.mxu0 %v1527_v8  ;;  %1012 = vmatprep.subr.bf16.mxu1 %v1528_v9  ;;  %v1545_v20 = vld [vmem:[%s1764_s24 + $0x240] ss:$8 sps:$4 sm:$0xff]   ;;  %v1548_v22 = vld [vmem:[%s1764_s24 + $0x254] ss:$8 sps:$4 sm:$0xff]   ;;  %v1551_v24 = vld [vmem:[%s1764_s24 + $0x250] ss:$8 sps:$4 sm:$0xff]  }
  0x1f   : > { %1094 = vmatprep.subr.bf16.mxu0 %v1530_v10  ;;  %v1552_v25 = vld [vmem:[%s1764_s24 + $0x64] ss:$8 sps:$4 sm:$0xff]   ;;  %v1556_v27 = vld [vmem:[%s1764_s24 + $0x60] ss:$8 sps:$4 sm:$0xff]   ;;  %v1558_v29 = vld [vmem:[%s1764_s24 + $0x74] ss:$8 sps:$4 sm:$0xff]  }
  0x20   : > { %v1554_v26 = vld [vmem:[%s1764_s24 + $0x264] ss:$8 sps:$4 sm:$0xff]   ;;  %v1557_v28 = vld [vmem:[%s1764_s24 + $0x260] ss:$8 sps:$4 sm:$0xff]   ;;  %v1560_v30 = vld [vmem:[%s1764_s24 + $0x274] ss:$8 sps:$4 sm:$0xff]  }
  0x21   : > { %1013 = vmatpush1.bf16.msra.mxu1 %v1532_v11  ;;  %v1562_v31 = vld [vmem:[%s1764_s24 + $0x70] ss:$8 sps:$4 sm:$0xff]   ;;  %v1564_v33 = vld [vmem:[%s1764_s24 + $0x84] ss:$8 sps:$4 sm:$0xff]   ;;  %v1568_v35 = vld [vmem:[%s1764_s24 + $0x80] ss:$8 sps:$4 sm:$0xff]  }
  0x22   : > { %1095 = vmatpush1.bf16.msra.mxu0 %v1533_v12  ;;  %1014 = vmatprep.subr.bf16.mxu1 %v1534_v13  ;;  %v1563_v32 = vld [vmem:[%s1764_s24 + $0x270] ss:$8 sps:$4 sm:$0xff]   ;;  %v1566_v34 = vld [vmem:[%s1764_s24 + $0x284] ss:$8 sps:$4 sm:$0xff]   ;;  %v1569_v36 = vld [vmem:[%s1764_s24 + $0x280] ss:$8 sps:$4 sm:$0xff]  }
  0x23   : > { %1096 = vmatprep.subr.bf16.mxu0 %v1536_v14  ;;  %v1710_v37 = vmov 1966171168   ;;  %v1570_v40 = vld [vmem:[%s1764_s24 + $0x94] ss:$8 sps:$4 sm:$0xff]   ;;  %v1574_v42 = vld [vmem:[%s1764_s24 + $0x90] ss:$8 sps:$4 sm:$0xff]  }
  0x24   : > { %v395_v38 = vunpack.c.l.s4 %v1710_v37  ;;  %v1572_v41 = vld [vmem:[%s1764_s24 + $0x294] ss:$8 sps:$4 sm:$0xff]   ;;  %v1806_v44 = vshrl.u32 %v397_v39, 7  ;;  %v1575_v45 = vld [vmem:[%s1764_s24 + $0x290] ss:$8 sps:$4 sm:$0xff]   ;;  %p1470_p7 = scmp.ne.s32.totalorder %s1699_s12, 6 }
  0x25   : > { %1015 = vmatpush1.bf16.msra.mxu1 %v1538_v15  ;;  %v1576_v46 = vld [vmem:[%s1764_s24 + $0xa4] ss:$8 sps:$4 sm:$0xff]   ;;  %v1580_v48 = vld [vmem:[%s1764_s24 + $0xa0] ss:$8 sps:$4 sm:$0xff]   ;;  %v1582_v51 = vld [vmem:[%s1764_s24 + $0xb4] ss:$8 sps:$4 sm:$0xff]  }
  0x26   : > { %1097 = vmatpush1.bf16.msra.mxu0 %v1539_v16  ;;  %1016 = vmatprep.subr.bf16.mxu1 %v1540_v17  ;;  %v396_v43 = vunpack.c.0.s8 %v395_v38  ;;  %v1578_v47 = vld [vmem:[%s1764_s24 + $0x2a4] ss:$8 sps:$4 sm:$0xff]   ;;  %v1581_v49 = vld [vmem:[%s1764_s24 + $0x2a0] ss:$8 sps:$4 sm:$0xff]   ;;  %v1584_v52 = vld [vmem:[%s1764_s24 + $0x2b4] ss:$8 sps:$4 sm:$0xff]  }
  0x27   : > { %1098 = vmatprep.subr.bf16.mxu0 %v1542_v18  ;;  %v279_v53 = vld [vmem:[%s244_s20] sm:$0x7f]  ;;  %v1586_v54 = vld [vmem:[%s1764_s24 + $0xb0] ss:$8 sps:$4 sm:$0xff]   ;;  %v1594_v2 = vld [vmem:[%s1764_s24 + $0xd4] ss:$8 sps:$4 sm:$0xff]  }
  0x28   : > { %v1814_v50 = vsub.s32 %v396_v43, %v1806_v44  ;;  %v393_v56 = vcombine.high %v279_v53, %v279_v53  ;;  %v1587_v57 = vld [vmem:[%s1764_s24 + $0x2b0] ss:$8 sps:$4 sm:$0xff]   ;;  %v1588_v58 = vld [vmem:[%s1764_s24 + $0xc4] ss:$8 sps:$4 sm:$0xff]   ;;  %v1592_v62 = vld [vmem:[%s1764_s24 + $0xc0] ss:$8 sps:$4 sm:$0xff]  }
  0x29   : > { %1017 = vmatpush1.bf16.msra.mxu1 %v1544_v19  ;;  %v1590_v59 = vld [vmem:[%s1764_s24 + $0x2c4] ss:$8 sps:$4 sm:$0xff]   ;;  %v1593_v1 = vld [vmem:[%s1764_s24 + $0x2c0] ss:$8 sps:$4 sm:$0xff]   ;;  %v1596_v3 = vld [vmem:[%s1764_s24 + $0x2d4] ss:$8 sps:$4 sm:$0xff]  }
  0x2a   : > { %1099 = vmatpush1.bf16.msra.mxu0 %v1545_v20  ;;  %1018 = vmatprep.subr.bf16.mxu1 %v1546_v21  ;;  %v400_v55 = vrot.slane %v279_v53, %v1814_v50  ;;  %v407_v61 = vrot.slane %v393_v56, %v1814_v50  ;;  %v1598_v5 = vld [vmem:[%s1764_s24 + $0xd0] ss:$8 sps:$4 sm:$0xff]   ;;  %v1600_v7 = vld [vmem:[%s1764_s24 + $0xe4] ss:$8 sps:$4 sm:$0xff]   ;;  %v1604_v9 = vld [vmem:[%s1764_s24 + $0xe0] ss:$8 sps:$4 sm:$0xff]  }
  0x2b   : > { %1100 = vmatprep.subr.bf16.mxu0 %v1548_v22  ;;  %v1599_v6 = vld [vmem:[%s1764_s24 + $0x2d0] ss:$8 sps:$4 sm:$0xff]   ;;  %v1602_v8 = vld [vmem:[%s1764_s24 + $0x2e4] ss:$8 sps:$4 sm:$0xff]   ;;  %v1605_v10 = vld [vmem:[%s1764_s24 + $0x2e0] ss:$8 sps:$4 sm:$0xff]  }
  0x2c   : > { %v408_v60 = vcombine.high %v400_v55, %v400_v55  ;;  %v409_v0 = vcombine.high %v407_v61, %v407_v61  ;;  %v1606_v11 = vld [vmem:[%s1764_s24 + $0xf4] ss:$8 sps:$4 sm:$0xff]   ;;  %v1610_v13 = vld [vmem:[%s1764_s24 + $0xf0] ss:$8 sps:$4 sm:$0xff]   ;;  %v1614_v15 = vld [vmem:[%s1764_s24 + $0x104] ss:$8 sps:$4 sm:$0xff]   ;;  %v1849_v18 = vrot.slane %v400_v55, %v1814_v50  ;;  %v1852_v19 = vrot.slane %v407_v61, %v1814_v50 }
  0x2d   : > { %1019 = vmatpush1.bf16.msra.mxu1 %v1550_v23  ;;  %v1608_v12 = vld [vmem:[%s1764_s24 + $0x2f4] ss:$8 sps:$4 sm:$0xff]   ;;  %v1611_v14 = vld [vmem:[%s1764_s24 + $0x2f0] ss:$8 sps:$4 sm:$0xff]   ;;  %v1618_v16 = vld [vmem:[%s1764_s24 + $0x304] ss:$8 sps:$4 sm:$0xff]  }
  0x2e   : > { %1101 = vmatpush1.bf16.msra.mxu0 %v1551_v24  ;;  %1020 = vmatprep.subr.bf16.mxu1 %v1552_v25  ;;  %v430_v63 = vrot.slane %v408_v60, %v1814_v50  ;;  %v437_v4 = vrot.slane %v409_v0, %v1814_v50  ;;  %v1612_v17 = vld [vmem:[%s1764_s24 + $0x100] ss:$8 sps:$4 sm:$0xff]   ;;  %v1621_v21 = vld [vmem:[%s1764_s24 + $0x114] ss:$8 sps:$4 sm:$0xff]   ;;  %v1619_v24 = vld [vmem:[%s1764_s24 + $0x110] ss:$8 sps:$4 sm:$0xff]  }
  0x2f   : > { %1102 = vmatprep.subr.bf16.mxu0 %v1554_v26  ;;  %v1616_v20 = vld [vmem:[%s1764_s24 + $0x300] ss:$8 sps:$4 sm:$0xff]   ;;  %v1624_v22 = vld [vmem:[%s1764_s24 + $0x314] ss:$8 sps:$4 sm:$0xff]   ;;  %v1622_v25 = vld [vmem:[%s1764_s24 + $0x310] ss:$8 sps:$4 sm:$0xff]  }
  0x30   : > { %1040 = vmatprep.mubr.bf16.mxu1 %v430_v63  ;;  %1122 = vmatprep.mubr.bf16.mxu0 %v437_v4  ;;  %v440_v23 = vcombine.high %v430_v63, %v430_v63  ;;  %v1627_v26 = vld [vmem:[%s1764_s24 + $0x124] ss:$8 sps:$4 sm:$0xff]   ;;  %v1637_v37 = vld [vmem:[%s1764_s24 + $0x140] ss:$8 sps:$4 sm:$0xff]   ;;  %v1645_v39 = vld [vmem:[%s1764_s24 + $0x154] ss:$8 sps:$4 sm:$0xff]  }
  0x31   : > { %1021 = vmatpush1.bf16.msra.mxu1 %v1556_v27  ;;  %v1630_v27 = vld [vmem:[%s1764_s24 + $0x324] ss:$8 sps:$4 sm:$0xff]   ;;  %v1640_v38 = vld [vmem:[%s1764_s24 + $0x340] ss:$8 sps:$4 sm:$0xff]   ;;  %v1666_v56 = vld [vmem:[%s1764_s24 + $0x194] ss:$8 sps:$4 sm:$0xff]  }
  0x32   : > { %1103 = vmatpush1.bf16.msra.mxu0 %v1557_v28  ;;  %1022 = vmatprep.subr.bf16.mxu1 %v1558_v29  ;;  %v1711_v28 = vmov 0   ;;  %v1625_v29 = vld [vmem:[%s1764_s24 + $0x120] ss:$8 sps:$4 sm:$0xff]   ;;  %v1651_v43 = vld [vmem:[%s1764_s24 + $0x164] ss:$8 sps:$4 sm:$0xff]  }
  0x33   : > { %1104 = vmatprep.subr.bf16.mxu0 %v1560_v30  ;;  %v1628_v30 = vld [vmem:[%s1764_s24 + $0x320] ss:$8 sps:$4 sm:$0xff]   ;;  %v1663_v53 = vld [vmem:[%s1764_s24 + $0x184] ss:$8 sps:$4 sm:$0xff]   ;;  %v1672_v60 = vld [vmem:[%s1764_s24 + $0x1b4] ss:$8 sps:$4 sm:$0xff]  }
  0x34   : > { %v1661_v55 = vld [vmem:[%s1764_s24 + $0x180] ss:$8 sps:$4 sm:$0xff]   ;;  %v1670_v61 = vld [vmem:[%s1764_s24 + $0x1b0] ss:$8 sps:$4 sm:$0xff]   ;;  %v1678_v0 = vld [vmem:[%s1764_s24 + $0x1d4] ss:$8 sps:$4 sm:$0xff]  }
  0x35   : > { %1023 = vmatpush1.bf16.msra.mxu1 %v1562_v31  ;;  %v1633_v31 = vld [vmem:[%s1764_s24 + $0x134] ss:$8 sps:$4 sm:$0xff]   ;;  %v1673_v63 = vld [vmem:[%s1764_s24 + $0x1c0] ss:$8 sps:$4 sm:$0xff]  }
  0x36   : > { %1105 = vmatpush1.bf16.msra.mxu0 %v1563_v32  ;;  %1024 = vmatprep.subr.bf16.mxu1 %v1564_v33  ;;  %v1636_v32 = vld [vmem:[%s1764_s24 + $0x334] ss:$8 sps:$4 sm:$0xff]   ;;  %v1631_v33 = vld [vmem:[%s1764_s24 + $0x130] ss:$8 sps:$4 sm:$0xff]  }
  0x37   : > { %1106 = vmatprep.subr.bf16.mxu0 %v1566_v34  ;;  %v1634_v34 = vld [vmem:[%s1764_s24 + $0x330] ss:$8 sps:$4 sm:$0xff]   ;;  %v1684_v4 = vld [vmem:[%s1764_s24 + $0x1f4] ss:$8 sps:$4 sm:$0xff]  }
  0x39   : > { %1025 = vmatpush1.bf16.msra.mxu1 %v1568_v35  ;;  %v1639_v35 = vld [vmem:[%s1764_s24 + $0x144] ss:$8 sps:$4 sm:$0xff]  }
  0x3a   : > { %1107 = vmatpush1.bf16.msra.mxu0 %v1569_v36  ;;  %1026 = vmatprep.subr.bf16.mxu1 %v1570_v40  ;;  %v1642_v36 = vld [vmem:[%s1764_s24 + $0x344] ss:$8 sps:$4 sm:$0xff]   ;;  %v1648_v40 = vld [vmem:[%s1764_s24 + $0x354] ss:$8 sps:$4 sm:$0xff]  }
  0x3b   : > { %1108 = vmatprep.subr.bf16.mxu0 %v1572_v41  ;;  %v1643_v41 = vld [vmem:[%s1764_s24 + $0x150] ss:$8 sps:$4 sm:$0xff]  }
  0x3d   : > { %1027 = vmatpush1.bf16.msra.mxu1 %v1574_v42  ;;  %v1646_v42 = vld [vmem:[%s1764_s24 + $0x350] ss:$8 sps:$4 sm:$0xff]  }
  0x3e   : > { %1109 = vmatpush1.bf16.msra.mxu0 %v1575_v45  ;;  %1028 = vmatprep.subr.bf16.mxu1 %v1576_v46  ;;  %v1654_v45 = vld [vmem:[%s1764_s24 + $0x364] ss:$8 sps:$4 sm:$0xff]   ;;  %v1649_v46 = vld [vmem:[%s1764_s24 + $0x160] ss:$8 sps:$4 sm:$0xff]  }
  0x3f   : > { %1110 = vmatprep.subr.bf16.mxu0 %v1578_v47  ;;  %v1652_v47 = vld [vmem:[%s1764_s24 + $0x360] ss:$8 sps:$4 sm:$0xff]  }
  0x41   : > { %1029 = vmatpush1.bf16.msra.mxu1 %v1580_v48  ;;  %v1657_v48 = vld [vmem:[%s1764_s24 + $0x174] ss:$8 sps:$4 sm:$0xff]  }
  0x42   : > { %1111 = vmatpush1.bf16.msra.mxu0 %v1581_v49  ;;  %1030 = vmatprep.subr.bf16.mxu1 %v1582_v51  ;;  %v1660_v49 = vld [vmem:[%s1764_s24 + $0x374] ss:$8 sps:$4 sm:$0xff]   ;;  %v1655_v51 = vld [vmem:[%s1764_s24 + $0x170] ss:$8 sps:$4 sm:$0xff]  }
  0x43   : > { %1112 = vmatprep.subr.bf16.mxu0 %v1584_v52  ;;  %v1658_v52 = vld [vmem:[%s1764_s24 + $0x370] ss:$8 sps:$4 sm:$0xff]  }
  0x45   : > { %1031 = vmatpush1.bf16.msra.mxu1 %v1586_v54  ;;  %v439_v54 = vcombine.high %v1852_v19, %v1852_v19 }
  0x46   : > { %1113 = vmatpush1.bf16.msra.mxu0 %v1587_v57  ;;  %1032 = vmatprep.subr.bf16.mxu1 %v1588_v58  ;;  %v1664_v57 = vld [vmem:[%s1764_s24 + $0x190] ss:$8 sps:$4 sm:$0xff]   ;;  %v1669_v58 = vld [vmem:[%s1764_s24 + $0x1a4] ss:$8 sps:$4 sm:$0xff]  }
  0x47   : > { %1114 = vmatprep.subr.bf16.mxu0 %v1590_v59  ;;  %v1667_v59 = vld [vmem:[%s1764_s24 + $0x1a0] ss:$8 sps:$4 sm:$0xff]  }
  0x49   : > { %1033 = vmatpush1.bf16.msra.mxu1 %v1592_v62  ;;  %v1675_v62 = vld [vmem:[%s1764_s24 + $0x1c4] ss:$8 sps:$4 sm:$0xff]  }
  0x4a   : > { %1115 = vmatpush1.bf16.msra.mxu0 %v1593_v1  ;;  %1034 = vmatprep.subr.bf16.mxu1 %v1594_v2  ;;  %v1676_v1 = vld [vmem:[%s1764_s24 + $0x1d0] ss:$8 sps:$4 sm:$0xff]   ;;  %v1681_v2 = vld [vmem:[%s1764_s24 + $0x1e4] ss:$8 sps:$4 sm:$0xff]  }
  0x4b   : > { %1116 = vmatprep.subr.bf16.mxu0 %v1596_v3  ;;  %v1679_v3 = vld [vmem:[%s1764_s24 + $0x1e0] ss:$8 sps:$4 sm:$0xff]  }
  0x4d   : > { %1035 = vmatpush1.bf16.msra.mxu1 %v1598_v5  ;;  %v1682_v5 = vld [vmem:[%s1764_s24 + $0x1f0] ss:$8 sps:$4 sm:$0xff]  }
  0x4e   : > { %1117 = vmatpush1.bf16.msra.mxu0 %v1599_v6  ;;  %1036 = vmatprep.subr.bf16.mxu1 %v1600_v7  ;;  %v438_v6 = vcombine.high %v1849_v18, %v1849_v18 }
  0x4f   : > { %1118 = vmatprep.subr.bf16.mxu0 %v1602_v8 }
  0x51   : > { %1037 = vmatpush1.bf16.msra.mxu1 %v1604_v9 }
  0x52   : > { %1119 = vmatpush1.bf16.msra.mxu0 %v1605_v10  ;;  %1038 = vmatprep.subr.bf16.mxu1 %v1606_v11  ;;  %v1712_v11 = vmov 1983009808  }
  0x53   : > { %1120 = vmatprep.subr.bf16.mxu0 %v1608_v12  ;;  %v1176_v12 = vunpack.c.l.s4 %v1712_v11 }
  0x55   : > { %1039 = vmatpush1.bf16.msra.mxu1 %v1610_v13  ;;  %v1177_v13 = vunpack.c.0.s8 %v1176_v12 }
  0x56   : > { %1121 = vmatpush1.bf16.msra.mxu0 %v1611_v14  ;;  %1049 = vmatprep.subr.bf16.mxu1 %v1614_v15 }
  0x57   : > { %1131 = vmatprep.subr.bf16.mxu0 %v1618_v16 }
  0x58   : > { %1041 = vmatmul.mubr.bf16.vlgmr.msra.gmra.mrb[0].mxu1 %v1849_v18 }
  0x59   : > { %1123 = vmatmul.mubr.bf16.vlgmr.msra.gmra.mrb[0].mxu0 %v1852_v19  ;;  %1050 = vmatpush1.bf16.msra.mxu1 %v1612_v17  ;;  %v1180_v19 = vsub.s32 %v1177_v13, %v1806_v44 }
  0x5a   : > { %1132 = vmatpush1.bf16.msra.mxu0 %v1616_v20  ;;  %1051 = vmatprep.subr.bf16.mxu1 %v1621_v21 }
  0x5b   : > { %1133 = vmatprep.subr.bf16.mxu0 %v1624_v22  ;;  %1163 = vmatprep.mubr.bf16.mxu0 %v1711_v28 }
  0x5c   : > { %1081 = vmatprep.mubr.bf16.mxu1 %v440_v23  ;;  %v278_v23 = vld [vmem:[#allocation2] sm:$0xf] }
  0x5d   : > { %1052 = vmatpush1.bf16.msra.mxu1 %v1619_v24 }
  0x5e   : > { %1134 = vmatpush1.bf16.msra.mxu0 %v1622_v25  ;;  %1053 = vmatprep.subr.bf16.mxu1 %v1627_v26  ;;  %v1190_v25 = vld [vmem:[%s1927_s2] sm:$0x3] (!%p1470_p7)  ;;  %v1194_v26 = vsub.s32 (!%p1470_p7), 0, %v1806_v44 }
  0x5f   : > { %1135 = vmatprep.subr.bf16.mxu0 %v1630_v27  ;;  %v1198_v27 = vsub.s32 (!%p1470_p7), 1, %v1806_v44 }
  0x60   : > { %v1195_v28 = vrot.slane (!%p1470_p7), %v1190_v25, %v1194_v26 }
  0x61   : > { %1054 = vmatpush1.bf16.msra.mxu1 %v1625_v29  ;;  %v1199_v29 = vrot.slane (!%p1470_p7), %v1190_v25, %v1198_v27 }
  0x62   : > { %1136 = vmatpush1.bf16.msra.mxu0 %v1628_v30  ;;  %1055 = vmatprep.subr.bf16.mxu1 %v1633_v31 }
  0x63   : > { %1137 = vmatprep.subr.bf16.mxu0 %v1636_v32  ;;  %v1200_v30 = vcombine.low (!%p1470_p7), %v1195_v28, %v1199_v29 }
  0x65   : > { %1056 = vmatpush1.bf16.msra.mxu1 %v1631_v33  ;;  %v1207_v32 = vrot.slane (!%p1470_p7), %v1200_v30, %v1180_v19 }
  0x66   : > { %1138 = vmatpush1.bf16.msra.mxu0 %v1634_v34  ;;  %1057 = vmatprep.subr.bf16.mxu1 %v1639_v35 }
  0x67   : > { %1139 = vmatprep.subr.bf16.mxu0 %v1642_v36 }
  0x69   : > { %1058 = vmatpush1.bf16.msra.mxu1 %v1637_v37 }
  0x6a   : > { %1140 = vmatpush1.bf16.msra.mxu0 %v1640_v38  ;;  %1059 = vmatprep.subr.bf16.mxu1 %v1645_v39 }
  0x6b   : > { %1141 = vmatprep.subr.bf16.mxu0 %v1648_v40 }
  0x6d   : > { %1060 = vmatpush1.bf16.msra.mxu1 %v1643_v41 }
  0x6e   : > { %1142 = vmatpush1.bf16.msra.mxu0 %v1646_v42  ;;  %1061 = vmatprep.subr.bf16.mxu1 %v1651_v43 }
  0x6f   : > { %1143 = vmatprep.subr.bf16.mxu0 %v1654_v45 }
  0x71   : > { %1062 = vmatpush1.bf16.msra.mxu1 %v1649_v46 }
  0x72   : > { %1144 = vmatpush1.bf16.msra.mxu0 %v1652_v47  ;;  %1063 = vmatprep.subr.bf16.mxu1 %v1657_v48 }
  0x73   : > { %1145 = vmatprep.subr.bf16.mxu0 %v1660_v49 }
  0x75   : > { %1064 = vmatpush1.bf16.msra.mxu1 %v1655_v51 }
  0x76   : > { %1146 = vmatpush1.bf16.msra.mxu0 %v1658_v52  ;;  %1065 = vmatprep.subr.bf16.mxu1 %v1663_v53 }
  0x79   : > { %1164 = vmatmul.mubr.bf16.vlgmr.msra.gmra.mrb[0].mxu0 %v439_v54  ;;  %1066 = vmatpush1.bf16.msra.mxu1 %v1661_v55 }
  0x7a   : > { %1067 = vmatprep.subr.bf16.mxu1 %v1666_v56 }
  0x7d   : > { %1068 = vmatpush1.bf16.msra.mxu1 %v1664_v57 }
  0x7e   : > { %1069 = vmatprep.subr.bf16.mxu1 %v1669_v58 }
  0x81   : > { %1070 = vmatpush1.bf16.msra.mxu1 %v1667_v59 }
  0x82   : > { %1071 = vmatprep.subr.bf16.mxu1 %v1672_v60 }
  0x85   : > { %1072 = vmatpush1.bf16.msra.mxu1 %v1670_v61 }
  0x86   : > { %1073 = vmatprep.subr.bf16.mxu1 %v1675_v62 }
  0x89   : > { %1074 = vmatpush1.bf16.msra.mxu1 %v1673_v63 }
  0x8a   : > { %1075 = vmatprep.subr.bf16.mxu1 %v1678_v0 }
  0x8d   : > { %1076 = vmatpush1.bf16.msra.mxu1 %v1676_v1 }
  0x8e   : > { %1077 = vmatprep.subr.bf16.mxu1 %v1681_v2 }
  0x91   : > { %1078 = vmatpush1.bf16.msra.mxu1 %v1679_v3 }
  0x92   : > { %1079 = vmatprep.subr.bf16.mxu1 %v1684_v4 }
  0x95   : > { %1080 = vmatpush1.bf16.msra.mxu1 %v1682_v5 }
  0x98   : > { %1082 = vmatmul.mubr.bf16.vlgmr.msra.gmra.mrb[0].mxu1 %v438_v6 }
 0x14c   : > { %v1165_v7 = vpop.f32.mrb[0].mxu0 }
 0x14d   : > { %v1167_v8 = vpop.f32.mrb[1].mxu0 }
 0x14e   : > { %v1169_v9 = vpop.f32.mrb[2].mxu0 }
 0x14f   : > { %v1170_v10 = vpop.f32.mrb[3].mxu0 }
 0x16b   : > { %v1083_v14 = vpop.f32.mrb[0].mxu1 }
 0x16c   : > { %v1478_v15 = vadd.f32 %v1165_v7, %v1083_v14  ;;  %v1085_v16 = vpop.f32.mrb[1].mxu1 }
 0x16d   : > { %v1479_v17 = vadd.f32 %v1167_v8, %v1085_v16  ;;  %v1087_v20 = vpop.f32.mrb[2].mxu1 }
 0x16e   : > { %v1088_v21 = vpop.f32.mrb[3].mxu1 }
 0x16f   : > { %v1174_v22 = vcombine.low %v1478_v15, %v1479_v17  ;;  %1188 = sbr.rel (%p1470_p7) target bundleno = 392 (0x188), region = 40 }
 0x171   : > { %v1181_v18 = vrot.slane %v1174_v22, %v1180_v19 }
 0x173   : > { %v1183_v24 = vadd.f32 %v1181_v18, %v278_v23 }
 0x175   : > { %1184 = vst [vmem:[#allocation2] sm:$0xf] %v1183_v24 }
 0x17c   : > { %v1189_v31 = vld [vmem:[#allocation2] sm:$0xf] }
 0x17d   : > { %v1209_v33 = vadd.f32 %v1207_v32, %v1189_v31 }
 0x17f   : > { %v1217_v34 = vrot.slane %v1209_v33, %v1180_v19 }
 0x181   : > { %v1218_v35 = vcombine.high %v1217_v34, %v1217_v34 }
 0x183   : > { %v1471_v36 = vpack.c.bf16 %v1218_v35, %v1217_v34 }
 0x185   : > { %v1232_v37 = vrot.slane %v1471_v36, %v1814_v50 }
 0x187   : > { %1472 = vst.sshfl [vmem:[%s1928_s3] sm:$0x5 pattern:$0x73625140] %v1232_v37 }
 0x188 PF: > { %s13_s14 = sadd.s32 1, %s1707_s14   ;;  %s1929_s12 = smov %s1703_s13 }
 0x189   : > { %p10_p8 = scmp.ge.s32.totalorder %s13_s14, 9   ;;  %s1930_s13 = smov %s1932_s15 }
 0x18b   :  { %12 = sbr.rel (!%p10_p8) target bundleno = 2 (0x2), region = 76 }

// kernel: yolo_forward.13
= control target key start
LH: loop header
LB: loop body
LE: loop exit
PB: predicated region body
PF: predicated region fallthrough
CT: control target
= control target key end

     0   :  { %s1384_s12 = smov 0   ;;  %s1386_s13 = smov 0   ;;  %s1674_s0 = inlined_call_operand.vmem [shape: bf16[2,256], index: 0, kind: input, shape index: {}]   ;;  %s1675_s1 = inlined_call_operand.vmem [shape: bf16[256,1536], index: 1, kind: input, shape index: {}]   ;;  %s1676_s2 = inlined_call_operand.vmem [shape: f32[1,1536], index: 2, kind: input, shape index: {}]   ;;  %s1677_s3 = inlined_call_operand.vmem [shape: f32[2,1536], index: 3, kind: output, shape index: {}]  }
   0x1   :  { %s1388_s14 = smov 0   ;;  %s1390_s15 = smov 0  }
   0x2   :  { %s1392_s16 = smov 0  }
   0x3 LB: > { %s28_s17 = sadd.s32 1, %s1356_s15  ;;  %p76_p1 = scmp.ne.s32.totalorder %s1348_s13, %s1344_s12  ;;  %s1360_s16 = sphi %s1392_s16, %s13_s16   ;;  %s1356_s15 = sphi %s1390_s15, %s1681_s15   ;;  %s1352_s14 = sphi %s1388_s14, %s1680_s14   ;;  %s1348_s13 = sphi %s1386_s13, %s1679_s13   ;;  %s1344_s12 = sphi %s1384_s12, %s1678_s12  }
   0x4   : > { %p30_p0 = scmp.ge.s32.totalorder %s28_s17, 3  ;;  %p77_p2 = scmp.eq.s32.totalorder %s1360_s16, 0 }
   0x5   : > { %s69_s19 = sadd.s32 1, %s1348_s13  ;;  %p1103_p5 = scmp.ge.s32.totalorder %s1360_s16, 3 }
   0x6   : > { %s1683_s17 = smov (%p30_p0, %s28_s17), 0  ;;  %p78_p3 = por %p77_p2, %p76_p1 }
   0x7   : > { %s65_s18 = ssub.s32 %s1356_s15, %s1683_s17  ;;  %168 = sbr.rel (%p1103_p5) target bundleno = 50 (0x32), region = 20 }
   0x8   : > { %p67_p4 = scmp.eq.s32.totalorder %s65_s18, 0 }
   0xa   : > { %s1419_s20 = scalar_select %p67_p4, %s1348_s13, %s69_s19  }
   0xe   : > { %171 = sbr.rel (!%p78_p3) target bundleno = 50 (0x32), region = 24  ;;  %s173_s21 = sand.u32 (%p78_p3), 1, %s1348_s13  }
   0xf   : > { %s1179_s22 = sshll.u32 (%p78_p3), %s1356_s15, 4  ;;  %s1104_s23 = sshll.u32 (%p78_p3), %s173_s21, 9 }
  0x10   : > { %s1427_s26 = scalar_lea.vmem (%p78_p3), %s1675_s1, %s1179_s22  ;;  %s1432_s27 = scalar_lea.vmem (%p78_p3), [#allocation3], %s1104_s23 }
  0x11   : > { %v194_v0 = vld [vmem:[%s1427_s26] sm:$0xff] (%p78_p3)  ;;  %v196_v1 = vld [vmem:[%s1427_s26 + $0x8] sm:$0xff] (%p78_p3)  ;;  %v198_v2 = vld [vmem:[%s1427_s26 + $0x30] sm:$0xff] (%p78_p3) }
  0x12   : > { %195 = vst [vmem:[%s1432_s27] sm:$0xff] (%p78_p3), %v194_v0  ;;  %197 = vst [vmem:[%s1432_s27 + $0x8] sm:$0xff] (%p78_p3), %v196_v1  ;;  %v200_v3 = vld [vmem:[%s1427_s26 + $0x38] sm:$0xff] (%p78_p3)  ;;  %v202_v4 = vld [vmem:[%s1427_s26 + $0x60] sm:$0xff] (%p78_p3) }
  0x13   : > { %199 = vst [vmem:[%s1432_s27 + $0x10] sm:$0xff] (%p78_p3), %v198_v2  ;;  %v204_v5 = vld [vmem:[%s1427_s26 + $0x68] sm:$0xff] (%p78_p3)  ;;  %201 = vst [vmem:[%s1432_s27 + $0x18] sm:$0xff] (%p78_p3), %v200_v3  ;;  %v206_v6 = vld [vmem:[%s1427_s26 + $0x90] sm:$0xff] (%p78_p3) }
  0x14   : > { %203 = vst [vmem:[%s1432_s27 + $0x20] sm:$0xff] (%p78_p3), %v202_v4  ;;  %205 = vst [vmem:[%s1432_s27 + $0x28] sm:$0xff] (%p78_p3), %v204_v5  ;;  %v208_v7 = vld [vmem:[%s1427_s26 + $0x98] sm:$0xff] (%p78_p3)  ;;  %v210_v8 = vld [vmem:[%s1427_s26 + $0xc0] sm:$0xff] (%p78_p3) }
  0x15   : > { %207 = vst [vmem:[%s1432_s27 + $0x30] sm:$0xff] %v206_v6  ;;  %209 = vst [vmem:[%s1432_s27 + $0x38] sm:$0xff] %v208_v7  ;;  %v212_v9 = vld [vmem:[%s1427_s26 + $0xc8] sm:$0xff]  ;;  %v214_v10 = vld [vmem:[%s1427_s26 + $0xf0] sm:$0xff] }
  0x16   : > { %211 = vst [vmem:[%s1432_s27 + $0x40] sm:$0xff] %v210_v8  ;;  %v216_v11 = vld [vmem:[%s1427_s26 + $0xf8] sm:$0xff]  ;;  %213 = vst [vmem:[%s1432_s27 + $0x48] sm:$0xff] %v212_v9  ;;  %v218_v12 = vld [vmem:[%s1427_s26 + $0x120] sm:$0xff] }
  0x17   : > { %215 = vst [vmem:[%s1432_s27 + $0x50] sm:$0xff] %v214_v10  ;;  %217 = vst [vmem:[%s1432_s27 + $0x58] sm:$0xff] %v216_v11  ;;  %v220_v13 = vld [vmem:[%s1427_s26 + $0x128] sm:$0xff]  ;;  %v222_v14 = vld [vmem:[%s1427_s26 + $0x150] sm:$0xff] }
  0x18   : > { %219 = vst [vmem:[%s1432_s27 + $0x60] sm:$0xff] %v218_v12  ;;  %221 = vst [vmem:[%s1432_s27 + $0x68] sm:$0xff] %v220_v13  ;;  %v224_v15 = vld [vmem:[%s1427_s26 + $0x158] sm:$0xff]  ;;  %v226_v16 = vld [vmem:[%s1427_s26 + $0x180] sm:$0xff] }
  0x19   : > { %223 = vst [vmem:[%s1432_s27 + $0x70] sm:$0xff] %v222_v14  ;;  %v228_v17 = vld [vmem:[%s1427_s26 + $0x188] sm:$0xff]  ;;  %225 = vst [vmem:[%s1432_s27 + $0x78] sm:$0xff] %v224_v15  ;;  %v230_v18 = vld [vmem:[%s1427_s26 + $0x1b0] sm:$0xff] }
  0x1a   : > { %227 = vst [vmem:[%s1432_s27 + $0x80] sm:$0xff] %v226_v16  ;;  %229 = vst [vmem:[%s1432_s27 + $0x88] sm:$0xff] %v228_v17  ;;  %v232_v19 = vld [vmem:[%s1427_s26 + $0x1b8] sm:$0xff]  ;;  %v234_v20 = vld [vmem:[%s1427_s26 + $0x1e0] sm:$0xff] }
  0x1b   : > { %231 = vst [vmem:[%s1432_s27 + $0x90] sm:$0xff] %v230_v18  ;;  %233 = vst [vmem:[%s1432_s27 + $0x98] sm:$0xff] %v232_v19  ;;  %v236_v21 = vld [vmem:[%s1427_s26 + $0x1e8] sm:$0xff]  ;;  %v238_v22 = vld [vmem:[%s1427_s26 + $0x210] sm:$0xff] }
  0x1c   : > { %235 = vst [vmem:[%s1432_s27 + $0xa0] sm:$0xff] %v234_v20  ;;  %v240_v23 = vld [vmem:[%s1427_s26 + $0x218] sm:$0xff]  ;;  %237 = vst [vmem:[%s1432_s27 + $0xa8] sm:$0xff] %v236_v21  ;;  %v242_v24 = vld [vmem:[%s1427_s26 + $0x240] sm:$0xff] }
  0x1d   : > { %239 = vst [vmem:[%s1432_s27 + $0xb0] sm:$0xff] %v238_v22  ;;  %241 = vst [vmem:[%s1432_s27 + $0xb8] sm:$0xff] %v240_v23  ;;  %v244_v25 = vld [vmem:[%s1427_s26 + $0x248] sm:$0xff]  ;;  %v246_v26 = vld [vmem:[%s1427_s26 + $0x270] sm:$0xff] }
  0x1e   : > { %243 = vst [vmem:[%s1432_s27 + $0xc0] sm:$0xff] %v242_v24  ;;  %245 = vst [vmem:[%s1432_s27 + $0xc8] sm:$0xff] %v244_v25  ;;  %v248_v27 = vld [vmem:[%s1427_s26 + $0x278] sm:$0xff]  ;;  %v250_v28 = vld [vmem:[%s1427_s26 + $0x2a0] sm:$0xff] }
  0x1f   : > { %247 = vst [vmem:[%s1432_s27 + $0xd0] sm:$0xff] %v246_v26  ;;  %v252_v29 = vld [vmem:[%s1427_s26 + $0x2a8] sm:$0xff]  ;;  %249 = vst [vmem:[%s1432_s27 + $0xd8] sm:$0xff] %v248_v27  ;;  %v254_v30 = vld [vmem:[%s1427_s26 + $0x2d0] sm:$0xff] }
  0x20   : > { %251 = vst [vmem:[%s1432_s27 + $0xe0] sm:$0xff] %v250_v28  ;;  %253 = vst [vmem:[%s1432_s27 + $0xe8] sm:$0xff] %v252_v29  ;;  %v256_v31 = vld [vmem:[%s1427_s26 + $0x2d8] sm:$0xff]  ;;  %v258_v32 = vld [vmem:[%s1427_s26 + $0x300] sm:$0xff] }
  0x21   : > { %255 = vst [vmem:[%s1432_s27 + $0xf0] sm:$0xff] %v254_v30  ;;  %257 = vst [vmem:[%s1432_s27 + $0xf8] sm:$0xff] %v256_v31  ;;  %v260_v33 = vld [vmem:[%s1427_s26 + $0x308] sm:$0xff]  ;;  %v262_v34 = vld [vmem:[%s1427_s26 + $0x330] sm:$0xff] }
  0x22   : > { %259 = vst [vmem:[%s1432_s27 + $0x100] sm:$0xff] %v258_v32  ;;  %v264_v35 = vld [vmem:[%s1427_s26 + $0x338] sm:$0xff]  ;;  %261 = vst [vmem:[%s1432_s27 + $0x108] sm:$0xff] %v260_v33  ;;  %v266_v36 = vld [vmem:[%s1427_s26 + $0x360] sm:$0xff] }
  0x23   : > { %263 = vst [vmem:[%s1432_s27 + $0x110] sm:$0xff] %v262_v34  ;;  %265 = vst [vmem:[%s1432_s27 + $0x118] sm:$0xff] %v264_v35  ;;  %v268_v37 = vld [vmem:[%s1427_s26 + $0x368] sm:$0xff]  ;;  %v270_v38 = vld [vmem:[%s1427_s26 + $0x390] sm:$0xff] }
  0x24   : > { %267 = vst [vmem:[%s1432_s27 + $0x120] sm:$0xff] %v266_v36  ;;  %269 = vst [vmem:[%s1432_s27 + $0x128] sm:$0xff] %v268_v37  ;;  %v272_v39 = vld [vmem:[%s1427_s26 + $0x398] sm:$0xff]  ;;  %v274_v40 = vld [vmem:[%s1427_s26 + $0x3c0] sm:$0xff] }
  0x25   : > { %271 = vst [vmem:[%s1432_s27 + $0x130] sm:$0xff] %v270_v38  ;;  %v276_v41 = vld [vmem:[%s1427_s26 + $0x3c8] sm:$0xff]  ;;  %273 = vst [vmem:[%s1432_s27 + $0x138] sm:$0xff] %v272_v39  ;;  %v278_v42 = vld [vmem:[%s1427_s26 + $0x3f0] sm:$0xff] }
  0x26   : > { %275 = vst [vmem:[%s1432_s27 + $0x140] sm:$0xff] %v274_v40  ;;  %277 = vst [vmem:[%s1432_s27 + $0x148] sm:$0xff] %v276_v41  ;;  %v280_v43 = vld [vmem:[%s1427_s26 + $0x3f8] sm:$0xff]  ;;  %v282_v44 = vld [vmem:[%s1427_s26 + $0x420] sm:$0xff] }
  0x27   : > { %279 = vst [vmem:[%s1432_s27 + $0x150] sm:$0xff] %v278_v42  ;;  %281 = vst [vmem:[%s1432_s27 + $0x158] sm:$0xff] %v280_v43  ;;  %v284_v45 = vld [vmem:[%s1427_s26 + $0x428] sm:$0xff]  ;;  %v286_v46 = vld [vmem:[%s1427_s26 + $0x450] sm:$0xff] }
  0x28   : > { %283 = vst [vmem:[%s1432_s27 + $0x160] sm:$0xff] %v282_v44  ;;  %v288_v47 = vld [vmem:[%s1427_s26 + $0x458] sm:$0xff]  ;;  %285 = vst [vmem:[%s1432_s27 + $0x168] sm:$0xff] %v284_v45  ;;  %v290_v48 = vld [vmem:[%s1427_s26 + $0x480] sm:$0xff] }
  0x29   : > { %287 = vst [vmem:[%s1432_s27 + $0x170] sm:$0xff] %v286_v46  ;;  %289 = vst [vmem:[%s1432_s27 + $0x178] sm:$0xff] %v288_v47  ;;  %v292_v49 = vld [vmem:[%s1427_s26 + $0x488] sm:$0xff]  ;;  %v294_v50 = vld [vmem:[%s1427_s26 + $0x4b0] sm:$0xff] }
  0x2a   : > { %291 = vst [vmem:[%s1432_s27 + $0x180] sm:$0xff] %v290_v48  ;;  %293 = vst [vmem:[%s1432_s27 + $0x188] sm:$0xff] %v292_v49  ;;  %v296_v51 = vld [vmem:[%s1427_s26 + $0x4b8] sm:$0xff]  ;;  %v298_v52 = vld [vmem:[%s1427_s26 + $0x4e0] sm:$0xff] }
  0x2b   : > { %295 = vst [vmem:[%s1432_s27 + $0x190] sm:$0xff] %v294_v50  ;;  %v300_v53 = vld [vmem:[%s1427_s26 + $0x4e8] sm:$0xff]  ;;  %297 = vst [vmem:[%s1432_s27 + $0x198] sm:$0xff] %v296_v51  ;;  %v302_v54 = vld [vmem:[%s1427_s26 + $0x510] sm:$0xff] }
  0x2c   : > { %299 = vst [vmem:[%s1432_s27 + $0x1a0] sm:$0xff] %v298_v52  ;;  %301 = vst [vmem:[%s1432_s27 + $0x1a8] sm:$0xff] %v300_v53  ;;  %v304_v55 = vld [vmem:[%s1427_s26 + $0x518] sm:$0xff]  ;;  %v306_v56 = vld [vmem:[%s1427_s26 + $0x540] sm:$0xff] }
  0x2d   : > { %303 = vst [vmem:[%s1432_s27 + $0x1b0] sm:$0xff] %v302_v54  ;;  %305 = vst [vmem:[%s1432_s27 + $0x1b8] sm:$0xff] %v304_v55  ;;  %v308_v57 = vld [vmem:[%s1427_s26 + $0x548] sm:$0xff]  ;;  %v310_v58 = vld [vmem:[%s1427_s26 + $0x570] sm:$0xff] }
  0x2e   : > { %307 = vst [vmem:[%s1432_s27 + $0x1c0] sm:$0xff] %v306_v56  ;;  %v312_v59 = vld [vmem:[%s1427_s26 + $0x578] sm:$0xff]  ;;  %309 = vst [vmem:[%s1432_s27 + $0x1c8] sm:$0xff] %v308_v57  ;;  %v314_v60 = vld [vmem:[%s1427_s26 + $0x5a0] sm:$0xff] }
  0x2f   : > { %311 = vst [vmem:[%s1432_s27 + $0x1d0] sm:$0xff] %v310_v58  ;;  %313 = vst [vmem:[%s1432_s27 + $0x1d8] sm:$0xff] %v312_v59  ;;  %v316_v61 = vld [vmem:[%s1427_s26 + $0x5a8] sm:$0xff]  ;;  %v318_v62 = vld [vmem:[%s1427_s26 + $0x5d0] sm:$0xff] }
  0x30   : > { %315 = vst [vmem:[%s1432_s27 + $0x1e0] sm:$0xff] %v314_v60  ;;  %317 = vst [vmem:[%s1432_s27 + $0x1e8] sm:$0xff] %v316_v61  ;;  %v320_v63 = vld [vmem:[%s1427_s26 + $0x5d8] sm:$0xff] }
  0x31   : > { %319 = vst [vmem:[%s1432_s27 + $0x1f0] sm:$0xff] %v318_v62  ;;  %321 = vst [vmem:[%s1432_s27 + $0x1f8] sm:$0xff] %v320_v63 }
  0x32 PF: > { %p1107_p6 = scmp.ge.s32.totalorder %s1360_s16, 1  ;;  %p334_p7 = scmp.lt.s32.totalorder %s1360_s16, 4 }
  0x34   : > { %p335_p8 = pnand %p1107_p6, %p334_p7 }
  0x35   : > { %s341_s28 = sand.u32 (!%p335_p8), 1, %s1344_s12   ;;  %v1565_v0 = vld.sshfl [vmem:[%s1674_s0] sm:$0x11 pattern:$0x75316420] (!%p335_p8)  ;;  %v489_v1 = vlaneseq (!%p335_p8)  ;;  %s1109_s6 = sshll.u32 (!%p335_p8), %s1352_s14, 2 }
  0x36   : > { %338 = sbr.rel (%p335_p8) target bundleno = 376 (0x178), region = 51  ;;  %s1108_s4 = sshll.u32 (!%p335_p8), %s341_s28, 9  ;;  %v1362_v2 = vmov (!%p335_p8), 1966171168   ;;  %v485_v7 = vcombine.high (!%p335_p8), %v1565_v0, %v1565_v0 }
  0x37   : > { %v487_v3 = vunpack.c.l.s4 (!%p335_p8), %v1362_v2  ;;  %v1567_v4 = vshrl.u32 (!%p335_p8), %v489_v1, 7  ;;  %s1569_s5 = scalar_lea.vmem (!%p335_p8), [#allocation3], %s1108_s4  ;;  %p392_p9 = scmp.lt.s32.totalorder (!%p335_p8), %s1109_s6, 11 }
  0x38   : > { %v1222_v5 = vld [vmem:[%s1569_s5 + $0x4] ss:$16 sps:$4 sm:$0xff] (!%p335_p8)   ;;  %v1224_v6 = vld [vmem:[%s1569_s5 + $0xc] ss:$16 sps:$4 sm:$0xff] (!%p335_p8)   ;;  %v1226_v9 = vld [vmem:[%s1569_s5] ss:$16 sps:$4 sm:$0xff] (!%p335_p8)  }
  0x39   : > { %v488_v8 = vunpack.c.0.s8 (!%p335_p8), %v487_v3  ;;  %822 = vmatprep.subr.bf16.mxu0 (!%p335_p8), %v1222_v5  ;;  %v1227_v10 = vld [vmem:[%s1569_s5 + $0x8] ss:$16 sps:$4 sm:$0xff] (!%p335_p8)   ;;  %863 = vmatprep.subr.bf16.mxu1 (!%p335_p8), %v1224_v6  ;;  %v1228_v11 = vld [vmem:[%s1569_s5 + $0x24] ss:$16 sps:$4 sm:$0xff] (!%p335_p8)   ;;  %v1230_v13 = vld [vmem:[%s1569_s5 + $0x2c] ss:$16 sps:$4 sm:$0xff] (!%p335_p8)  }
  0x3a   : > { %823 = vmatpush1.bf16.msra.mxu0 (!%p335_p8), %v1226_v9  ;;  %864 = vmatpush1.bf16.msra.mxu1 (!%p335_p8), %v1227_v10  ;;  %v1232_v14 = vld [vmem:[%s1569_s5 + $0x20] ss:$16 sps:$4 sm:$0xff] (!%p335_p8)   ;;  %v1233_v15 = vld [vmem:[%s1569_s5 + $0x28] ss:$16 sps:$4 sm:$0xff] (!%p335_p8)   ;;  %v1234_v17 = vld [vmem:[%s1569_s5 + $0x44] ss:$16 sps:$4 sm:$0xff] (!%p335_p8)  }
  0x3b   : > { %v1579_v12 = vsub.s32 (!%p335_p8), %v488_v8, %v1567_v4  ;;  %824 = vmatprep.subr.bf16.mxu0 (!%p335_p8), %v1228_v11  ;;  %865 = vmatprep.subr.bf16.mxu1 (!%p335_p8), %v1230_v13  ;;  %v1236_v18 = vld [vmem:[%s1569_s5 + $0x4c] ss:$16 sps:$4 sm:$0xff] (!%p335_p8)   ;;  %v1238_v19 = vld [vmem:[%s1569_s5 + $0x40] ss:$16 sps:$4 sm:$0xff] (!%p335_p8)   ;;  %v1239_v20 = vld [vmem:[%s1569_s5 + $0x48] ss:$16 sps:$4 sm:$0xff] (!%p335_p8)  }
  0x3c   : > { %v1240_v21 = vld [vmem:[%s1569_s5 + $0x64] ss:$16 sps:$4 sm:$0xff] (!%p335_p8)   ;;  %v1242_v22 = vld [vmem:[%s1569_s5 + $0x6c] ss:$16 sps:$4 sm:$0xff] (!%p335_p8)   ;;  %v1244_v23 = vld [vmem:[%s1569_s5 + $0x60] ss:$16 sps:$4 sm:$0xff] (!%p335_p8)  }
  0x3d   : > { %v499_v16 = vrot.slane %v485_v7, %v1579_v12  ;;  %v1245_v24 = vld [vmem:[%s1569_s5 + $0x68] ss:$16 sps:$4 sm:$0xff]   ;;  %v1246_v25 = vld [vmem:[%s1569_s5 + $0x84] ss:$16 sps:$4 sm:$0xff]   ;;  %v1248_v26 = vld [vmem:[%s1569_s5 + $0x8c] ss:$16 sps:$4 sm:$0xff]   ;;  %v492_v11 = vrot.slane %v1565_v0, %v1579_v12 }
  0x3e   : > { %825 = vmatpush1.bf16.msra.mxu0 %v1232_v14  ;;  %866 = vmatpush1.bf16.msra.mxu1 %v1233_v15  ;;  %v1250_v27 = vld [vmem:[%s1569_s5 + $0x80] ss:$16 sps:$4 sm:$0xff]   ;;  %v1251_v28 = vld [vmem:[%s1569_s5 + $0x88] ss:$16 sps:$4 sm:$0xff]   ;;  %v1252_v29 = vld [vmem:[%s1569_s5 + $0xa4] ss:$16 sps:$4 sm:$0xff]  }
  0x3f   : > { %854 = vmatprep.mubr.bf16.mxu0 %v499_v16  ;;  %895 = vmatprep.mubr.bf16.mxu1 %v499_v16  ;;  %v1254_v30 = vld [vmem:[%s1569_s5 + $0xac] ss:$16 sps:$4 sm:$0xff]   ;;  %v1256_v31 = vld [vmem:[%s1569_s5 + $0xa0] ss:$16 sps:$4 sm:$0xff]   ;;  %v1257_v32 = vld [vmem:[%s1569_s5 + $0xa8] ss:$16 sps:$4 sm:$0xff]  }
  0x40   : > { %826 = vmatprep.subr.bf16.mxu0 %v1234_v17  ;;  %867 = vmatprep.subr.bf16.mxu1 %v1236_v18  ;;  %v1258_v33 = vld [vmem:[%s1569_s5 + $0xc4] ss:$16 sps:$4 sm:$0xff]   ;;  %v1260_v34 = vld [vmem:[%s1569_s5 + $0xcc] ss:$16 sps:$4 sm:$0xff]   ;;  %v1262_v35 = vld [vmem:[%s1569_s5 + $0xc0] ss:$16 sps:$4 sm:$0xff]  }
  0x41   : > { %v1263_v36 = vld [vmem:[%s1569_s5 + $0xc8] ss:$16 sps:$4 sm:$0xff]   ;;  %v1264_v37 = vld [vmem:[%s1569_s5 + $0xe4] ss:$16 sps:$4 sm:$0xff]   ;;  %v1266_v38 = vld [vmem:[%s1569_s5 + $0xec] ss:$16 sps:$4 sm:$0xff]  }
  0x42   : > { %827 = vmatpush1.bf16.msra.mxu0 %v1238_v19  ;;  %868 = vmatpush1.bf16.msra.mxu1 %v1239_v20  ;;  %v1268_v39 = vld [vmem:[%s1569_s5 + $0xe0] ss:$16 sps:$4 sm:$0xff]   ;;  %v1269_v40 = vld [vmem:[%s1569_s5 + $0xe8] ss:$16 sps:$4 sm:$0xff]   ;;  %v1270_v41 = vld [vmem:[%s1569_s5 + $0x104] ss:$16 sps:$4 sm:$0xff]  }
  0x43   : > { %828 = vmatprep.subr.bf16.mxu0 %v1240_v21  ;;  %869 = vmatprep.subr.bf16.mxu1 %v1242_v22  ;;  %v1272_v42 = vld [vmem:[%s1569_s5 + $0x10c] ss:$16 sps:$4 sm:$0xff]   ;;  %v1274_v43 = vld [vmem:[%s1569_s5 + $0x100] ss:$16 sps:$4 sm:$0xff]   ;;  %v1275_v44 = vld [vmem:[%s1569_s5 + $0x108] ss:$16 sps:$4 sm:$0xff]  }
  0x44   : > { %v1276_v45 = vld [vmem:[%s1569_s5 + $0x124] ss:$16 sps:$4 sm:$0xff]   ;;  %v1278_v46 = vld [vmem:[%s1569_s5 + $0x12c] ss:$16 sps:$4 sm:$0xff]   ;;  %v1280_v47 = vld [vmem:[%s1569_s5 + $0x120] ss:$16 sps:$4 sm:$0xff]  }
  0x45   : > { %v1281_v48 = vld [vmem:[%s1569_s5 + $0x128] ss:$16 sps:$4 sm:$0xff]   ;;  %v1282_v49 = vld [vmem:[%s1569_s5 + $0x144] ss:$16 sps:$4 sm:$0xff]   ;;  %v1284_v50 = vld [vmem:[%s1569_s5 + $0x14c] ss:$16 sps:$4 sm:$0xff]  }
  0x46   : > { %829 = vmatpush1.bf16.msra.mxu0 %v1244_v23  ;;  %870 = vmatpush1.bf16.msra.mxu1 %v1245_v24  ;;  %v1286_v51 = vld [vmem:[%s1569_s5 + $0x140] ss:$16 sps:$4 sm:$0xff]   ;;  %v1287_v52 = vld [vmem:[%s1569_s5 + $0x148] ss:$16 sps:$4 sm:$0xff]   ;;  %v1288_v53 = vld [vmem:[%s1569_s5 + $0x164] ss:$16 sps:$4 sm:$0xff]  }
  0x47   : > { %830 = vmatprep.subr.bf16.mxu0 %v1246_v25  ;;  %871 = vmatprep.subr.bf16.mxu1 %v1248_v26  ;;  %v1290_v54 = vld [vmem:[%s1569_s5 + $0x16c] ss:$16 sps:$4 sm:$0xff]   ;;  %v1292_v55 = vld [vmem:[%s1569_s5 + $0x160] ss:$16 sps:$4 sm:$0xff]   ;;  %v1293_v56 = vld [vmem:[%s1569_s5 + $0x168] ss:$16 sps:$4 sm:$0xff]  }
  0x48   : > { %v1294_v57 = vld [vmem:[%s1569_s5 + $0x184] ss:$16 sps:$4 sm:$0xff]   ;;  %v1296_v58 = vld [vmem:[%s1569_s5 + $0x18c] ss:$16 sps:$4 sm:$0xff]   ;;  %v1298_v59 = vld [vmem:[%s1569_s5 + $0x180] ss:$16 sps:$4 sm:$0xff]  }
  0x49   : > { %v1299_v60 = vld [vmem:[%s1569_s5 + $0x188] ss:$16 sps:$4 sm:$0xff]   ;;  %v1300_v61 = vld [vmem:[%s1569_s5 + $0x1a4] ss:$16 sps:$4 sm:$0xff]   ;;  %v1302_v62 = vld [vmem:[%s1569_s5 + $0x1ac] ss:$16 sps:$4 sm:$0xff]  }
  0x4a   : > { %831 = vmatpush1.bf16.msra.mxu0 %v1250_v27  ;;  %872 = vmatpush1.bf16.msra.mxu1 %v1251_v28  ;;  %v1304_v63 = vld [vmem:[%s1569_s5 + $0x1a0] ss:$16 sps:$4 sm:$0xff]   ;;  %v1305_v1 = vld [vmem:[%s1569_s5 + $0x1a8] ss:$16 sps:$4 sm:$0xff]   ;;  %v1306_v2 = vld [vmem:[%s1569_s5 + $0x1c4] ss:$16 sps:$4 sm:$0xff]  }
  0x4b   : > { %832 = vmatprep.subr.bf16.mxu0 %v1252_v29  ;;  %873 = vmatprep.subr.bf16.mxu1 %v1254_v30  ;;  %v1308_v3 = vld [vmem:[%s1569_s5 + $0x1cc] ss:$16 sps:$4 sm:$0xff]   ;;  %v1310_v5 = vld [vmem:[%s1569_s5 + $0x1c0] ss:$16 sps:$4 sm:$0xff]   ;;  %v1311_v6 = vld [vmem:[%s1569_s5 + $0x1c8] ss:$16 sps:$4 sm:$0xff]  }
  0x4c   : > { %v1312_v7 = vld [vmem:[%s1569_s5 + $0x1e4] ss:$16 sps:$4 sm:$0xff]   ;;  %v1314_v8 = vld [vmem:[%s1569_s5 + $0x1ec] ss:$16 sps:$4 sm:$0xff]   ;;  %v1316_v9 = vld [vmem:[%s1569_s5 + $0x1e0] ss:$16 sps:$4 sm:$0xff]  }
  0x4d   : > { %v1317_v10 = vld [vmem:[%s1569_s5 + $0x1e8] ss:$16 sps:$4 sm:$0xff]   ;;  %s1685_s6 = smov (!%p392_p9, %s1109_s6), 11  ;;  %v1363_v13 = vmov 1983009808   ;;  %v936_v15 = vsub.s32 0, %v1567_v4 }
  0x4e   : > { %833 = vmatpush1.bf16.msra.mxu0 %v1256_v31  ;;  %874 = vmatpush1.bf16.msra.mxu1 %v1257_v32  ;;  %s394_s9 = scalar_lea.vmem %s1676_s2, %s1685_s6  ;;  %v911_v14 = vunpack.c.l.s4 %v1363_v13  ;;  %v940_v16 = vsub.s32 1, %v1567_v4  ;;  %v944_v0 = vsub.s32 2, %v1567_v4  ;;  %v948_v12 = vsub.s32 3, %v1567_v4  ;;  %s1111_s10 = sshll.u32 %s1685_s6, 1 }
  0x4f   : > { %834 = vmatprep.subr.bf16.mxu0 %v1258_v33  ;;  %875 = vmatprep.subr.bf16.mxu1 %v1260_v34  ;;  %v932_v17 = vld [vmem:[%s394_s9] sm:$0xf]  ;;  %s404_s14 = scalar_lea.vmem %s1677_s3, %s1111_s10 }
  0x50   : > { %v912_v18 = vunpack.c.0.s8 %v911_v14  ;;  %v937_v19 = vrot.slane %v932_v17, %v936_v15  ;;  %v941_v20 = vrot.slane %v932_v17, %v940_v16  ;;  %v945_v21 = vrot.slane %v932_v17, %v944_v0 }
  0x51   : > { %v949_v22 = vrot.slane %v932_v17, %v948_v12 }
  0x52   : > { %835 = vmatpush1.bf16.msra.mxu0 %v1262_v35  ;;  %876 = vmatpush1.bf16.msra.mxu1 %v1263_v36  ;;  %v915_v23 = vsub.s32 %v912_v18, %v1567_v4  ;;  %v950_v24 = vcombine.low %v937_v19, %v941_v20 }
  0x53   : > { %836 = vmatprep.subr.bf16.mxu0 %v1264_v37  ;;  %877 = vmatprep.subr.bf16.mxu1 %v1266_v38  ;;  %v951_v25 = vcombine.low %v945_v21, %v949_v22 }
  0x54   : > { %v958_v28 = vrot.slane %v950_v24, %v915_v23 }
  0x55   : > { %v965_v29 = vrot.slane %v951_v25, %v915_v23 }
  0x56   : > { %837 = vmatpush1.bf16.msra.mxu0 %v1268_v39  ;;  %878 = vmatpush1.bf16.msra.mxu1 %v1269_v40 }
  0x57   : > { %838 = vmatprep.subr.bf16.mxu0 %v1270_v41  ;;  %879 = vmatprep.subr.bf16.mxu1 %v1272_v42  ;;  %v966_v40 = vcombine.low %v958_v28, %v965_v29 }
  0x5a   : > { %839 = vmatpush1.bf16.msra.mxu0 %v1274_v43  ;;  %880 = vmatpush1.bf16.msra.mxu1 %v1275_v44 }
  0x5b   : > { %840 = vmatprep.subr.bf16.mxu0 %v1276_v45  ;;  %881 = vmatprep.subr.bf16.mxu1 %v1278_v46 }
  0x5e   : > { %841 = vmatpush1.bf16.msra.mxu0 %v1280_v47  ;;  %882 = vmatpush1.bf16.msra.mxu1 %v1281_v48 }
  0x5f   : > { %842 = vmatprep.subr.bf16.mxu0 %v1282_v49  ;;  %883 = vmatprep.subr.bf16.mxu1 %v1284_v50 }
  0x62   : > { %843 = vmatpush1.bf16.msra.mxu0 %v1286_v51  ;;  %884 = vmatpush1.bf16.msra.mxu1 %v1287_v52 }
  0x63   : > { %844 = vmatprep.subr.bf16.mxu0 %v1288_v53  ;;  %885 = vmatprep.subr.bf16.mxu1 %v1290_v54 }
  0x66   : > { %845 = vmatpush1.bf16.msra.mxu0 %v1292_v55  ;;  %886 = vmatpush1.bf16.msra.mxu1 %v1293_v56 }
  0x67   : > { %846 = vmatprep.subr.bf16.mxu0 %v1294_v57  ;;  %887 = vmatprep.subr.bf16.mxu1 %v1296_v58 }
  0x6a   : > { %847 = vmatpush1.bf16.msra.mxu0 %v1298_v59  ;;  %888 = vmatpush1.bf16.msra.mxu1 %v1299_v60 }
  0x6b   : > { %848 = vmatprep.subr.bf16.mxu0 %v1300_v61  ;;  %889 = vmatprep.subr.bf16.mxu1 %v1302_v62 }
  0x6e   : > { %849 = vmatpush1.bf16.msra.mxu0 %v1304_v63  ;;  %890 = vmatpush1.bf16.msra.mxu1 %v1305_v1 }
  0x6f   : > { %850 = vmatprep.subr.bf16.mxu0 %v1306_v2  ;;  %891 = vmatprep.subr.bf16.mxu1 %v1308_v3 }
  0x72   : > { %851 = vmatpush1.bf16.msra.mxu0 %v1310_v5  ;;  %892 = vmatpush1.bf16.msra.mxu1 %v1311_v6 }
  0x73   : > { %852 = vmatprep.subr.bf16.mxu0 %v1312_v7  ;;  %893 = vmatprep.subr.bf16.mxu1 %v1314_v8 }
  0x76   : > { %853 = vmatpush1.bf16.msra.mxu0 %v1316_v9  ;;  %894 = vmatpush1.bf16.msra.mxu1 %v1317_v10 }
  0x79   : > { %855 = vmatmul.mubr.bf16.vlgmr.msra.gmra.mrb[0].mxu0 %v492_v11  ;;  %896 = vmatmul.mubr.bf16.vlgmr.msra.gmra.mrb[0].mxu1 %v492_v11 }
 0x14c   : > { %v856_v26 = vpop.f32.mrb[0].mxu0  ;;  %v897_v27 = vpop.f32.mrb[0].mxu1 }
 0x14d   : > { %v858_v30 = vpop.f32.mrb[1].mxu0  ;;  %v899_v31 = vpop.f32.mrb[1].mxu1 }
 0x14e   : > { %v908_v32 = vcombine.low %v856_v26, %v858_v30  ;;  %v909_v33 = vcombine.low %v897_v27, %v899_v31  ;;  %v860_v34 = vpop.f32.mrb[2].mxu0  ;;  %v901_v35 = vpop.f32.mrb[2].mxu1 }
 0x14f   : > { %v861_v36 = vpop.f32.mrb[3].mxu0  ;;  %v902_v37 = vpop.f32.mrb[3].mxu1 }
 0x150   : > { %v916_v38 = vrot.slane %v908_v32, %v915_v23  ;;  %v923_v39 = vrot.slane %v909_v33, %v915_v23 }
 0x152   : > { %v924_v41 = vcombine.low %v916_v38, %v923_v39 }
 0x154   : > { %v968_v4 = vadd.f32 %v966_v40, %v924_v41 }
 0x156   : > { %v969_v42 = vand.u32 2147483647, %v968_v4  ;;  %vm975_vm0 = vcmp.ge.f32.partialorder %v968_v4, 0.0 }
 0x158   : > { %v970_v43 = vsub.f32 0.0, %v969_v42 }
 0x15a   : > { %v971_v44 = vmul.f32 1.442695, %v970_v43 }
 0x15c   : > { %1318 = vpow2.f32 %v971_v44 }
 0x166   : > { %v1319_v45 = vpop.eup %1318 }
 0x167   : > { %v973_v46 = vadd.f32 1.0, %v1319_v45 }
 0x169   : > { %1320 = vrcp.f32 %v973_v46 }
 0x173   : > { %v1321_v47 = vpop.eup %1320 }
 0x174   : > { %v976_v48 = vsub.f32 1.0, %v1321_v47 }
 0x176   : > { %v977_v49 = vsel %vm975_vm0, %v1321_v47, %v976_v48 }
 0x177   : > { %978 = vst [vmem:[%s404_s14] sm:$0xff] %v977_v49 }
 0x178 PF: > { %s13_s16 = sadd.s32 1, %s1360_s16   ;;  %s1678_s12 = smov %s1348_s13 }
 0x179   : > { %p10_p10 = scmp.ge.s32.totalorder %s13_s16, 5   ;;  %s1679_s13 = smov %s1419_s20 }
 0x17a   : > { %s1680_s14 = smov %s1356_s15  ;;  %s1681_s15 = smov %s1683_s17 }
 0x17b   :  { %12 = sbr.rel (!%p10_p10) target bundleno = 3 (0x3), region = 104 }

</bundles_post_ra>
